<compile_context>
chip_gen: v7x
topology: tpu7x:2x2x1
jax: 0.10.0
libtpu: 0.0.40
codegen_flags: <defaults>
</compile_context>

<pallas_src>
import functools

import jax
import jax.numpy as jnp
from jax import lax
from jax.experimental import pallas as pl
from jax.experimental.pallas import tpu as pltpu


_SQRT_2_OVER_PI = 0.7978845608028654


def _gelu_tanh(x):
    # TODO(synk): PyTorch nn.GELU defaults to the exact erf form; the tanh approximation
    # is used because erf has no guaranteed Pallas/Mosaic lowering (~1e-3 deviation).
    return 0.5 * x * (1.0 + jnp.tanh(_SQRT_2_OVER_PI * (x + 0.044715 * x * x * x)))


def _round_up(n, m):
    return ((n + m - 1) // m) * m


# --------------------------------------------------------------------- fused kernel
def _local_block_kernel(scale_ref,              # (B,) SMEM  per-sample DropPath scale
                        x_ref,                  # (1, C, HW) sample, channels-first
                        cm_ref,                 # (7, Lp)    per-dx column masks
                        wdw_ref, dwb_ref,       # (C, 49), (C, 1)   depthwise 7x7 w / b
                        lnw_ref, lnb_ref,       # (C, 1)            LayerNorm w / b
                        w1_ref, b1_ref,         # (4C, C), (4C, 1)  pwconv1
                        g_ref, be_ref,          # (4C, 1)           GRN gamma / beta
                        w2_ref, b2_ref,         # (C, 4C), (C, 1)   pwconv2
                        o_ref,                  # (1, C, HW)
                        *, H, W, C, base, eps):
    HW = H * W
    b = pl.program_id(0)

    x = x_ref[0].astype(jnp.float32)                       # (C, HW)
    cm = cm_ref[...]                                       # (7, Lp)
    Lp = cm.shape[1]

    # ---- depthwise 7x7 conv on the flattened (lane-major) spatial axis -------------
    # Zero lane-padding on both sides supplies the H-boundary halo; per-dx column masks
    # zero the source columns that would wrap into a neighbouring image row.
    xpad = jnp.concatenate(
        [jnp.zeros((C, base), jnp.float32), x,
         jnp.zeros((C, Lp - base - HW), jnp.float32)], axis=1)   # (C, Lp)
    wdw = wdw_ref[...].astype(jnp.float32)                 # (C, 49)
    acc = jnp.zeros((C, HW), jnp.float32)
    for j in range(7):                                     # dx tap, ox = j - 3
        ox = j - 3
        xm = xpad * cm[j:j + 1, :]                         # mask row-wrap columns for this dx
        for i in range(7):                                 # dy tap, oy = i - 3
            off = (i - 3) * W + ox
            t = i * 7 + j
            src = xm[:, base + off: base + off + HW]       # = x[h+oy, w+ox] (zero outside)
            acc = acc + src * wdw[:, t:t + 1]
    y = acc + dwb_ref[...].astype(jnp.float32)             # (C, HW)

    # ---- LayerNorm over channels -----------------------------------------------------
    mean = jnp.mean(y, axis=0, keepdims=True)              # (1, HW)
    cen = y - mean
    var = jnp.mean(cen * cen, axis=0, keepdims=True)
    yn = cen * lax.rsqrt(var + eps)
    yn = yn * lnw_ref[...].astype(jnp.float32) + lnb_ref[...].astype(jnp.float32)

    # ---- pwconv1 (bf16 MXU, f32 accumulation) + GELU -----------------------------------
    h = jnp.dot(w1_ref[...].astype(jnp.bfloat16), yn.astype(jnp.bfloat16),
                preferred_element_type=jnp.float32)        # (4C, HW)
    h = _gelu_tanh(h + b1_ref[...].astype(jnp.float32))

    # ---- GRN: L2 norm over the full spatial extent, per channel --------------------------
    gx = jnp.sqrt(jnp.sum(h * h, axis=1, keepdims=True))   # (4C, 1)
    nx = gx / (jnp.mean(gx, axis=0, keepdims=True) + 1e-6)
    h = g_ref[...].astype(jnp.float32) * (h * nx) + be_ref[...].astype(jnp.float32) + h

    # ---- pwconv2 (bf16 MXU) + DropPath scale + residual ----------------------------------
    z = jnp.dot(w2_ref[...].astype(jnp.bfloat16), h.astype(jnp.bfloat16),
                preferred_element_type=jnp.float32)        # (C, HW)
    z = z + b2_ref[...].astype(jnp.float32)
    o_ref[0] = (x + scale_ref[b] * z).astype(o_ref.dtype)


# ------------------------------------------------------------------------ wrapper
def _column_masks(H, W, base, Lp):
    """(7, Lp) f32 masks: for dx offset ox = j-3 keep only padded-source columns whose
    in-row position stays inside the image (guards row wrap of the flat layout)."""
    HW = H * W
    q = jnp.arange(Lp) - base
    qw = jnp.mod(q, W)
    inside = (q >= 0) & (q < HW)
    rows = []
    for ox in range(-3, 4):
        lo, hi = max(ox, 0), W + min(ox, 0)
        rows.append(inside & (qw >= lo) & (qw < hi))
    return jnp.stack(rows).astype(jnp.float32)


def local_block_forward(x_nchw, params, drop_scale, *, eps=1e-6):
    """Full Local_block forward. x_nchw: (B, C, H, W); drop_scale: (B,) per-sample factor."""
    B, C, H, W = x_nchw.shape
    HW = H * W
    C4 = 4 * C
    base = 3 * W + 3                          # halo of the flattened spatial axis
    Lp = _round_up(HW + 2 * base, 128)        # lane-padded slab length

    x3 = x_nchw.reshape(B, C, HW)             # free view (no transpose, no copy)
    cmask = _column_masks(H, W, base, Lp)
    col = lambda a: a.reshape(-1, 1)
    full = lambda shape: pl.BlockSpec(shape, lambda b, s: (0, 0))

    kernel = functools.partial(_local_block_kernel, H=H, W=W, C=C, base=base, eps=eps)
    out = pl.pallas_call(
        kernel,
        out_shape=jax.ShapeDtypeStruct((B, C, HW), x_nchw.dtype),
        grid_spec=pltpu.PrefetchScalarGridSpec(
            num_scalar_prefetch=1,
            grid=(B,),
            in_specs=[
                pl.BlockSpec((1, C, HW), lambda b, s: (b, 0, 0)),   # x (conv input + residual)
                full((7, Lp)),                                      # column masks
                full((C, 49)), full((C, 1)),                        # dwconv w / b
                full((C, 1)), full((C, 1)),                         # LayerNorm w / b
                full((C4, C)), full((C4, 1)),                       # pwconv1 w / b
                full((C4, 1)), full((C4, 1)),                       # GRN gamma / beta
                full((C, C4)), full((C, 1)),                        # pwconv2 w / b
            ],
            out_specs=pl.BlockSpec((1, C, HW), lambda b, s: (b, 0, 0)),
        ),
        compiler_params=pltpu.CompilerParams(
            dimension_semantics=("parallel",),
            vmem_limit_bytes=64 * 1024 * 1024,
        ),
    )(drop_scale.astype(jnp.float32), x3, cmask,
      params["dw_w"].reshape(C, 49), col(params["dw_b"]),
      col(params["ln_w"]), col(params["ln_b"]),
      params["w1"], col(params["b1"]),
      col(params["gamma"]), col(params["beta"]),
      params["w2"], col(params["b2"]))
    return out.reshape(B, C, H, W)


class LocalBlock:
    """JAX/Pallas counterpart of the PyTorch Local_block (ConvNeXtV2 block)."""

    def __init__(self, dim, drop_rate=0.0, *, key):
        assert drop_rate < 1.0, "drop_rate must be < 1.0 (1/keep_prob would overflow)"
        self.dim = dim
        self.drop_rate = float(drop_rate)
        self.training = True
        k = jax.random.split(key, 3)
        c4 = 4 * dim
        self.params = {
            "dw_w": 0.1 * jax.random.normal(k[0], (dim, 7, 7), jnp.float32),
            "dw_b": jnp.zeros((dim,), jnp.float32),
            "ln_w": jnp.ones((dim,), jnp.float32),
            "ln_b": jnp.zeros((dim,), jnp.float32),
            "w1": 0.1 * jax.random.normal(k[1], (c4, dim), jnp.float32),   # PyTorch (out, in)
            "b1": jnp.zeros((c4,), jnp.float32),
            # GRN params are zero-initialized in the PyTorch module.
            "gamma": jnp.zeros((c4,), jnp.float32),
            "beta": jnp.zeros((c4,), jnp.float32),
            "w2": 0.1 * jax.random.normal(k[2], (dim, c4), jnp.float32),   # PyTorch (out, in)
            "b2": jnp.zeros((dim,), jnp.float32),
        }

    def drop_path_scale(self, batch, rng):
        """Per-sample DropPath factor: 0 (dropped) or 1/keep_prob (kept)."""
        if self.drop_rate > 0.0 and self.training:
            keep = 1.0 - self.drop_rate
            u = jax.random.uniform(rng, (batch,), dtype=jnp.float32)
            return jnp.floor(keep + u) / keep
        return jnp.ones((batch,), jnp.float32)

    def __call__(self, x, *, rng=None):
        return local_block_forward(x, self.params, self.drop_path_scale(x.shape[0], rng))


# -------------------------------------------------------------- pure-JAX reference
def reference_forward(x_nchw, params, drop_scale):
    B, C, H, W = x_nchw.shape
    x = x_nchw.astype(jnp.float32)
    xp = jnp.pad(x, ((0, 0), (0, 0), (3, 3), (3, 3)))
    y = jnp.zeros_like(x)
    for dy in range(7):
        for dx in range(7):
            w_tap = params["dw_w"][:, dy, dx][None, :, None, None]
            y = y + xp[:, :, dy:dy + H, dx:dx + W] * w_tap
    y = y + params["dw_b"][None, :, None, None]
    yt = jnp.transpose(y, (0, 2, 3, 1))                                  # (B, H, W, C)
    mean = yt.mean(-1, keepdims=True)
    var = ((yt - mean) ** 2).mean(-1, keepdims=True)
    yn = (yt - mean) / jnp.sqrt(var + 1e-6) * params["ln_w"] + params["ln_b"]
    h = yn @ params["w1"].T + params["b1"]
    h = _gelu_tanh(h)
    gx = jnp.sqrt(jnp.sum(h * h, axis=(1, 2), keepdims=True))
    nx = gx / (jnp.mean(gx, axis=-1, keepdims=True) + 1e-6)
    h = params["gamma"] * (h * nx) + params["beta"] + h
    z = h @ params["w2"].T + params["b2"]
    z = jnp.transpose(z, (0, 3, 1, 2))
    out = x + drop_scale[:, None, None, None] * z
    return out.astype(x_nchw.dtype)


if __name__ == "__main__":
    root = jax.random.PRNGKey(0)
    k_x, k_mod, k_gg, k_gb, k_drop = jax.random.split(root, 5)
    B, C, H, W = 2, 4, 16, 16
    x = jax.random.normal(k_x, (B, C, H, W), dtype=jnp.float32)

    blk = LocalBlock(dim=C, drop_rate=0.2, key=k_mod)
    # Non-zero GRN params so the GRN path is actually exercised.
    blk.params["gamma"] = 0.1 * jax.random.normal(k_gg, (4 * C,), jnp.float32)
    blk.params["beta"] = 0.1 * jax.random.normal(k_gb, (4 * C,), jnp.float32)

    ok = True

    # Training mode (stochastic depth active); same per-sample scale for kernel + ref.
    blk.training = True
    scale_train = blk.drop_path_scale(B, k_drop)
    y_train = jax.block_until_ready(local_block_forward(x, blk.params, scale_train))
    ref_train = reference_forward(x, blk.params, scale_train)
    ok = ok and bool(jnp.allclose(y_train, ref_train, rtol=2e-2, atol=2e-2))

    # Eval mode (drop_path is the identity).
    blk.training = False
    y_eval = jax.block_until_ready(blk(x))
    ref_eval = reference_forward(x, blk.params, jnp.ones((B,), jnp.float32))
    ok = ok and bool(jnp.allclose(y_eval, ref_eval, rtol=2e-2, atol=2e-2))

    if ok:
        print("KERNEL_OK")
    else:
        raise SystemExit("Local_block Pallas kernel mismatch vs reference")
</pallas_src>

<mosaic_0001>
module attributes {stable_mosaic.version = 11 : i64} {
  func.func @_local_block_kernel(%arg0: i32, %arg1: memref<2xf32, #tpu.memory_space<smem>>, %arg2: memref<1x4x256xf32, #tpu.memory_space<vmem>>, %arg3: memref<7x384xf32, #tpu.memory_space<vmem>>, %arg4: memref<4x49xf32, #tpu.memory_space<vmem>>, %arg5: memref<4x1xf32, #tpu.memory_space<vmem>>, %arg6: memref<4x1xf32, #tpu.memory_space<vmem>>, %arg7: memref<4x1xf32, #tpu.memory_space<vmem>>, %arg8: memref<16x4xf32, #tpu.memory_space<vmem>>, %arg9: memref<16x1xf32, #tpu.memory_space<vmem>>, %arg10: memref<16x1xf32, #tpu.memory_space<vmem>>, %arg11: memref<16x1xf32, #tpu.memory_space<vmem>>, %arg12: memref<4x16xf32, #tpu.memory_space<vmem>>, %arg13: memref<4x1xf32, #tpu.memory_space<vmem>>, %arg14: memref<1x4x256xf32, #tpu.memory_space<vmem>>) attributes {dimension_semantics = [#tpu.dimension_semantics<parallel>], iteration_bounds = array<i64: 2>, scalar_prefetch = 1 : i64, scratch_operands = 0 : i64, tpu.core_type = #tpu.core_type<tc>, window_params = [{transform_indices = @transform_0, window_bounds = array<i64: 1, 4, 256>}, {pipeline_mode = #tpu.pipeline_mode<synchronous>, transform_indices = @transform_1, window_bounds = array<i64: 7, 384>}, {pipeline_mode = #tpu.pipeline_mode<synchronous>, transform_indices = @transform_2, window_bounds = array<i64: 4, 49>}, {pipeline_mode = #tpu.pipeline_mode<synchronous>, transform_indices = @transform_3, window_bounds = array<i64: 4, 1>}, {pipeline_mode = #tpu.pipeline_mode<synchronous>, transform_indices = @transform_4, window_bounds = array<i64: 4, 1>}, {pipeline_mode = #tpu.pipeline_mode<synchronous>, transform_indices = @transform_5, window_bounds = array<i64: 4, 1>}, {pipeline_mode = #tpu.pipeline_mode<synchronous>, transform_indices = @transform_6, window_bounds = array<i64: 16, 4>}, {pipeline_mode = #tpu.pipeline_mode<synchronous>, transform_indices = @transform_7, window_bounds = array<i64: 16, 1>}, {pipeline_mode = #tpu.pipeline_mode<synchronous>, transform_indices = @transform_8, window_bounds = array<i64: 16, 1>}, {pipeline_mode = #tpu.pipeline_mode<synchronous>, transform_indices = @transform_9, window_bounds = array<i64: 16, 1>}, {pipeline_mode = #tpu.pipeline_mode<synchronous>, transform_indices = @transform_10, window_bounds = array<i64: 4, 16>}, {pipeline_mode = #tpu.pipeline_mode<synchronous>, transform_indices = @transform_11, window_bounds = array<i64: 4, 1>}, {transform_indices = @transform_12, window_bounds = array<i64: 1, 4, 256>}]} {
    %c0 = arith.constant 0 : index
    %c0_0 = arith.constant 0 : index
    %c0_1 = arith.constant 0 : index
    %0 = vector.load %arg2[%c0, %c0_0, %c0_1] : memref<1x4x256xf32, #tpu.memory_space<vmem>>, vector<1x4x256xf32>
    %1 = vector.shape_cast %0 : vector<1x4x256xf32> to vector<4x256xf32>
    %c0_2 = arith.constant 0 : index
    %c0_3 = arith.constant 0 : index
    %2 = vector.load %arg3[%c0_2, %c0_3] : memref<7x384xf32, #tpu.memory_space<vmem>>, vector<7x384xf32>
    %cst = arith.constant 0.000000e+00 : f32
    %3 = vector.broadcast %cst : f32 to vector<4x51xf32>
    %cst_4 = arith.constant 0.000000e+00 : f32
    %4 = vector.broadcast %cst_4 : f32 to vector<4x77xf32>
    %5 = tpu.concatenate %3, %1, %4 in 1 : vector<4x51xf32>, vector<4x256xf32>, vector<4x77xf32> -> vector<4x384xf32>
    %c0_5 = arith.constant 0 : index
    %c0_6 = arith.constant 0 : index
    %6 = vector.load %arg4[%c0_5, %c0_6] : memref<4x49xf32, #tpu.memory_space<vmem>>, vector<4x49xf32>
    %cst_7 = arith.constant 0.000000e+00 : f32
    %7 = vector.broadcast %cst_7 : f32 to vector<4x256xf32>
    %8 = vector.extract_strided_slice %2 {offsets = [0, 0], sizes = [1, 384], strides = [1, 1]} : vector<7x384xf32> to vector<1x384xf32>
    %9 = vector.broadcast %8 : vector<1x384xf32> to vector<4x384xf32>
    %10 = arith.mulf %5, %9 : vector<4x384xf32>
    %11 = vector.extract_strided_slice %10 {offsets = [0, 0], sizes = [4, 256], strides = [1, 1]} : vector<4x384xf32> to vector<4x256xf32>
    %12 = vector.extract_strided_slice %6 {offsets = [0, 0], sizes = [4, 1], strides = [1, 1]} : vector<4x49xf32> to vector<4x1xf32>
    %13 = vector.broadcast %12 : vector<4x1xf32> to vector<4x256xf32>
    %14 = arith.mulf %11, %13 : vector<4x256xf32>
    %15 = arith.addf %7, %14 : vector<4x256xf32>
    %16 = vector.extract_strided_slice %10 {offsets = [0, 16], sizes = [4, 256], strides = [1, 1]} : vector<4x384xf32> to vector<4x256xf32>
    %17 = vector.extract_strided_slice %6 {offsets = [0, 7], sizes = [4, 1], strides = [1, 1]} : vector<4x49xf32> to vector<4x1xf32>
    %18 = vector.broadcast %17 : vector<4x1xf32> to vector<4x256xf32>
    %19 = arith.mulf %16, %18 : vector<4x256xf32>
    %20 = arith.addf %15, %19 : vector<4x256xf32>
    %21 = vector.extract_strided_slice %10 {offsets = [0, 32], sizes = [4, 256], strides = [1, 1]} : vector<4x384xf32> to vector<4x256xf32>
    %22 = vector.extract_strided_slice %6 {offsets = [0, 14], sizes = [4, 1], strides = [1, 1]} : vector<4x49xf32> to vector<4x1xf32>
    %23 = vector.broadcast %22 : vector<4x1xf32> to vector<4x256xf32>
    %24 = arith.mulf %21, %23 : vector<4x256xf32>
    %25 = arith.addf %20, %24 : vector<4x256xf32>
    %26 = vector.extract_strided_slice %10 {offsets = [0, 48], sizes = [4, 256], strides = [1, 1]} : vector<4x384xf32> to vector<4x256xf32>
    %27 = vector.extract_strided_slice %6 {offsets = [0, 21], sizes = [4, 1], strides = [1, 1]} : vector<4x49xf32> to vector<4x1xf32>
    %28 = vector.broadcast %27 : vector<4x1xf32> to vector<4x256xf32>
    %29 = arith.mulf %26, %28 : vector<4x256xf32>
    %30 = arith.addf %25, %29 : vector<4x256xf32>
    %31 = vector.extract_strided_slice %10 {offsets = [0, 64], sizes = [4, 256], strides = [1, 1]} : vector<4x384xf32> to vector<4x256xf32>
    %32 = vector.extract_strided_slice %6 {offsets = [0, 28], sizes = [4, 1], strides = [1, 1]} : vector<4x49xf32> to vector<4x1xf32>
    %33 = vector.broadcast %32 : vector<4x1xf32> to vector<4x256xf32>
    %34 = arith.mulf %31, %33 : vector<4x256xf32>
    %35 = arith.addf %30, %34 : vector<4x256xf32>
    %36 = vector.extract_strided_slice %10 {offsets = [0, 80], sizes = [4, 256], strides = [1, 1]} : vector<4x384xf32> to vector<4x256xf32>
    %37 = vector.extract_strided_slice %6 {offsets = [0, 35], sizes = [4, 1], strides = [1, 1]} : vector<4x49xf32> to vector<4x1xf32>
    %38 = vector.broadcast %37 : vector<4x1xf32> to vector<4x256xf32>
    %39 = arith.mulf %36, %38 : vector<4x256xf32>
    %40 = arith.addf %35, %39 : vector<4x256xf32>
    %41 = vector.extract_strided_slice %10 {offsets = [0, 96], sizes = [4, 256], strides = [1, 1]} : vector<4x384xf32> to vector<4x256xf32>
    %42 = vector.extract_strided_slice %6 {offsets = [0, 42], sizes = [4, 1], strides = [1, 1]} : vector<4x49xf32> to vector<4x1xf32>
    %43 = vector.broadcast %42 : vector<4x1xf32> to vector<4x256xf32>
    %44 = arith.mulf %41, %43 : vector<4x256xf32>
    %45 = arith.addf %40, %44 : vector<4x256xf32>
    %46 = vector.extract_strided_slice %2 {offsets = [1, 0], sizes = [1, 384], strides = [1, 1]} : vector<7x384xf32> to vector<1x384xf32>
    %47 = vector.broadcast %46 : vector<1x384xf32> to vector<4x384xf32>
    %48 = arith.mulf %5, %47 : vector<4x384xf32>
    %49 = vector.extract_strided_slice %48 {offsets = [0, 1], sizes = [4, 256], strides = [1, 1]} : vector<4x384xf32> to vector<4x256xf32>
    %50 = vector.extract_strided_slice %6 {offsets = [0, 1], sizes = [4, 1], strides = [1, 1]} : vector<4x49xf32> to vector<4x1xf32>
    %51 = vector.broadcast %50 : vector<4x1xf32> to vector<4x256xf32>
    %52 = arith.mulf %49, %51 : vector<4x256xf32>
    %53 = arith.addf %45, %52 : vector<4x256xf32>
    %54 = vector.extract_strided_slice %48 {offsets = [0, 17], sizes = [4, 256], strides = [1, 1]} : vector<4x384xf32> to vector<4x256xf32>
    %55 = vector.extract_strided_slice %6 {offsets = [0, 8], sizes = [4, 1], strides = [1, 1]} : vector<4x49xf32> to vector<4x1xf32>
    %56 = vector.broadcast %55 : vector<4x1xf32> to vector<4x256xf32>
    %57 = arith.mulf %54, %56 : vector<4x256xf32>
    %58 = arith.addf %53, %57 : vector<4x256xf32>
    %59 = vector.extract_strided_slice %48 {offsets = [0, 33], sizes = [4, 256], strides = [1, 1]} : vector<4x384xf32> to vector<4x256xf32>
    %60 = vector.extract_strided_slice %6 {offsets = [0, 15], sizes = [4, 1], strides = [1, 1]} : vector<4x49xf32> to vector<4x1xf32>
    %61 = vector.broadcast %60 : vector<4x1xf32> to vector<4x256xf32>
    %62 = arith.mulf %59, %61 : vector<4x256xf32>
    %63 = arith.addf %58, %62 : vector<4x256xf32>
    %64 = vector.extract_strided_slice %48 {offsets = [0, 49], sizes = [4, 256], strides = [1, 1]} : vector<4x384xf32> to vector<4x256xf32>
    %65 = vector.extract_strided_slice %6 {offsets = [0, 22], sizes = [4, 1], strides = [1, 1]} : vector<4x49xf32> to vector<4x1xf32>
    %66 = vector.broadcast %65 : vector<4x1xf32> to vector<4x256xf32>
    %67 = arith.mulf %64, %66 : vector<4x256xf32>
    %68 = arith.addf %63, %67 : vector<4x256xf32>
    %69 = vector.extract_strided_slice %48 {offsets = [0, 65], sizes = [4, 256], strides = [1, 1]} : vector<4x384xf32> to vector<4x256xf32>
    %70 = vector.extract_strided_slice %6 {offsets = [0, 29], sizes = [4, 1], strides = [1, 1]} : vector<4x49xf32> to vector<4x1xf32>
    %71 = vector.broadcast %70 : vector<4x1xf32> to vector<4x256xf32>
    %72 = arith.mulf %69, %71 : vector<4x256xf32>
    %73 = arith.addf %68, %72 : vector<4x256xf32>
    %74 = vector.extract_strided_slice %48 {offsets = [0, 81], sizes = [4, 256], strides = [1, 1]} : vector<4x384xf32> to vector<4x256xf32>
    %75 = vector.extract_strided_slice %6 {offsets = [0, 36], sizes = [4, 1], strides = [1, 1]} : vector<4x49xf32> to vector<4x1xf32>
    %76 = vector.broadcast %75 : vector<4x1xf32> to vector<4x256xf32>
    %77 = arith.mulf %74, %76 : vector<4x256xf32>
    %78 = arith.addf %73, %77 : vector<4x256xf32>
    %79 = vector.extract_strided_slice %48 {offsets = [0, 97], sizes = [4, 256], strides = [1, 1]} : vector<4x384xf32> to vector<4x256xf32>
    %80 = vector.extract_strided_slice %6 {offsets = [0, 43], sizes = [4, 1], strides = [1, 1]} : vector<4x49xf32> to vector<4x1xf32>
    %81 = vector.broadcast %80 : vector<4x1xf32> to vector<4x256xf32>
    %82 = arith.mulf %79, %81 : vector<4x256xf32>
    %83 = arith.addf %78, %82 : vector<4x256xf32>
    %84 = vector.extract_strided_slice %2 {offsets = [2, 0], sizes = [1, 384], strides = [1, 1]} : vector<7x384xf32> to vector<1x384xf32>
    %85 = vector.broadcast %84 : vector<1x384xf32> to vector<4x384xf32>
    %86 = arith.mulf %5, %85 : vector<4x384xf32>
    %87 = vector.extract_strided_slice %86 {offsets = [0, 2], sizes = [4, 256], strides = [1, 1]} : vector<4x384xf32> to vector<4x256xf32>
    %88 = vector.extract_strided_slice %6 {offsets = [0, 2], sizes = [4, 1], strides = [1, 1]} : vector<4x49xf32> to vector<4x1xf32>
    %89 = vector.broadcast %88 : vector<4x1xf32> to vector<4x256xf32>
    %90 = arith.mulf %87, %89 : vector<4x256xf32>
    %91 = arith.addf %83, %90 : vector<4x256xf32>
    %92 = vector.extract_strided_slice %86 {offsets = [0, 18], sizes = [4, 256], strides = [1, 1]} : vector<4x384xf32> to vector<4x256xf32>
    %93 = vector.extract_strided_slice %6 {offsets = [0, 9], sizes = [4, 1], strides = [1, 1]} : vector<4x49xf32> to vector<4x1xf32>
    %94 = vector.broadcast %93 : vector<4x1xf32> to vector<4x256xf32>
    %95 = arith.mulf %92, %94 : vector<4x256xf32>
    %96 = arith.addf %91, %95 : vector<4x256xf32>
    %97 = vector.extract_strided_slice %86 {offsets = [0, 34], sizes = [4, 256], strides = [1, 1]} : vector<4x384xf32> to vector<4x256xf32>
    %98 = vector.extract_strided_slice %6 {offsets = [0, 16], sizes = [4, 1], strides = [1, 1]} : vector<4x49xf32> to vector<4x1xf32>
    %99 = vector.broadcast %98 : vector<4x1xf32> to vector<4x256xf32>
    %100 = arith.mulf %97, %99 : vector<4x256xf32>
    %101 = arith.addf %96, %100 : vector<4x256xf32>
    %102 = vector.extract_strided_slice %86 {offsets = [0, 50], sizes = [4, 256], strides = [1, 1]} : vector<4x384xf32> to vector<4x256xf32>
    %103 = vector.extract_strided_slice %6 {offsets = [0, 23], sizes = [4, 1], strides = [1, 1]} : vector<4x49xf32> to vector<4x1xf32>
    %104 = vector.broadcast %103 : vector<4x1xf32> to vector<4x256xf32>
    %105 = arith.mulf %102, %104 : vector<4x256xf32>
    %106 = arith.addf %101, %105 : vector<4x256xf32>
    %107 = vector.extract_strided_slice %86 {offsets = [0, 66], sizes = [4, 256], strides = [1, 1]} : vector<4x384xf32> to vector<4x256xf32>
    %108 = vector.extract_strided_slice %6 {offsets = [0, 30], sizes = [4, 1], strides = [1, 1]} : vector<4x49xf32> to vector<4x1xf32>
    %109 = vector.broadcast %108 : vector<4x1xf32> to vector<4x256xf32>
    %110 = arith.mulf %107, %109 : vector<4x256xf32>
    %111 = arith.addf %106, %110 : vector<4x256xf32>
    %112 = vector.extract_strided_slice %86 {offsets = [0, 82], sizes = [4, 256], strides = [1, 1]} : vector<4x384xf32> to vector<4x256xf32>
    %113 = vector.extract_strided_slice %6 {offsets = [0, 37], sizes = [4, 1], strides = [1, 1]} : vector<4x49xf32> to vector<4x1xf32>
    %114 = vector.broadcast %113 : vector<4x1xf32> to vector<4x256xf32>
    %115 = arith.mulf %112, %114 : vector<4x256xf32>
    %116 = arith.addf %111, %115 : vector<4x256xf32>
    %117 = vector.extract_strided_slice %86 {offsets = [0, 98], sizes = [4, 256], strides = [1, 1]} : vector<4x384xf32> to vector<4x256xf32>
    %118 = vector.extract_strided_slice %6 {offsets = [0, 44], sizes = [4, 1], strides = [1, 1]} : vector<4x49xf32> to vector<4x1xf32>
    %119 = vector.broadcast %118 : vector<4x1xf32> to vector<4x256xf32>
    %120 = arith.mulf %117, %119 : vector<4x256xf32>
    %121 = arith.addf %116, %120 : vector<4x256xf32>
    %122 = vector.extract_strided_slice %2 {offsets = [3, 0], sizes = [1, 384], strides = [1, 1]} : vector<7x384xf32> to vector<1x384xf32>
    %123 = vector.broadcast %122 : vector<1x384xf32> to vector<4x384xf32>
    %124 = arith.mulf %5, %123 : vector<4x384xf32>
    %125 = vector.extract_strided_slice %124 {offsets = [0, 3], sizes = [4, 256], strides = [1, 1]} : vector<4x384xf32> to vector<4x256xf32>
    %126 = vector.extract_strided_slice %6 {offsets = [0, 3], sizes = [4, 1], strides = [1, 1]} : vector<4x49xf32> to vector<4x1xf32>
    %127 = vector.broadcast %126 : vector<4x1xf32> to vector<4x256xf32>
    %128 = arith.mulf %125, %127 : vector<4x256xf32>
    %129 = arith.addf %121, %128 : vector<4x256xf32>
    %130 = vector.extract_strided_slice %124 {offsets = [0, 19], sizes = [4, 256], strides = [1, 1]} : vector<4x384xf32> to vector<4x256xf32>
    %131 = vector.extract_strided_slice %6 {offsets = [0, 10], sizes = [4, 1], strides = [1, 1]} : vector<4x49xf32> to vector<4x1xf32>
    %132 = vector.broadcast %131 : vector<4x1xf32> to vector<4x256xf32>
    %133 = arith.mulf %130, %132 : vector<4x256xf32>
    %134 = arith.addf %129, %133 : vector<4x256xf32>
    %135 = vector.extract_strided_slice %124 {offsets = [0, 35], sizes = [4, 256], strides = [1, 1]} : vector<4x384xf32> to vector<4x256xf32>
    %136 = vector.extract_strided_slice %6 {offsets = [0, 17], sizes = [4, 1], strides = [1, 1]} : vector<4x49xf32> to vector<4x1xf32>
    %137 = vector.broadcast %136 : vector<4x1xf32> to vector<4x256xf32>
    %138 = arith.mulf %135, %137 : vector<4x256xf32>
    %139 = arith.addf %134, %138 : vector<4x256xf32>
    %140 = vector.extract_strided_slice %124 {offsets = [0, 51], sizes = [4, 256], strides = [1, 1]} : vector<4x384xf32> to vector<4x256xf32>
    %141 = vector.extract_strided_slice %6 {offsets = [0, 24], sizes = [4, 1], strides = [1, 1]} : vector<4x49xf32> to vector<4x1xf32>
    %142 = vector.broadcast %141 : vector<4x1xf32> to vector<4x256xf32>
    %143 = arith.mulf %140, %142 : vector<4x256xf32>
    %144 = arith.addf %139, %143 : vector<4x256xf32>
    %145 = vector.extract_strided_slice %124 {offsets = [0, 67], sizes = [4, 256], strides = [1, 1]} : vector<4x384xf32> to vector<4x256xf32>
    %146 = vector.extract_strided_slice %6 {offsets = [0, 31], sizes = [4, 1], strides = [1, 1]} : vector<4x49xf32> to vector<4x1xf32>
    %147 = vector.broadcast %146 : vector<4x1xf32> to vector<4x256xf32>
    %148 = arith.mulf %145, %147 : vector<4x256xf32>
    %149 = arith.addf %144, %148 : vector<4x256xf32>
    %150 = vector.extract_strided_slice %124 {offsets = [0, 83], sizes = [4, 256], strides = [1, 1]} : vector<4x384xf32> to vector<4x256xf32>
    %151 = vector.extract_strided_slice %6 {offsets = [0, 38], sizes = [4, 1], strides = [1, 1]} : vector<4x49xf32> to vector<4x1xf32>
    %152 = vector.broadcast %151 : vector<4x1xf32> to vector<4x256xf32>
    %153 = arith.mulf %150, %152 : vector<4x256xf32>
    %154 = arith.addf %149, %153 : vector<4x256xf32>
    %155 = vector.extract_strided_slice %124 {offsets = [0, 99], sizes = [4, 256], strides = [1, 1]} : vector<4x384xf32> to vector<4x256xf32>
    %156 = vector.extract_strided_slice %6 {offsets = [0, 45], sizes = [4, 1], strides = [1, 1]} : vector<4x49xf32> to vector<4x1xf32>
    %157 = vector.broadcast %156 : vector<4x1xf32> to vector<4x256xf32>
    %158 = arith.mulf %155, %157 : vector<4x256xf32>
    %159 = arith.addf %154, %158 : vector<4x256xf32>
    %160 = vector.extract_strided_slice %2 {offsets = [4, 0], sizes = [1, 384], strides = [1, 1]} : vector<7x384xf32> to vector<1x384xf32>
    %161 = vector.broadcast %160 : vector<1x384xf32> to vector<4x384xf32>
    %162 = arith.mulf %5, %161 : vector<4x384xf32>
    %163 = vector.extract_strided_slice %162 {offsets = [0, 4], sizes = [4, 256], strides = [1, 1]} : vector<4x384xf32> to vector<4x256xf32>
    %164 = vector.extract_strided_slice %6 {offsets = [0, 4], sizes = [4, 1], strides = [1, 1]} : vector<4x49xf32> to vector<4x1xf32>
    %165 = vector.broadcast %164 : vector<4x1xf32> to vector<4x256xf32>
    %166 = arith.mulf %163, %165 : vector<4x256xf32>
    %167 = arith.addf %159, %166 : vector<4x256xf32>
    %168 = vector.extract_strided_slice %162 {offsets = [0, 20], sizes = [4, 256], strides = [1, 1]} : vector<4x384xf32> to vector<4x256xf32>
    %169 = vector.extract_strided_slice %6 {offsets = [0, 11], sizes = [4, 1], strides = [1, 1]} : vector<4x49xf32> to vector<4x1xf32>
    %170 = vector.broadcast %169 : vector<4x1xf32> to vector<4x256xf32>
    %171 = arith.mulf %168, %170 : vector<4x256xf32>
    %172 = arith.addf %167, %171 : vector<4x256xf32>
    %173 = vector.extract_strided_slice %162 {offsets = [0, 36], sizes = [4, 256], strides = [1, 1]} : vector<4x384xf32> to vector<4x256xf32>
    %174 = vector.extract_strided_slice %6 {offsets = [0, 18], sizes = [4, 1], strides = [1, 1]} : vector<4x49xf32> to vector<4x1xf32>
    %175 = vector.broadcast %174 : vector<4x1xf32> to vector<4x256xf32>
    %176 = arith.mulf %173, %175 : vector<4x256xf32>
    %177 = arith.addf %172, %176 : vector<4x256xf32>
    %178 = vector.extract_strided_slice %162 {offsets = [0, 52], sizes = [4, 256], strides = [1, 1]} : vector<4x384xf32> to vector<4x256xf32>
    %179 = vector.extract_strided_slice %6 {offsets = [0, 25], sizes = [4, 1], strides = [1, 1]} : vector<4x49xf32> to vector<4x1xf32>
    %180 = vector.broadcast %179 : vector<4x1xf32> to vector<4x256xf32>
    %181 = arith.mulf %178, %180 : vector<4x256xf32>
    %182 = arith.addf %177, %181 : vector<4x256xf32>
    %183 = vector.extract_strided_slice %162 {offsets = [0, 68], sizes = [4, 256], strides = [1, 1]} : vector<4x384xf32> to vector<4x256xf32>
    %184 = vector.extract_strided_slice %6 {offsets = [0, 32], sizes = [4, 1], strides = [1, 1]} : vector<4x49xf32> to vector<4x1xf32>
    %185 = vector.broadcast %184 : vector<4x1xf32> to vector<4x256xf32>
    %186 = arith.mulf %183, %185 : vector<4x256xf32>
    %187 = arith.addf %182, %186 : vector<4x256xf32>
    %188 = vector.extract_strided_slice %162 {offsets = [0, 84], sizes = [4, 256], strides = [1, 1]} : vector<4x384xf32> to vector<4x256xf32>
    %189 = vector.extract_strided_slice %6 {offsets = [0, 39], sizes = [4, 1], strides = [1, 1]} : vector<4x49xf32> to vector<4x1xf32>
    %190 = vector.broadcast %189 : vector<4x1xf32> to vector<4x256xf32>
    %191 = arith.mulf %188, %190 : vector<4x256xf32>
    %192 = arith.addf %187, %191 : vector<4x256xf32>
    %193 = vector.extract_strided_slice %162 {offsets = [0, 100], sizes = [4, 256], strides = [1, 1]} : vector<4x384xf32> to vector<4x256xf32>
    %194 = vector.extract_strided_slice %6 {offsets = [0, 46], sizes = [4, 1], strides = [1, 1]} : vector<4x49xf32> to vector<4x1xf32>
    %195 = vector.broadcast %194 : vector<4x1xf32> to vector<4x256xf32>
    %196 = arith.mulf %193, %195 : vector<4x256xf32>
    %197 = arith.addf %192, %196 : vector<4x256xf32>
    %198 = vector.extract_strided_slice %2 {offsets = [5, 0], sizes = [1, 384], strides = [1, 1]} : vector<7x384xf32> to vector<1x384xf32>
    %199 = vector.broadcast %198 : vector<1x384xf32> to vector<4x384xf32>
    %200 = arith.mulf %5, %199 : vector<4x384xf32>
    %201 = vector.extract_strided_slice %200 {offsets = [0, 5], sizes = [4, 256], strides = [1, 1]} : vector<4x384xf32> to vector<4x256xf32>
    %202 = vector.extract_strided_slice %6 {offsets = [0, 5], sizes = [4, 1], strides = [1, 1]} : vector<4x49xf32> to vector<4x1xf32>
    %203 = vector.broadcast %202 : vector<4x1xf32> to vector<4x256xf32>
    %204 = arith.mulf %201, %203 : vector<4x256xf32>
    %205 = arith.addf %197, %204 : vector<4x256xf32>
    %206 = vector.extract_strided_slice %200 {offsets = [0, 21], sizes = [4, 256], strides = [1, 1]} : vector<4x384xf32> to vector<4x256xf32>
    %207 = vector.extract_strided_slice %6 {offsets = [0, 12], sizes = [4, 1], strides = [1, 1]} : vector<4x49xf32> to vector<4x1xf32>
    %208 = vector.broadcast %207 : vector<4x1xf32> to vector<4x256xf32>
    %209 = arith.mulf %206, %208 : vector<4x256xf32>
    %210 = arith.addf %205, %209 : vector<4x256xf32>
    %211 = vector.extract_strided_slice %200 {offsets = [0, 37], sizes = [4, 256], strides = [1, 1]} : vector<4x384xf32> to vector<4x256xf32>
    %212 = vector.extract_strided_slice %6 {offsets = [0, 19], sizes = [4, 1], strides = [1, 1]} : vector<4x49xf32> to vector<4x1xf32>
    %213 = vector.broadcast %212 : vector<4x1xf32> to vector<4x256xf32>
    %214 = arith.mulf %211, %213 : vector<4x256xf32>
    %215 = arith.addf %210, %214 : vector<4x256xf32>
    %216 = vector.extract_strided_slice %200 {offsets = [0, 53], sizes = [4, 256], strides = [1, 1]} : vector<4x384xf32> to vector<4x256xf32>
    %217 = vector.extract_strided_slice %6 {offsets = [0, 26], sizes = [4, 1], strides = [1, 1]} : vector<4x49xf32> to vector<4x1xf32>
    %218 = vector.broadcast %217 : vector<4x1xf32> to vector<4x256xf32>
    %219 = arith.mulf %216, %218 : vector<4x256xf32>
    %220 = arith.addf %215, %219 : vector<4x256xf32>
    %221 = vector.extract_strided_slice %200 {offsets = [0, 69], sizes = [4, 256], strides = [1, 1]} : vector<4x384xf32> to vector<4x256xf32>
    %222 = vector.extract_strided_slice %6 {offsets = [0, 33], sizes = [4, 1], strides = [1, 1]} : vector<4x49xf32> to vector<4x1xf32>
    %223 = vector.broadcast %222 : vector<4x1xf32> to vector<4x256xf32>
    %224 = arith.mulf %221, %223 : vector<4x256xf32>
    %225 = arith.addf %220, %224 : vector<4x256xf32>
    %226 = vector.extract_strided_slice %200 {offsets = [0, 85], sizes = [4, 256], strides = [1, 1]} : vector<4x384xf32> to vector<4x256xf32>
    %227 = vector.extract_strided_slice %6 {offsets = [0, 40], sizes = [4, 1], strides = [1, 1]} : vector<4x49xf32> to vector<4x1xf32>
    %228 = vector.broadcast %227 : vector<4x1xf32> to vector<4x256xf32>
    %229 = arith.mulf %226, %228 : vector<4x256xf32>
    %230 = arith.addf %225, %229 : vector<4x256xf32>
    %231 = vector.extract_strided_slice %200 {offsets = [0, 101], sizes = [4, 256], strides = [1, 1]} : vector<4x384xf32> to vector<4x256xf32>
    %232 = vector.extract_strided_slice %6 {offsets = [0, 47], sizes = [4, 1], strides = [1, 1]} : vector<4x49xf32> to vector<4x1xf32>
    %233 = vector.broadcast %232 : vector<4x1xf32> to vector<4x256xf32>
    %234 = arith.mulf %231, %233 : vector<4x256xf32>
    %235 = arith.addf %230, %234 : vector<4x256xf32>
    %236 = vector.extract_strided_slice %2 {offsets = [6, 0], sizes = [1, 384], strides = [1, 1]} : vector<7x384xf32> to vector<1x384xf32>
    %237 = vector.broadcast %236 : vector<1x384xf32> to vector<4x384xf32>
    %238 = arith.mulf %5, %237 : vector<4x384xf32>
    %239 = vector.extract_strided_slice %238 {offsets = [0, 6], sizes = [4, 256], strides = [1, 1]} : vector<4x384xf32> to vector<4x256xf32>
    %240 = vector.extract_strided_slice %6 {offsets = [0, 6], sizes = [4, 1], strides = [1, 1]} : vector<4x49xf32> to vector<4x1xf32>
    %241 = vector.broadcast %240 : vector<4x1xf32> to vector<4x256xf32>
    %242 = arith.mulf %239, %241 : vector<4x256xf32>
    %243 = arith.addf %235, %242 : vector<4x256xf32>
    %244 = vector.extract_strided_slice %238 {offsets = [0, 22], sizes = [4, 256], strides = [1, 1]} : vector<4x384xf32> to vector<4x256xf32>
    %245 = vector.extract_strided_slice %6 {offsets = [0, 13], sizes = [4, 1], strides = [1, 1]} : vector<4x49xf32> to vector<4x1xf32>
    %246 = vector.broadcast %245 : vector<4x1xf32> to vector<4x256xf32>
    %247 = arith.mulf %244, %246 : vector<4x256xf32>
    %248 = arith.addf %243, %247 : vector<4x256xf32>
    %249 = vector.extract_strided_slice %238 {offsets = [0, 38], sizes = [4, 256], strides = [1, 1]} : vector<4x384xf32> to vector<4x256xf32>
    %250 = vector.extract_strided_slice %6 {offsets = [0, 20], sizes = [4, 1], strides = [1, 1]} : vector<4x49xf32> to vector<4x1xf32>
    %251 = vector.broadcast %250 : vector<4x1xf32> to vector<4x256xf32>
    %252 = arith.mulf %249, %251 : vector<4x256xf32>
    %253 = arith.addf %248, %252 : vector<4x256xf32>
    %254 = vector.extract_strided_slice %238 {offsets = [0, 54], sizes = [4, 256], strides = [1, 1]} : vector<4x384xf32> to vector<4x256xf32>
    %255 = vector.extract_strided_slice %6 {offsets = [0, 27], sizes = [4, 1], strides = [1, 1]} : vector<4x49xf32> to vector<4x1xf32>
    %256 = vector.broadcast %255 : vector<4x1xf32> to vector<4x256xf32>
    %257 = arith.mulf %254, %256 : vector<4x256xf32>
    %258 = arith.addf %253, %257 : vector<4x256xf32>
    %259 = vector.extract_strided_slice %238 {offsets = [0, 70], sizes = [4, 256], strides = [1, 1]} : vector<4x384xf32> to vector<4x256xf32>
    %260 = vector.extract_strided_slice %6 {offsets = [0, 34], sizes = [4, 1], strides = [1, 1]} : vector<4x49xf32> to vector<4x1xf32>
    %261 = vector.broadcast %260 : vector<4x1xf32> to vector<4x256xf32>
    %262 = arith.mulf %259, %261 : vector<4x256xf32>
    %263 = arith.addf %258, %262 : vector<4x256xf32>
    %264 = vector.extract_strided_slice %238 {offsets = [0, 86], sizes = [4, 256], strides = [1, 1]} : vector<4x384xf32> to vector<4x256xf32>
    %265 = vector.extract_strided_slice %6 {offsets = [0, 41], sizes = [4, 1], strides = [1, 1]} : vector<4x49xf32> to vector<4x1xf32>
    %266 = vector.broadcast %265 : vector<4x1xf32> to vector<4x256xf32>
    %267 = arith.mulf %264, %266 : vector<4x256xf32>
    %268 = arith.addf %263, %267 : vector<4x256xf32>
    %269 = vector.extract_strided_slice %238 {offsets = [0, 102], sizes = [4, 256], strides = [1, 1]} : vector<4x384xf32> to vector<4x256xf32>
    %270 = vector.extract_strided_slice %6 {offsets = [0, 48], sizes = [4, 1], strides = [1, 1]} : vector<4x49xf32> to vector<4x1xf32>
    %271 = vector.broadcast %270 : vector<4x1xf32> to vector<4x256xf32>
    %272 = arith.mulf %269, %271 : vector<4x256xf32>
    %273 = arith.addf %268, %272 : vector<4x256xf32>
    %c0_8 = arith.constant 0 : index
    %c0_9 = arith.constant 0 : index
    %274 = vector.load %arg5[%c0_8, %c0_9] : memref<4x1xf32, #tpu.memory_space<vmem>>, vector<4x1xf32>
    %275 = vector.broadcast %274 : vector<4x1xf32> to vector<4x256xf32>
    %276 = arith.addf %273, %275 : vector<4x256xf32>
    %cst_10 = arith.constant dense<0.000000e+00> : vector<256xf32>
    %277 = vector.multi_reduction <add>, %276, %cst_10 [0] : vector<4x256xf32> to vector<256xf32>
    %278 = vector.shape_cast %277 : vector<256xf32> to vector<1x256xf32>
    %cst_11 = arith.constant 4.000000e+00 : f32
    %279 = vector.broadcast %cst_11 : f32 to vector<1x256xf32>
    %280 = arith.divf %278, %279 : vector<1x256xf32>
    %281 = vector.broadcast %280 : vector<1x256xf32> to vector<4x256xf32>
    %282 = arith.subf %276, %281 : vector<4x256xf32>
    %283 = arith.mulf %282, %282 : vector<4x256xf32>
    %cst_12 = arith.constant dense<0.000000e+00> : vector<256xf32>
    %284 = vector.multi_reduction <add>, %283, %cst_12 [0] : vector<4x256xf32> to vector<256xf32>
    %285 = vector.shape_cast %284 : vector<256xf32> to vector<1x256xf32>
    %cst_13 = arith.constant 4.000000e+00 : f32
    %286 = vector.broadcast %cst_13 : f32 to vector<1x256xf32>
    %287 = arith.divf %285, %286 : vector<1x256xf32>
    %cst_14 = arith.constant 9.99999997E-7 : f32
    %288 = vector.broadcast %cst_14 : f32 to vector<1x256xf32>
    %289 = arith.addf %287, %288 : vector<1x256xf32>
    %290 = math.rsqrt %289 : vector<1x256xf32>
    %291 = vector.broadcast %290 : vector<1x256xf32> to vector<4x256xf32>
    %292 = arith.mulf %282, %291 : vector<4x256xf32>
    %c0_15 = arith.constant 0 : index
    %c0_16 = arith.constant 0 : index
    %293 = vector.load %arg6[%c0_15, %c0_16] : memref<4x1xf32, #tpu.memory_space<vmem>>, vector<4x1xf32>
    %294 = vector.broadcast %293 : vector<4x1xf32> to vector<4x256xf32>
    %295 = arith.mulf %292, %294 : vector<4x256xf32>
    %c0_17 = arith.constant 0 : index
    %c0_18 = arith.constant 0 : index
    %296 = vector.load %arg7[%c0_17, %c0_18] : memref<4x1xf32, #tpu.memory_space<vmem>>, vector<4x1xf32>
    %297 = vector.broadcast %296 : vector<4x1xf32> to vector<4x256xf32>
    %298 = arith.addf %295, %297 : vector<4x256xf32>
    %c0_19 = arith.constant 0 : index
    %c0_20 = arith.constant 0 : index
    %299 = vector.load %arg8[%c0_19, %c0_20] : memref<16x4xf32, #tpu.memory_space<vmem>>, vector<16x4xf32>
    %300 = arith.truncf %299 : vector<16x4xf32> to vector<16x4xbf16>
    %301 = arith.truncf %298 : vector<4x256xf32> to vector<4x256xbf16>
    %cst_21 = arith.constant dense<0.000000e+00> : vector<16x256xf32>
    %302 = tpu.matmul %300, %301, %cst_21 {dimension_numbers = #tpu.dot_dimension_numbers<[1], [0], [0], [1], [0, 0, 1, 1], [], []>} : vector<16x4xbf16>, vector<4x256xbf16>, vector<16x256xf32> -> vector<16x256xf32>
    %c0_22 = arith.constant 0 : index
    %c0_23 = arith.constant 0 : index
    %303 = vector.load %arg9[%c0_22, %c0_23] : memref<16x1xf32, #tpu.memory_space<vmem>>, vector<16x1xf32>
    %304 = vector.broadcast %303 : vector<16x1xf32> to vector<16x256xf32>
    %305 = arith.addf %302, %304 : vector<16x256xf32>
    %cst_24 = arith.constant 5.000000e-01 : f32
    %306 = vector.broadcast %cst_24 : f32 to vector<16x256xf32>
    %307 = arith.mulf %306, %305 : vector<16x256xf32>
    %cst_25 = arith.constant 4.471500e-02 : f32
    %308 = vector.broadcast %cst_25 : f32 to vector<16x256xf32>
    %309 = arith.mulf %308, %305 : vector<16x256xf32>
    %310 = arith.mulf %309, %305 : vector<16x256xf32>
    %311 = arith.mulf %310, %305 : vector<16x256xf32>
    %312 = arith.addf %305, %311 : vector<16x256xf32>
    %cst_26 = arith.constant 0.797884583 : f32
    %313 = vector.broadcast %cst_26 : f32 to vector<16x256xf32>
    %314 = arith.mulf %313, %312 : vector<16x256xf32>
    %315 = math.tanh %314 : vector<16x256xf32>
    %cst_27 = arith.constant 1.000000e+00 : f32
    %316 = vector.broadcast %cst_27 : f32 to vector<16x256xf32>
    %317 = arith.addf %316, %315 : vector<16x256xf32>
    %318 = arith.mulf %307, %317 : vector<16x256xf32>
    %319 = arith.mulf %318, %318 : vector<16x256xf32>
    %cst_28 = arith.constant dense<0.000000e+00> : vector<16xf32>
    %320 = vector.multi_reduction <add>, %319, %cst_28 [1] : vector<16x256xf32> to vector<16xf32>
    %321 = vector.shape_cast %320 : vector<16xf32> to vector<16x1xf32>
    %322 = math.sqrt %321 : vector<16x1xf32>
    %cst_29 = arith.constant dense<0.000000e+00> : vector<1xf32>
    %323 = vector.multi_reduction <add>, %322, %cst_29 [0] : vector<16x1xf32> to vector<1xf32>
    %324 = vector.shape_cast %323 : vector<1xf32> to vector<1x1xf32>
    %cst_30 = arith.constant 1.600000e+01 : f32
    %325 = vector.broadcast %cst_30 : f32 to vector<1x1xf32>
    %326 = arith.divf %324, %325 : vector<1x1xf32>
    %cst_31 = arith.constant 9.99999997E-7 : f32
    %327 = vector.broadcast %cst_31 : f32 to vector<1x1xf32>
    %328 = arith.addf %326, %327 : vector<1x1xf32>
    %329 = vector.broadcast %328 : vector<1x1xf32> to vector<16x1xf32>
    %330 = arith.divf %322, %329 : vector<16x1xf32>
    %c0_32 = arith.constant 0 : index
    %c0_33 = arith.constant 0 : index
    %331 = vector.load %arg10[%c0_32, %c0_33] : memref<16x1xf32, #tpu.memory_space<vmem>>, vector<16x1xf32>
    %332 = vector.broadcast %330 : vector<16x1xf32> to vector<16x256xf32>
    %333 = arith.mulf %318, %332 : vector<16x256xf32>
    %334 = vector.broadcast %331 : vector<16x1xf32> to vector<16x256xf32>
    %335 = arith.mulf %334, %333 : vector<16x256xf32>
    %c0_34 = arith.constant 0 : index
    %c0_35 = arith.constant 0 : index
    %336 = vector.load %arg11[%c0_34, %c0_35] : memref<16x1xf32, #tpu.memory_space<vmem>>, vector<16x1xf32>
    %337 = vector.broadcast %336 : vector<16x1xf32> to vector<16x256xf32>
    %338 = arith.addf %335, %337 : vector<16x256xf32>
    %339 = arith.addf %338, %318 : vector<16x256xf32>
    %c0_36 = arith.constant 0 : index
    %c0_37 = arith.constant 0 : index
    %340 = vector.load %arg12[%c0_36, %c0_37] : memref<4x16xf32, #tpu.memory_space<vmem>>, vector<4x16xf32>
    %341 = arith.truncf %340 : vector<4x16xf32> to vector<4x16xbf16>
    %342 = arith.truncf %339 : vector<16x256xf32> to vector<16x256xbf16>
    %cst_38 = arith.constant dense<0.000000e+00> : vector<4x256xf32>
    %343 = tpu.matmul %341, %342, %cst_38 {dimension_numbers = #tpu.dot_dimension_numbers<[1], [0], [0], [1], [0, 0, 1, 1], [], []>} : vector<4x16xbf16>, vector<16x256xbf16>, vector<4x256xf32> -> vector<4x256xf32>
    %c0_39 = arith.constant 0 : index
    %c0_40 = arith.constant 0 : index
    %344 = vector.load %arg13[%c0_39, %c0_40] : memref<4x1xf32, #tpu.memory_space<vmem>>, vector<4x1xf32>
    %345 = vector.broadcast %344 : vector<4x1xf32> to vector<4x256xf32>
    %346 = arith.addf %343, %345 : vector<4x256xf32>
    %347 = arith.index_cast %arg0 : i32 to index
    %348 = memref.load %arg1[%347] : memref<2xf32, #tpu.memory_space<smem>>
    %349 = vector.broadcast %348 : f32 to vector<4x256xf32>
    %350 = arith.mulf %349, %346 : vector<4x256xf32>
    %351 = arith.addf %1, %350 : vector<4x256xf32>
    %c0_41 = arith.constant 0 : index
    %c0_42 = arith.constant 0 : index
    %c0_43 = arith.constant 0 : index
    %352 = vector.load %arg14[%c0_41, %c0_42, %c0_43] : memref<1x4x256xf32, #tpu.memory_space<vmem>>, vector<1x4x256xf32>
    %353 = vector.shape_cast %352 : vector<1x4x256xf32> to vector<4x256xf32>
    %354 = vector.shape_cast %351 : vector<4x256xf32> to vector<1x4x256xf32>
    tpu.vector_store %arg14[%c0_41, %c0_42, %c0_43], %354 {strides = array<i32>} : memref<1x4x256xf32, #tpu.memory_space<vmem>>, vector<1x4x256xf32>,
    return
  }
  func.func @transform_0(%arg0: i32, %arg1: memref<2xf32, #tpu.memory_space<smem>>) -> (i32, i32, i32) {
    %c0_i32 = arith.constant 0 : i32
    %c0_i32_0 = arith.constant 0 : i32
    %c0_i32_1 = arith.constant 0 : i32
    return %arg0, %c0_i32, %c0_i32_0 : i32, i32, i32
  }
  func.func @transform_1(%arg0: i32, %arg1: memref<2xf32, #tpu.memory_space<smem>>) -> (i32, i32) {
    %c0_i32 = arith.constant 0 : i32
    %c0_i32_0 = arith.constant 0 : i32
    %c0_i32_1 = arith.constant 0 : i32
    return %c0_i32, %c0_i32_0 : i32, i32
  }
  func.func @transform_2(%arg0: i32, %arg1: memref<2xf32, #tpu.memory_space<smem>>) -> (i32, i32) {
    %c0_i32 = arith.constant 0 : i32
    %c0_i32_0 = arith.constant 0 : i32
    %c0_i32_1 = arith.constant 0 : i32
    return %c0_i32, %c0_i32_0 : i32, i32
  }
  func.func @transform_3(%arg0: i32, %arg1: memref<2xf32, #tpu.memory_space<smem>>) -> (i32, i32) {
    %c0_i32 = arith.constant 0 : i32
    %c0_i32_0 = arith.constant 0 : i32
    %c0_i32_1 = arith.constant 0 : i32
    return %c0_i32, %c0_i32_0 : i32, i32
  }
  func.func @transform_4(%arg0: i32, %arg1: memref<2xf32, #tpu.memory_space<smem>>) -> (i32, i32) {
    %c0_i32 = arith.constant 0 : i32
    %c0_i32_0 = arith.constant 0 : i32
    %c0_i32_1 = arith.constant 0 : i32
    return %c0_i32, %c0_i32_0 : i32, i32
  }
  func.func @transform_5(%arg0: i32, %arg1: memref<2xf32, #tpu.memory_space<smem>>) -> (i32, i32) {
    %c0_i32 = arith.constant 0 : i32
    %c0_i32_0 = arith.constant 0 : i32
    %c0_i32_1 = arith.constant 0 : i32
    return %c0_i32, %c0_i32_0 : i32, i32
  }
  func.func @transform_6(%arg0: i32, %arg1: memref<2xf32, #tpu.memory_space<smem>>) -> (i32, i32) {
    %c0_i32 = arith.constant 0 : i32
    %c0_i32_0 = arith.constant 0 : i32
    %c0_i32_1 = arith.constant 0 : i32
    return %c0_i32, %c0_i32_0 : i32, i32
  }
  func.func @transform_7(%arg0: i32, %arg1: memref<2xf32, #tpu.memory_space<smem>>) -> (i32, i32) {
    %c0_i32 = arith.constant 0 : i32
    %c0_i32_0 = arith.constant 0 : i32
    %c0_i32_1 = arith.constant 0 : i32
    return %c0_i32, %c0_i32_0 : i32, i32
  }
  func.func @transform_8(%arg0: i32, %arg1: memref<2xf32, #tpu.memory_space<smem>>) -> (i32, i32) {
    %c0_i32 = arith.constant 0 : i32
    %c0_i32_0 = arith.constant 0 : i32
    %c0_i32_1 = arith.constant 0 : i32
    return %c0_i32, %c0_i32_0 : i32, i32
  }
  func.func @transform_9(%arg0: i32, %arg1: memref<2xf32, #tpu.memory_space<smem>>) -> (i32, i32) {
    %c0_i32 = arith.constant 0 : i32
    %c0_i32_0 = arith.constant 0 : i32
    %c0_i32_1 = arith.constant 0 : i32
    return %c0_i32, %c0_i32_0 : i32, i32
  }
  func.func @transform_10(%arg0: i32, %arg1: memref<2xf32, #tpu.memory_space<smem>>) -> (i32, i32) {
    %c0_i32 = arith.constant 0 : i32
    %c0_i32_0 = arith.constant 0 : i32
    %c0_i32_1 = arith.constant 0 : i32
    return %c0_i32, %c0_i32_0 : i32, i32
  }
  func.func @transform_11(%arg0: i32, %arg1: memref<2xf32, #tpu.memory_space<smem>>) -> (i32, i32) {
    %c0_i32 = arith.constant 0 : i32
    %c0_i32_0 = arith.constant 0 : i32
    %c0_i32_1 = arith.constant 0 : i32
    return %c0_i32, %c0_i32_0 : i32, i32
  }
  func.func @transform_12(%arg0: i32, %arg1: memref<2xf32, #tpu.memory_space<smem>>) -> (i32, i32, i32) {
    %c0_i32 = arith.constant 0 : i32
    %c0_i32_0 = arith.constant 0 : i32
    %c0_i32_1 = arith.constant 0 : i32
    return %arg0, %c0_i32, %c0_i32_0 : i32, i32, i32
  }
}

</mosaic_0001>

<bundles_post_ra>
// kernel: tpu_custom_call.1
= control target key start
LH: loop header
LB: loop body
LE: loop exit
PB: predicated region body
PF: predicated region fallthrough
CT: control target
= control target key end

     0   :  { %s4595_s0 = inlined_call_operand.hbm [shape: f32[2], index: 0, kind: input, shape index: {}]   ;;  %s4596_s1 = inlined_call_operand.hbm [shape: f32[2,4,256], index: 1, kind: input, shape index: {}]   ;;  %s4597_s2 = inlined_call_operand.hbm [shape: f32[7,384], index: 2, kind: input, shape index: {}]   ;;  %s4598_s3 = inlined_call_operand.hbm [shape: f32[4,49], index: 3, kind: input, shape index: {}]   ;;  %s4599_s4 = inlined_call_operand.hbm [shape: f32[4,1], index: 4, kind: input, shape index: {}]   ;;  %s4600_s5 = inlined_call_operand.hbm [shape: f32[4,1], index: 5, kind: input, shape index: {}]   ;;  %s4601_s6 = inlined_call_operand.hbm [shape: f32[4,1], index: 6, kind: input, shape index: {}]   ;;  %s4602_s7 = inlined_call_operand.hbm [shape: f32[16,4], index: 7, kind: input, shape index: {}]   ;;  %s4603_s8 = inlined_call_operand.hbm [shape: f32[16,1], index: 8, kind: input, shape index: {}]   ;;  %s4604_s9 = inlined_call_operand.hbm [shape: f32[16,1], index: 9, kind: input, shape index: {}]   ;;  %s4605_s10 = inlined_call_operand.hbm [shape: f32[16,1], index: 10, kind: input, shape index: {}]   ;;  %s4606_s11 = inlined_call_operand.hbm [shape: f32[4,16], index: 11, kind: input, shape index: {}]   ;;  %s4607_s12 = inlined_call_operand.hbm [shape: f32[4,1], index: 12, kind: input, shape index: {}]   ;;  %s4608_s13 = inlined_call_operand.hbm [shape: f32[2,4,256], index: 13, kind: output, shape index: {}]  }
   0x1   :  { %4624 = sst [smem:[#allocation45_spill]] %s4597_s2  ;;  %s2694_s27 = scalar_lea.hbm %s4595_s0, 16 }
   0x2   :  { %4625 = sst [smem:[#allocation46_spill]] %s4599_s4  ;;  %p2695_p0 = scmp.ne.s32.totalorder %s4595_s0, %s2694_s27 }
   0x3   :  { %4626 = sst [smem:[#allocation47_spill]] %s4601_s6  ;;  %p2698_p1 = scmp.lt.u32.totalorder %s2694_s27, %s4595_s0 }
   0x4   :  { %4627 = sst [smem:[#allocation48_spill]] %s4608_s13 }
   0x5   :  { %p2700_p2 = pnand %p2698_p1, %p2695_p0 }
   0x7   :  { %2703 = shalt.err (!%p2700_p2)  }
   0x8   :  { %s3136_s15 = smov [#allocation3]  }
   0x9   :  { %19 = dma.hbm_to_smem %s4595_s0, 16, %s3136_s15, [#allocation2] }
   0xa   :  { %3086 = dma.done.wait [#allocation2], 16 }
   0xb   :  { %3087 = vsyncadd [#allocation2], 4294967280 }
   0xc   :  { %21 = sfence }
   0xd   :  { %22 = vsyncpa [#allocation5], 0 }
   0xe   :  { %24 = vsyncpa [#allocation5 + $0x1], 0 }
   0xf   :  { %25 = vsyncpa [#allocation8], 0 }
  0x10   :  { %26 = vsyncpa [#allocation11], 0 }
  0x11   :  { %27 = vsyncpa [#allocation14], 0 }
  0x12   :  { %28 = vsyncpa [#allocation17], 0 }
  0x13   :  { %29 = vsyncpa [#allocation20], 0 }
  0x14   :  { %30 = vsyncpa [#allocation23], 0 }
  0x15   :  { %31 = vsyncpa [#allocation6], 0 }
  0x16   :  { %33 = vsyncpa [#allocation6 + $0x1], 0  ;;  %s3332_s18 = smov 0   ;;  %s3334_s19 = smov 0  }
  0x17   :  { %s3336_s20 = smov 0   ;;  %s3338_s0 = smov 0  }
  0x18 LB: > { %s3137_s21 = smov [#allocation7]   ;;  %s3353_s23 = sadd.s32 4294967295, %s3134_s0   ;;  %s3134_s0 = sphi %s3338_s0, %s4681_s0   ;;  %s3130_s20 = sphi %s3336_s20, %s4680_s20   ;;  %s3126_s19 = sphi %s3334_s19, %s4679_s19   ;;  %s3122_s18 = sphi %s3332_s18, %s4678_s18  }
  0x19   : > { %s340_s22 = sshll.u32 %s3137_s21, 4  ;;  %p2326_p3 = scmp.ge.s32.totalorder %s3134_s0, 1  ;;  %s341_s22 = int_to_ptr.vmem [resolvable:$true] %s340_s22 }
  0x1a   : > { %p4609_p4 = scmp.eq.s32.totalorder %s3353_s23, 0  ;;  %p327_p5 = scmp.lt.s32.totalorder %s3134_s0, 3 }
  0x1b   : > { %s3138_s25 = smov [#allocation10]   ;;  %s3139_s27 = smov [#allocation13]  }
  0x1c   : > { %p3358_p6 = pnand %p2326_p3, %p327_p5  ;;  %s362_s26 = sshll.u32 %s3138_s25, 4  ;;  %s3365_s26 = int_to_ptr.vmem [resolvable:$true] %s362_s26 }
  0x1d   : > { %s384_s28 = sshll.u32 %s3139_s27, 4  ;;  %s4631_s2 = sld [smem:[#allocation45_spill]]  ;;  %s3373_s28 = int_to_ptr.vmem [resolvable:$true] %s384_s28 }
  0x1e   : > { %s4628_s24 = scalar_select %p3358_p6, 1, 0 }
  0x1f   : > { %p2414_p8 = pneg %p3358_p6 }
  0x20   : > { %4629 = sst [smem:[#allocation34_spill]] %s4628_s24 }
  0x21   : > { %p3369_p9 = pnand %p2414_p8, %p4609_p4 }
  0x23   : > { %s2704_s15 = scalar_lea.hbm %s4631_s2, 384  ;;  %p3383_p11 = pneg %p3369_p9 }
  0x24   : > { %p2705_p10 = scmp.ne.s32.totalorder %s4631_s2, %s2704_s15  ;;  %p2711_p0 = scmp.lt.u32.totalorder %s2704_s15, %s4631_s2 }
  0x26   : > { %p2707_p12 = pnand %p3383_p11, %p2705_p10 }
  0x28   : > { %p2708_p13 = pneg %p2707_p12 }
  0x2a   : > { %p2713_p1 = pnand %p2711_p0, %p2708_p13 }
  0x2c   : > { %2716 = shalt.err (!%p2713_p1)
}
  0x2d   : > { %s2717_s30 = scalar_lea.vmem %s341_s22, 384  ;;  %p2725_p8 = scmp.lt.s32.totalorder %s341_s22, %s341_s22 }
  0x2e   : > { %p2718_p2 = scmp.ne.s32.totalorder %s341_s22, %s2717_s30  ;;  %p2726_p7 = scmp.lt.s32.totalorder %s2717_s30, %s2717_s30 }
  0x30   : > { %p2720_p3 = pnand %p2718_p2, %p3383_p11  ;;  %p2727_p4 = por %p2726_p7, %p2725_p8 }
  0x32   : > { %p2721_p5 = pneg %p2720_p3 }
  0x34   : > { %p2728_p6 = pnand %p2727_p4, %p2721_p5 }
  0x36   : > { %2731 = shalt.err (!%p2728_p6)
}
  0x37   : > { %2417 = dma.hbm_to_vmem [thread:$0]  (!%p3369_p9), %s4631_s2, 384, %s341_s22, [#allocation8]  }
  0x38   : > { %s4633_s4 = sld [smem:[#allocation46_spill]] }
  0x3e   : > { %s2732_s25 = scalar_lea.hbm %s4633_s4, 64 }
  0x3f   : > { %p2733_p10 = scmp.ne.s32.totalorder %s4633_s4, %s2732_s25  ;;  %p2739_p4 = scmp.lt.u32.totalorder %s2732_s25, %s4633_s4 }
  0x41   : > { %p2735_p12 = pnand %p2733_p10, %p3383_p11 }
  0x43   : > { %p2736_p7 = pneg %p2735_p12 }
  0x45   : > { %p2741_p6 = pnand %p2739_p4, %p2736_p7 }
  0x47   : > { %2744 = shalt.err (!%p2741_p6)
}
  0x48   : > { %s2745_s22 = scalar_lea.vmem %s3365_s26, 64  ;;  %p2753_p2 = scmp.lt.s32.totalorder %s3365_s26, %s3365_s26 }
  0x49   : > { %p2746_p13 = scmp.ne.s32.totalorder %s3365_s26, %s2745_s22  ;;  %p2754_p3 = scmp.lt.s32.totalorder %s2745_s22, %s2745_s22 }
  0x4b   : > { %p2748_p0 = pnand %p2746_p13, %p3383_p11  ;;  %p2755_p5 = por %p2754_p3, %p2753_p2 }
  0x4d   : > { %p2749_p1 = pneg %p2748_p0 }
  0x4f   : > { %p2756_p8 = pnand %p2755_p5, %p2749_p1 }
  0x51   : > { %2759 = shalt.err (!%p2756_p8)
}
  0x52   : > { %2423 = dma.hbm_to_vmem [thread:$0]  (!%p3369_p9), %s4633_s4, 64, %s3365_s26, [#allocation11]  }
  0x53   : > { %s4634_s6 = sld [smem:[#allocation47_spill]] }
  0x59   : > { %s2760_s15 = scalar_lea.hbm %s4634_s6, 64 }
  0x5a   : > { %p2761_p10 = scmp.ne.s32.totalorder %s4634_s6, %s2760_s15  ;;  %p2767_p4 = scmp.lt.u32.totalorder %s2760_s15, %s4634_s6 }
  0x5c   : > { %p2763_p12 = pnand %p2761_p10, %p3383_p11 }
  0x5e   : > { %p2764_p7 = pneg %p2763_p12 }
  0x60   : > { %p2769_p6 = pnand %p2767_p4, %p2764_p7 }
  0x62   : > { %2772 = shalt.err (!%p2769_p6)
}
  0x63   : > { %s2773_s26 = scalar_lea.vmem %s3373_s28, 64  ;;  %p2781_p2 = scmp.lt.s32.totalorder %s3373_s28, %s3373_s28 }
  0x64   : > { %p2774_p13 = scmp.ne.s32.totalorder %s3373_s28, %s2773_s26  ;;  %p2782_p3 = scmp.lt.s32.totalorder %s2773_s26, %s2773_s26 }
  0x66   : > { %p2776_p0 = pnand %p2774_p13, %p3383_p11  ;;  %p2783_p5 = por %p2782_p3, %p2781_p2 }
  0x68   : > { %p2777_p1 = pneg %p2776_p0 }
  0x6a   : > { %p2784_p8 = pnand %p2783_p5, %p2777_p1 }
  0x6c   : > { %2787 = shalt.err (!%p2784_p8)
}
  0x6d   : > { %2429 = dma.hbm_to_vmem [thread:$0]  (!%p3369_p9), %s4634_s6, 64, %s3373_s28, [#allocation14]  }
  0x6e   : > { %s3140_s24 = smov [#allocation16]   ;;  %s3141_s16 = smov [#allocation19]  }
  0x6f   : > { %s407_s14 = sshll.u32 %s3140_s24, 4  ;;  %s433_s15 = sshll.u32 %s3141_s16, 4  ;;  %s408_s14 = int_to_ptr.vmem [resolvable:$true] %s407_s14  ;;  %s434_s15 = int_to_ptr.vmem [resolvable:$true] %s433_s15 }
  0x70   : > { %s2788_s27 = scalar_lea.hbm %s4603_s8, 256 }
  0x71   : > { %p2789_p10 = scmp.ne.s32.totalorder %s4603_s8, %s2788_s27  ;;  %p2795_p4 = scmp.lt.u32.totalorder %s2788_s27, %s4603_s8 }
  0x73   : > { %p2791_p12 = pnand %p2789_p10, %p3383_p11 }
  0x75   : > { %p2792_p7 = pneg %p2791_p12 }
  0x77   : > { %p2797_p6 = pnand %p2795_p4, %p2792_p7 }
  0x79   : > { %2800 = shalt.err (!%p2797_p6)
}
  0x7a   : > { %s2801_s28 = scalar_lea.vmem %s408_s14, 256  ;;  %p2809_p2 = scmp.lt.s32.totalorder %s408_s14, %s408_s14 }
  0x7b   : > { %p2802_p13 = scmp.ne.s32.totalorder %s408_s14, %s2801_s28  ;;  %p2810_p3 = scmp.lt.s32.totalorder %s2801_s28, %s2801_s28 }
  0x7d   : > { %p2804_p0 = pnand %p2802_p13, %p3383_p11  ;;  %p2811_p5 = por %p2810_p3, %p2809_p2 }
  0x7f   : > { %p2805_p1 = pneg %p2804_p0 }
  0x81   : > { %p2812_p8 = pnand %p2811_p5, %p2805_p1 }
  0x83   : > { %2815 = shalt.err (!%p2812_p8)
}
  0x84   : > { %s3142_s13 = smov 128   ;;  %s3143_s24 = smov 8  }
  0x85   : > { %2435 = dma.hbm_to_vmem [thread:$0]  (!%p3369_p9), %s4603_s8, 256, %s408_s14, [#allocation17], %s3142_s13, %s3142_s13, %s3143_s24  }
  0x86   : > { %s2816_s27 = scalar_lea.hbm %s4605_s10, 256 }
  0x87   : > { %p2817_p10 = scmp.ne.s32.totalorder %s4605_s10, %s2816_s27  ;;  %p2823_p4 = scmp.lt.u32.totalorder %s2816_s27, %s4605_s10 }
  0x89   : > { %p2819_p12 = pnand %p2817_p10, %p3383_p11 }
  0x8b   : > { %p2820_p7 = pneg %p2819_p12 }
  0x8d   : > { %p2825_p6 = pnand %p2823_p4, %p2820_p7 }
  0x8f   : > { %2828 = shalt.err (!%p2825_p6)
}
  0x90   : > { %s2829_s2 = scalar_lea.vmem %s434_s15, 256  ;;  %p2837_p2 = scmp.lt.s32.totalorder %s434_s15, %s434_s15 }
  0x91   : > { %p2830_p13 = scmp.ne.s32.totalorder %s434_s15, %s2829_s2  ;;  %p2838_p3 = scmp.lt.s32.totalorder %s2829_s2, %s2829_s2 }
  0x93   : > { %p2832_p0 = pnand %p2830_p13, %p3383_p11  ;;  %p2839_p5 = por %p2838_p3, %p2837_p2 }
  0x95   : > { %p2833_p1 = pneg %p2832_p0 }
  0x97   : > { %p2840_p8 = pnand %p2839_p5, %p2833_p1 }
  0x99   : > { %2843 = shalt.err (!%p2840_p8)
}
  0x9a   : > { %2441 = dma.hbm_to_vmem [thread:$0]  (!%p3369_p9), %s4605_s10, 256, %s434_s15, [#allocation20], %s3142_s13, %s3142_s13, %s3143_s24  }
  0x9b   : > { %s3144_s17 = smov [#allocation9]   ;;  %s3145_s27 = smov [#allocation12]  }
  0x9c   : > { %s351_s25 = sshll.u32 %s3144_s17, 4  ;;  %s373_s30 = sshll.u32 %s3145_s27, 4  ;;  %s352_s25 = int_to_ptr.vmem [resolvable:$true] %s351_s25  ;;  %s374_s30 = int_to_ptr.vmem [resolvable:$true] %s373_s30 }
  0x9d   : > { %s2844_s28 = scalar_lea.hbm %s4598_s3, 64 }
  0x9e   : > { %p2845_p10 = scmp.ne.s32.totalorder %s4598_s3, %s2844_s28  ;;  %p2851_p4 = scmp.lt.u32.totalorder %s2844_s28, %s4598_s3 }
  0xa0   : > { %p2847_p12 = pnand %p2845_p10, %p3383_p11 }
  0xa2   : > { %p2848_p7 = pneg %p2847_p12 }
  0xa4   : > { %p2853_p6 = pnand %p2851_p4, %p2848_p7 }
  0xa6   : > { %2856 = shalt.err (!%p2853_p6)
}
  0xa7   : > { %s2857_s15 = scalar_lea.vmem %s352_s25, 64  ;;  %p2865_p2 = scmp.lt.s32.totalorder %s352_s25, %s352_s25 }
  0xa8   : > { %p2858_p13 = scmp.ne.s32.totalorder %s352_s25, %s2857_s15  ;;  %p2866_p3 = scmp.lt.s32.totalorder %s2857_s15, %s2857_s15 }
  0xaa   : > { %p2860_p0 = pnand %p2858_p13, %p3383_p11  ;;  %p2867_p5 = por %p2866_p3, %p2865_p2 }
  0xac   : > { %p2861_p1 = pneg %p2860_p0 }
  0xae   : > { %p2868_p8 = pnand %p2867_p5, %p2861_p1 }
  0xb0   : > { %2871 = shalt.err (!%p2868_p8)
}
  0xb1   : > { %2420 = dma.hbm_to_vmem [thread:$0]  (!%p3369_p9), %s4598_s3, 64, %s352_s25, [#allocation8]  }
  0xb2   : > { %s2872_s27 = scalar_lea.hbm %s4600_s5, 64 }
  0xb3   : > { %p2873_p10 = scmp.ne.s32.totalorder %s4600_s5, %s2872_s27  ;;  %p2879_p4 = scmp.lt.u32.totalorder %s2872_s27, %s4600_s5 }
  0xb5   : > { %p2875_p12 = pnand %p2873_p10, %p3383_p11 }
  0xb7   : > { %p2876_p7 = pneg %p2875_p12 }
  0xb9   : > { %p2881_p6 = pnand %p2879_p4, %p2876_p7 }
  0xbb   : > { %2884 = shalt.err (!%p2881_p6)
}
  0xbc   : > { %s2885_s14 = scalar_lea.vmem %s374_s30, 64  ;;  %p2893_p2 = scmp.lt.s32.totalorder %s374_s30, %s374_s30 }
  0xbd   : > { %p2886_p13 = scmp.ne.s32.totalorder %s374_s30, %s2885_s14  ;;  %p2894_p3 = scmp.lt.s32.totalorder %s2885_s14, %s2885_s14 }
  0xbf   : > { %p2888_p0 = pnand %p2886_p13, %p3383_p11  ;;  %p2895_p5 = por %p2894_p3, %p2893_p2 }
  0xc1   : > { %p2889_p1 = pneg %p2888_p0 }
  0xc3   : > { %p2896_p8 = pnand %p2895_p5, %p2889_p1 }
  0xc5   : > { %2899 = shalt.err (!%p2896_p8)
}
  0xc6   : > { %2426 = dma.hbm_to_vmem [thread:$0]  (!%p3369_p9), %s4600_s5, 64, %s374_s30, [#allocation11]  }
  0xc7   : > { %s3146_s4 = smov [#allocation15]   ;;  %s3147_s6 = smov [#allocation18]  }
  0xc8   : > { %s394_s16 = sshll.u32 %s3146_s4, 4  ;;  %s420_s17 = sshll.u32 %s3147_s6, 4  ;;  %s395_s16 = int_to_ptr.vmem [resolvable:$true] %s394_s16  ;;  %s421_s17 = int_to_ptr.vmem [resolvable:$true] %s420_s17 }
  0xc9   : > { %s2900_s22 = scalar_lea.hbm %s4602_s7, 256 }
  0xca   : > { %p2901_p10 = scmp.ne.s32.totalorder %s4602_s7, %s2900_s22  ;;  %p2907_p4 = scmp.lt.u32.totalorder %s2900_s22, %s4602_s7 }
  0xcc   : > { %p2903_p12 = pnand %p2901_p10, %p3383_p11 }
  0xce   : > { %p2904_p7 = pneg %p2903_p12 }
  0xd0   : > { %p2909_p6 = pnand %p2907_p4, %p2904_p7 }
  0xd2   : > { %2912 = shalt.err (!%p2909_p6)
}
  0xd3   : > { %s2913_s30 = scalar_lea.vmem %s395_s16, 256  ;;  %p2921_p2 = scmp.lt.s32.totalorder %s395_s16, %s395_s16 }
  0xd4   : > { %p2914_p13 = scmp.ne.s32.totalorder %s395_s16, %s2913_s30  ;;  %p2922_p3 = scmp.lt.s32.totalorder %s2913_s30, %s2913_s30 }
  0xd6   : > { %p2916_p0 = pnand %p2914_p13, %p3383_p11  ;;  %p2923_p5 = por %p2922_p3, %p2921_p2 }
  0xd8   : > { %p2917_p1 = pneg %p2916_p0 }
  0xda   : > { %p2924_p8 = pnand %p2923_p5, %p2917_p1 }
  0xdc   : > { %2927 = shalt.err (!%p2924_p8)
}
  0xdd   : > { %2432 = dma.hbm_to_vmem [thread:$0]  (!%p3369_p9), %s4602_s7, 256, %s395_s16, [#allocation14], %s3142_s13, %s3142_s13, %s3143_s24  }
  0xde   : > { %s2928_s26 = scalar_lea.hbm %s4604_s9, 256 }
  0xdf   : > { %p2929_p10 = scmp.ne.s32.totalorder %s4604_s9, %s2928_s26  ;;  %p2935_p4 = scmp.lt.u32.totalorder %s2928_s26, %s4604_s9 }
  0xe1   : > { %p2931_p12 = pnand %p2929_p10, %p3383_p11 }
  0xe3   : > { %p2932_p7 = pneg %p2931_p12 }
  0xe5   : > { %p2937_p6 = pnand %p2935_p4, %p2932_p7 }
  0xe7   : > { %2940 = shalt.err (!%p2937_p6)
}
  0xe8   : > { %s2941_s25 = scalar_lea.vmem %s421_s17, 256  ;;  %p2949_p2 = scmp.lt.s32.totalorder %s421_s17, %s421_s17 }
  0xe9   : > { %p2942_p13 = scmp.ne.s32.totalorder %s421_s17, %s2941_s25  ;;  %p2950_p3 = scmp.lt.s32.totalorder %s2941_s25, %s2941_s25 }
  0xeb   : > { %p2944_p0 = pnand %p2942_p13, %p3383_p11  ;;  %p2951_p5 = por %p2950_p3, %p2949_p2 }
  0xed   : > { %p2945_p1 = pneg %p2944_p0 }
  0xef   : > { %p2952_p8 = pnand %p2951_p5, %p2945_p1 }
  0xf1   : > { %2955 = shalt.err (!%p2952_p8)
}
  0xf2   : > { %2438 = dma.hbm_to_vmem [thread:$0]  (!%p3369_p9), %s4604_s9, 256, %s421_s17, [#allocation17], %s3142_s13, %s3142_s13, %s3143_s24  }
  0xf3   : > { %s3148_s15 = smov [#allocation21]   ;;  %s3149_s6 = smov [#allocation22]  }
  0xf4   : > { %s447_s4 = sshll.u32 %s3148_s15, 4  ;;  %s458_s27 = sshll.u32 %s3149_s6, 4  ;;  %s448_s4 = int_to_ptr.vmem [resolvable:$true] %s447_s4  ;;  %s459_s27 = int_to_ptr.vmem [resolvable:$true] %s458_s27 }
  0xf5   : > { %s2956_s28 = scalar_lea.hbm %s4606_s11, 64 }
  0xf6   : > { %p2957_p10 = scmp.ne.s32.totalorder %s4606_s11, %s2956_s28  ;;  %p2963_p4 = scmp.lt.u32.totalorder %s2956_s28, %s4606_s11 }
  0xf8   : > { %p2959_p12 = pnand %p2957_p10, %p3383_p11 }
  0xfa   : > { %p2960_p7 = pneg %p2959_p12 }
  0xfc   : > { %p2965_p6 = pnand %p2963_p4, %p2960_p7 }
  0xfe   : > { %2968 = shalt.err (!%p2965_p6)
}
  0xff   : > { %s2969_s13 = scalar_lea.vmem %s448_s4, 64  ;;  %p2977_p2 = scmp.lt.s32.totalorder %s448_s4, %s448_s4 }
 0x100   : > { %p2970_p13 = scmp.ne.s32.totalorder %s448_s4, %s2969_s13  ;;  %p2978_p3 = scmp.lt.s32.totalorder %s2969_s13, %s2969_s13 }
 0x102   : > { %p2972_p0 = pnand %p2970_p13, %p3383_p11  ;;  %p2979_p5 = por %p2978_p3, %p2977_p2 }
 0x104   : > { %p2973_p1 = pneg %p2972_p0 }
 0x106   : > { %p2980_p8 = pnand %p2979_p5, %p2973_p1 }
 0x108   : > { %2983 = shalt.err (!%p2980_p8)
}
 0x109   : > { %2444 = dma.hbm_to_vmem [thread:$0]  (!%p3369_p9), %s4606_s11, 64, %s448_s4, [#allocation20]  }
 0x10a   : > { %s2984_s6 = scalar_lea.hbm %s4607_s12, 64 }
 0x10b   : > { %p2985_p10 = scmp.ne.s32.totalorder %s4607_s12, %s2984_s6  ;;  %p2991_p4 = scmp.lt.u32.totalorder %s2984_s6, %s4607_s12 }
 0x10d   : > { %p2987_p12 = pnand %p2985_p10, %p3383_p11 }
 0x10f   : > { %p2988_p7 = pneg %p2987_p12 }
 0x111   : > { %p2993_p6 = pnand %p2991_p4, %p2988_p7 }
 0x113   : > { %2996 = shalt.err (!%p2993_p6)
}
 0x114   : > { %s2997_s14 = scalar_lea.vmem %s459_s27, 64  ;;  %p3005_p2 = scmp.lt.s32.totalorder %s459_s27, %s459_s27 }
 0x115   : > { %p2998_p13 = scmp.ne.s32.totalorder %s459_s27, %s2997_s14  ;;  %p3006_p3 = scmp.lt.s32.totalorder %s2997_s14, %s2997_s14 }
 0x117   : > { %p3000_p0 = pnand %p2998_p13, %p3383_p11  ;;  %p3007_p5 = por %p3006_p3, %p3005_p2 }
 0x119   : > { %p3001_p1 = pneg %p3000_p0 }
 0x11b   : > { %p3008_p8 = pnand %p3007_p5, %p3001_p1 }
 0x11d   : > { %3011 = shalt.err (!%p3008_p8)
}
 0x11e   : > { %2447 = dma.hbm_to_vmem [thread:$0]  (!%p3369_p9), %s4607_s12, 64, %s459_s27, [#allocation23]  }
 0x11f   : > { %s2325_s21 = sadd.s32 4294967294, %s3134_s0   ;;  %s3603_s29 = sadd.s32 1, %s3134_s0  }
 0x120   : > { %s46_s16 = sadd.s32 1, %s3130_s20  ;;  %s43_s13 = ssub.s32 %s3134_s0, %s3603_s29 }
 0x121   : > { %p53_p11 = scmp.ne.s32.totalorder %s3130_s20, %s3126_s19  ;;  %p44_p10 = scmp.eq.s32.totalorder %s43_s13, 0 }
 0x122   : > { %p54_p12 = scmp.eq.s32.totalorder %s3134_s0, 0  ;;  %p59_p7 = scmp.ne.s32.totalorder %s3126_s19, %s3122_s18 }
 0x123   : > { %p314_p4 = scmp.eq.s32.totalorder %s3353_s23, 1  ;;  %p4635_p13 = scmp.eq.s32.totalorder %s3353_s23, 0 }
 0x124   : > { %s3615_s24 = scalar_select %p44_p10, %s3130_s20, %s46_s16  }
 0x125   : > { %p55_p6 = por %p54_p12, %p53_p11  ;;  %p3619_p0 = por %p4635_p13, %p59_p7 }
 0x126   : > { %p3623_p9 = por %p314_p4, %p53_p11  ;;  %p320_p1 = scmp.eq.s32.totalorder %s2325_s21, 1 }
 0x127   : > { %p2467_p2 = scmp.lt.s32.totalorder %s3134_s0, 2  ;;  %s469_s30 = sand.u32 1, %s3130_s20  }
 0x128   : > { %s4637_s27 = scalar_select %p3623_p9, 1, 0 }
 0x129   : > { %p3629_p3 = por %p320_p1, %p59_p7  ;;  %s2339_s6 = sshll.u32 %s469_s30, 3 }
 0x12a   : > { %s2364_s26 = sshll.u32 %s3134_s0, 7  ;;  %s473_s14 = scalar_lea.vmem [#allocation4], %s2339_s6 }
 0x12b   : > { %s4638_s15 = scalar_select %p3629_p3, 1, 0 }
 0x12c   : > { %s3637_s2 = scalar_lea.hbm %s4596_s1, %s2364_s26  ;;  %s481_s4 = sshll.u32 %s473_s14, 4  ;;  %s3643_s4 = int_to_ptr.vmem [resolvable:$true] %s481_s4 }
 0x12d   : > { %p3639_p5 = pnand %p2467_p2, %p55_p6  ;;  %s470_s21 = scalar_lea.sflag [#allocation5], %s469_s30 }
 0x12e   : > { %s3012_s16 = scalar_lea.hbm %s3637_s2, 128  ;;  %s3017_s26 = scalar_lea.hbm %s4596_s1, 256 }
 0x12f   : > { %p3013_p8 = scmp.ne.s32.totalorder %s3637_s2, %s3012_s16  ;;  %p3014_p11 = pneg %p3639_p5 }
 0x130   : > { %p3018_p7 = scmp.lt.u32.totalorder %s3637_s2, %s4596_s1  ;;  %p3019_p4 = scmp.lt.u32.totalorder %s3017_s26, %s3012_s16 }
 0x131   : > { %p3015_p10 = pnand %p3014_p11, %p3013_p8  ;;  %p3021_p13 = scmp.lt.u32.totalorder %s3012_s16, %s3637_s2 }
 0x132   : > { %p3020_p6 = por %p3019_p4, %p3018_p7 }
 0x133   : > { %p3016_p12 = pneg %p3015_p10 }
 0x134   : > { %p3022_p1 = por %p3021_p13, %p3020_p6 }
 0x136   : > { %p3023_p2 = pnand %p3022_p1, %p3016_p12 }
 0x138   : > { %3026 = shalt.err (!%p3023_p2)
}
 0x139   : > { %s3027_s30 = scalar_lea.vmem %s3643_s4, 128  ;;  %s3150_s14 = smov [#allocation4]  }
 0x13a   : > { %p3028_p8 = scmp.ne.s32.totalorder %s3643_s4, %s3027_s30  ;;  %s3032_s13 = sshll.u32 %s3150_s14, 4  ;;  %s3033_s13 = int_to_ptr.vmem [resolvable:$false] %s3032_s13 }
 0x13b   : > { %s3034_s6 = scalar_lea.vmem %s3033_s13, 256  ;;  %p3035_p9 = scmp.lt.s32.totalorder %s3643_s4, %s3033_s13 }
 0x13c   : > { %p3030_p10 = pnand %p3028_p8, %p3014_p11  ;;  %p3036_p7 = scmp.lt.s32.totalorder %s3034_s6, %s3027_s30 }
 0x13e   : > { %p3031_p3 = pneg %p3030_p10  ;;  %p3037_p4 = por %p3036_p7, %p3035_p9 }
 0x140   : > { %p3038_p6 = pnand %p3037_p4, %p3031_p3 }
 0x142   : > { %3041 = shalt.err (!%p3038_p6)
}
 0x143   : > { %2451 = dma.hbm_to_vmem [thread:$0]  (!%p3639_p5), %s3637_s2, 128, %s3643_s4, %s470_s21  }
 0x144   : > { %s4640_s16 = sld [smem:[#allocation34_spill]] }
 0x14a   : > { %p4641_p12 = scmp.ne.s32.totalorder %s4640_s16, 0 }
 0x14c   : > { %490 = sbr.rel (%p4641_p12) target bundleno = 1687 (0x697), region = 68 }
 0x153   : > { %s3673_s26 = sand.u32 1, %s3126_s19  }
 0x154   : > { %s2343_s22 = sshll.u32 %s3673_s26, 3  ;;  %s493_s28 = scalar_lea.sflag [#allocation5], %s3673_s26 }
 0x155   : > { %s3679_s30 = scalar_lea.vmem [#allocation4], %s2343_s22 }
 0x156   : > { %3089 = dma.done.wait (%p3619_p0), %s493_s28, 128  }
 0x157   : > { %3091 = vsyncadd (%p3619_p0), %s493_s28, 4294967168  ;;  %p4642_p9 = scmp.eq.s32.totalorder %s3353_s23, 0 }
 0x159   : > { %3093 = dma.done.wait (%p4642_p9), [#allocation8], 448   ;;  %p4643_p3 = pmov %p4642_p9 }
 0x15b   : > { %3095 = vsyncadd (%p4643_p3), [#allocation8], 4294966848  ;;  %p4644_p5 = pmov %p4643_p3 }
 0x15c   : > { %p4645_p11 = pmov %p4643_p3 }
 0x15d   : > { %3097 = dma.done.wait (%p4644_p5), [#allocation11], 128  }
 0x15e   : > { %3099 = vsyncadd (%p4645_p11), [#allocation11], 4294967168  ;;  %p4646_p13 = pmov %p4643_p3 }
 0x15f   : > { %p4647_p1 = pmov %p4643_p3 }
 0x160   : > { %3101 = dma.done.wait (%p4646_p13), [#allocation14], 320  }
 0x161   : > { %3103 = vsyncadd (%p4647_p1), [#allocation14], 4294966976  ;;  %p4648_p0 = pmov %p4647_p1 }
 0x163   : > { %3105 = dma.done.wait (%p4648_p0), [#allocation17], 512   ;;  %p4649_p2 = pmov %p4648_p0 }
 0x164   : > { %p4650_p8 = pmov %p4648_p0 }
 0x165   : > { %3107 = vsyncadd (%p4649_p2), [#allocation17], 4294966784 }
 0x166   : > { %3109 = dma.done.wait (%p4650_p8), [#allocation20], 320   ;;  %p4651_p10 = pmov %p4648_p0 }
 0x167   : > { %p4652_p7 = pmov %p4648_p0 }
 0x168   : > { %3111 = vsyncadd (%p4651_p10), [#allocation20], 4294966976 }
 0x169   : > { %3113 = dma.done.wait (%p4652_p7), [#allocation23], 64   ;;  %p4653_p4 = pmov %p4648_p0 }
 0x16a   : > { %v3151_v0 = vmov 7   ;;  %v3152_v1 = vmov 21   ;;  %v600_v2 = vlaneseq  ;;  %v3709_v3 = vld [vmem:[#allocation9] sm:$0xf]  ;;  %v3153_v5 = vmov 0   ;;  %s3154_s17 = smov 51  }
 0x16b   : > { %3115 = vsyncadd (%p4653_p4), [#allocation23], 4294967232  ;;  %2624 = vset.pattern.permute.xlu0 %v3151_v0  ;;  %2626 = vset.pattern.permute.xlu1 %v3152_v1  ;;  %v582_v4 = vld [vmem:[%s3679_s30] sm:$0xff]  ;;  %v3717_v7 = vld [vmem:[#allocation7] sm:$0x7f]  ;;  %v3155_v8 = vmov 14  }
 0x16c   : > { %1946 = vmatprep.mubr.bf16.mxu0 %v3153_v5  ;;  %2116 = vmatprep.mubr.bf16.mxu1 %v3153_v5  ;;  %v3715_v6 = vshrl.u32 %v600_v2, 7  ;;  %v587_v9 = vcombine.high %v582_v4, %v582_v4  ;;  %v3736_v15 = vld [vmem:[#allocation7 + $0x8] sm:$0x7f]  ;;  %v3742_v18 = vld [vmem:[#allocation7 + $0x10] sm:$0x7f]  ;;  %v3156_v23 = vmov 28  }
 0x16d   : > { %625 = vperm.xlu0 %2624, %v3709_v3   ;;  %588 = vrot.lane.b32.xlu1 %v582_v4, %s3154_s17  ;;  %v3157_v24 = vmov 35   ;;  %v3158_v34 = vmov 1   ;;  %v3159_v35 = vmov 42   ;;  %v3160_v36 = vmov 22   ;;  %s3192_s2 = smov 112   ;;  %s3194_s4 = smov 96  }
 0x16e   : > { %v3721_v10 = vsub.s32 2, %v3715_v6  ;;  %v3724_v11 = vsub.s32 3, %v3715_v6  ;;  %v3728_v12 = vsub.s32 4, %v3715_v6  ;;  %v3731_v13 = vsub.s32 5, %v3715_v6  ;;  %s3195_s25 = smov 80   ;;  %s3196_s21 = smov 64  }
 0x16f   : > { %v3734_v14 = vsub.s32 6, %v3715_v6  ;;  %v3161_v37 = vmov 8   ;;  %v3162_v38 = vmov 43   ;;  %v3163_v39 = vmov 15   ;;  %s3197_s14 = smov 48   ;;  %s3198_s13 = smov 32  }
 0x170   : > { %v941_v16 = vrot.slane %v3717_v7, %v3721_v10  ;;  %v1117_v17 = vrot.slane %v3717_v7, %v3724_v11  ;;  %v1293_v19 = vrot.slane %v3717_v7, %v3728_v12  ;;  %v1469_v20 = vrot.slane %v3717_v7, %v3731_v13  ;;  %s3199_s6 = smov 127   ;;  %s3201_s16 = smov 111  }
 0x171   : > { %2625 = vset.pattern.permute.xlu0 %v3155_v8  ;;  %671 = vperm.xlu1 %2626, %v3709_v3   ;;  %v1645_v21 = vrot.slane %v3717_v7, %v3734_v14  ;;  %v945_v22 = vrot.slane %v3736_v15, %v3721_v10  ;;  %v949_v25 = vrot.slane %v3742_v18, %v3721_v10  ;;  %v3164_v40 = vmov 16   ;;  %s3203_s28 = smov 95   ;;  %p4675_p12 = scmp.ne.s32.totalorder %s4637_s27, 0 }
 0x172   : > { %648 = vperm.xlu0 %2625, %v3709_v3   ;;  %v1121_v26 = vrot.slane %v3736_v15, %v3724_v11  ;;  %v1125_v27 = vrot.slane %v3742_v18, %v3724_v11  ;;  %v1297_v28 = vrot.slane %v3736_v15, %v3728_v12  ;;  %v1301_v29 = vrot.slane %v3742_v18, %v3728_v12 }
 0x173   : > { %v1473_v30 = vrot.slane %v3736_v15, %v3731_v13  ;;  %v1477_v31 = vrot.slane %v3742_v18, %v3731_v13  ;;  %v1649_v32 = vrot.slane %v3736_v15, %v3734_v14  ;;  %v1653_v33 = vrot.slane %v3742_v18, %v3734_v14 }
 0x174   : > { %v3165_v41 = vmov 29   ;;  %v3166_v42 = vmov 37   ;;  %v3167_v43 = vmov 36   ;;  %v3168_v44 = vmov 10  }
 0x175   : > { %590 = vrot.lane.b32.xlu1 %v587_v9, %s3154_s17  ;;  %v3169_v45 = vmov 2   ;;  %v3170_v46 = vmov 31   ;;  %v3171_v47 = vmov 9   ;;  %v3172_v48 = vmov 4   ;;  %s3205_s17 = smov 79  }
 0x176   : > { %2627 = vset.pattern.permute.xlu0 %v3156_v23  ;;  %2628 = vset.pattern.permute.xlu1 %v3157_v24  ;;  %v3173_v49 = vmov 23   ;;  %v3174_v50 = vmov 39   ;;  %v3175_v51 = vmov 30   ;;  %v3176_v52 = vmov 5  }
 0x177   : > { %694 = vperm.xlu0 %2627, %v3709_v3   ;;  %v3177_v53 = vmov 44   ;;  %v3178_v54 = vmov 3   ;;  %v3179_v55 = vmov 17   ;;  %v3180_v56 = vmov 24  }
 0x178   : > { %v3181_v57 = vmov 38   ;;  %v3182_v58 = vmov 45   ;;  %v3183_v59 = vmov 11   ;;  %v3184_v60 = vmov 18  }
 0x179   : > { %717 = vperm.xlu1 %2628, %v3709_v3   ;;  %v3185_v61 = vmov 25   ;;  %v3186_v62 = vmov 32   ;;  %v3187_v63 = vmov 46   ;;  %vm592_vm0 = vcmask 416768  }
 0x17a   : > { %v3188_v8 = vmov 12   ;;  %v3189_v23 = vmov 19   ;;  %v3190_v24 = vmov 26   ;;  %vm640_vm1 = vcmask 916480  }
 0x17b   : > { %2630 = vset.pattern.permute.xlu0 %v3158_v34  ;;  %vm663_vm2 = vcmask 785408   ;;  %vm686_vm3 = vcmask 654336   ;;  %vm709_vm4 = vcmask 523264   ;;  %vm732_vm5 = vcmask 392192  }
 0x17c   : > { %778 = vperm.xlu0 %2630, %v3709_v3   ;;  %vm755_vm6 = vcmask 261120   ;;  %vm793_vm7 = vcmask 1039360   ;;  %vm816_vm8 = vcmask 908288   ;;  %vm839_vm9 = vcmask 777216  }
 0x17d   : > { %2629 = vset.pattern.permute.xlu1 %v3159_v35  ;;  %vm862_vm10 = vcmask 646144   ;;  %vm885_vm11 = vcmask 515072   ;;  %vm908_vm12 = vcmask 384000   ;;  %vm931_vm13 = vcmask 252928  }
 0x17e   : > { %740 = vperm.xlu1 %2629, %v3709_v3   ;;  %vm969_vm14 = vcmask 1031168   ;;  %vm992_vm15 = vcmask 900096  }
 0x180   : > { %2633 = vset.pattern.permute.xlu0 %v3160_v36  ;;  %v3191_v36 = vmov 33  }
 0x181   : > { %847 = vperm.xlu0 %2633, %v3709_v3  }
 0x182   : > { %2631 = vset.pattern.permute.xlu1 %v3161_v37 }
 0x183   : > { %801 = vperm.xlu1 %2631, %v3709_v3  }
 0x185   : > { %2636 = vset.pattern.permute.xlu0 %v3162_v38 }
 0x186   : > { %916 = vperm.xlu0 %2636, %v3709_v3  }
 0x187   : > { %2632 = vset.pattern.permute.xlu1 %v3163_v39 }
 0x188   : > { %824 = vperm.xlu1 %2632, %v3709_v3  }
 0x18a   : > { %2639 = vset.pattern.permute.xlu0 %v3164_v40 }
 0x18b   : > { %1000 = vperm.xlu0 %2639, %v3709_v3  }
 0x18c   : > { %2634 = vset.pattern.permute.xlu1 %v3165_v41 }
 0x18d   : > { %870 = vperm.xlu1 %2634, %v3709_v3  }
 0x18f   : > { %2642 = vset.pattern.permute.xlu0 %v3166_v42 }
 0x190   : > { %1069 = vperm.xlu0 %2642, %v3709_v3  }
 0x191   : > { %2635 = vset.pattern.permute.xlu1 %v3167_v43 }
 0x192   : > { %893 = vperm.xlu1 %2635, %v3709_v3  }
 0x194   : > { %2645 = vset.pattern.permute.xlu0 %v3168_v44 }
 0x195   : > { %1153 = vperm.xlu0 %2645, %v3709_v3  }
 0x196   : > { %2637 = vset.pattern.permute.xlu1 %v3169_v45  ;;  %v3193_v45 = vmov 40  }
 0x197   : > { %954 = vperm.xlu1 %2637, %v3709_v3  }
 0x199   : > { %2648 = vset.pattern.permute.xlu0 %v3170_v46 }
 0x19a   : > { %1222 = vperm.xlu0 %2648, %v3709_v3  }
 0x19b   : > { %2638 = vset.pattern.permute.xlu1 %v3171_v47 }
 0x19c   : > { %977 = vperm.xlu1 %2638, %v3709_v3  }
 0x19e   : > { %2651 = vset.pattern.permute.xlu0 %v3172_v48 }
 0x19f   : > { %1306 = vperm.xlu0 %2651, %v3709_v3  }
 0x1a0   : > { %2640 = vset.pattern.permute.xlu1 %v3173_v49 }
 0x1a1   : > { %1023 = vperm.xlu1 %2640, %v3709_v3  }
 0x1a3   : > { %2656 = vset.pattern.permute.xlu0 %v3174_v50 }
 0x1a4   : > { %1421 = vperm.xlu0 %2656, %v3709_v3  }
 0x1a5   : > { %2641 = vset.pattern.permute.xlu1 %v3175_v51 }
 0x1a6   : > { %1046 = vperm.xlu1 %2641, %v3709_v3  }
 0x1a8   : > { %2658 = vset.pattern.permute.xlu0 %v3176_v52 }
 0x1a9   : > { %1482 = vperm.xlu0 %2658, %v3709_v3  }
 0x1aa   : > { %2643 = vset.pattern.permute.xlu1 %v3177_v53 }
 0x1ab   : > { %1092 = vperm.xlu1 %2643, %v3709_v3  }
 0x1ad   : > { %2659 = vset.pattern.permute.xlu0 %v3153_v5 }
 0x1ae   : > { %617 = vperm.xlu0 %2659, %v3709_v3  }
 0x1af   : > { %2644 = vset.pattern.permute.xlu1 %v3178_v54 }
 0x1b0   : > { %1130 = vperm.xlu1 %2644, %v3709_v3  }
 0x1b4   : > { %2646 = vset.pattern.permute.xlu1 %v3179_v55 }
 0x1b5   : > { %1176 = vperm.xlu1 %2646, %v3709_v3  }
 0x1b9   : > { %2647 = vset.pattern.permute.xlu1 %v3180_v56 }
 0x1ba   : > { %1199 = vperm.xlu1 %2647, %v3709_v3  }
 0x1be   : > { %2649 = vset.pattern.permute.xlu1 %v3181_v57 }
 0x1bf   : > { %1245 = vperm.xlu1 %2649, %v3709_v3  }
 0x1c3   : > { %2650 = vset.pattern.permute.xlu1 %v3182_v58 }
 0x1c4   : > { %1268 = vperm.xlu1 %2650, %v3709_v3  }
 0x1c8   : > { %2652 = vset.pattern.permute.xlu1 %v3183_v59 }
 0x1c9   : > { %1329 = vperm.xlu1 %2652, %v3709_v3  }
 0x1cd   : > { %2653 = vset.pattern.permute.xlu1 %v3184_v60  ;;  %v764_v60 = vsub.s32 1, %v3715_v6 }
 0x1ce   : > { %1352 = vperm.xlu1 %2653, %v3709_v3  }
 0x1d2   : > { %2654 = vset.pattern.permute.xlu1 %v3185_v61 }
 0x1d3   : > { %1375 = vperm.xlu1 %2654, %v3709_v3  }
 0x1d7   : > { %2655 = vset.pattern.permute.xlu1 %v3186_v62 }
 0x1d8   : > { %1398 = vperm.xlu1 %2655, %v3709_v3  }
 0x1dc   : > { %2657 = vset.pattern.permute.xlu1 %v3187_v63 }
 0x1dd   : > { %1444 = vperm.xlu1 %2657, %v3709_v3  }
 0x1df   : > { %v589_v0 = vpop.permute.xlu1 %588 }
 0x1e0   : > { %v3805_v1 = vsel %vm592_vm0, 0.0, %v589_v0 }
 0x1e1   : > { %v3811_v2 = vmul.f32 %v941_v16, %v3805_v1  ;;  %v3817_v4 = vmul.f32 %v1117_v17, %v3805_v1  ;;  %2660 = vset.pattern.permute.xlu1 %v3188_v8  ;;  %v3823_v9 = vmul.f32 %v1293_v19, %v3805_v1  ;;  %v3829_v16 = vmul.f32 %v1469_v20, %v3805_v1 }
 0x1e2   : > { %v3835_v17 = vmul.f32 %v1645_v21, %v3805_v1  ;;  %1505 = vperm.xlu1 %2660, %v3709_v3   ;;  %v602_v19 = vsub.s32 0, %v3715_v6 }
 0x1e4   : > { %4654 = vst [vmem:[#allocation35_spill] sm:$0xff] %v3835_v17  ;;  %v603_v20 = vrot.slane %v3717_v7, %v602_v19  ;;  %v607_v37 = vrot.slane %v3736_v15, %v602_v19  ;;  %v611_v38 = vrot.slane %v3742_v18, %v602_v19 }
 0x1e6   : > { %2661 = vset.pattern.permute.xlu1 %v3189_v23  ;;  %v3843_v21 = vmul.f32 %v603_v20, %v3805_v1 }
 0x1e7   : > { %1528 = vperm.xlu1 %2661, %v3709_v3  }
 0x1eb   : > { %2662 = vset.pattern.permute.xlu1 %v3190_v24 }
 0x1ec   : > { %1551 = vperm.xlu1 %2662, %v3709_v3   ;;  %v626_v34 = vpop.permute.xlu0 %625 }
 0x1ed   : > { %v628_v39 = vmul.f32 %v626_v34, %v3843_v21 }
 0x1f0   : > { %v672_v35 = vpop.permute.xlu1 %671  ;;  %2663 = vset.pattern.permute.xlu1 %v3191_v36 }
 0x1f1   : > { %1574 = vperm.xlu1 %2663, %v3709_v3   ;;  %v649_v13 = vpop.permute.xlu0 %648  ;;  %v674_v14 = vmul.f32 %v672_v35, %v3843_v21 }
 0x1f4   : > { %v591_v40 = vpop.permute.xlu1 %590 }
 0x1f5   : > { %v3850_v41 = vsel %vm592_vm0, %v589_v0, %v591_v40  ;;  %v3853_v42 = vsel %vm592_vm0, %v591_v40, 0.0  ;;  %634 = vrot.lane.b32.xlu1 %v628_v39, %s3192_s2  ;;  %v769_v0 = vrot.slane %v3736_v15, %v764_v60  ;;  %v765_v15 = vrot.slane %v3717_v7, %v764_v60 }
 0x1f6   : > { %v3856_v43 = vmul.f32 %v607_v37, %v3850_v41  ;;  %v3859_v44 = vmul.f32 %v611_v38, %v3853_v42  ;;  %2664 = vset.pattern.permute.xlu1 %v3193_v45  ;;  %v3865_v46 = vmul.f32 %v945_v22, %v3850_v41  ;;  %v3871_v47 = vmul.f32 %v949_v25, %v3853_v42  ;;  %v695_v53 = vpop.permute.xlu0 %694 }
 0x1f7   : > { %v3877_v48 = vmul.f32 %v1121_v26, %v3850_v41  ;;  %v3883_v49 = vmul.f32 %v1125_v27, %v3853_v42  ;;  %v3889_v22 = vmul.f32 %v1297_v28, %v3850_v41  ;;  %v3895_v10 = vmul.f32 %v1301_v29, %v3853_v42 }
 0x1f8   : > { %v3901_v25 = vmul.f32 %v1473_v30, %v3850_v41  ;;  %v3907_v11 = vmul.f32 %v1477_v31, %v3853_v42  ;;  %v718_v26 = vpop.permute.xlu1 %717  ;;  %v3913_v12 = vmul.f32 %v1649_v32, %v3850_v41  ;;  %v3919_v27 = vmul.f32 %v1653_v33, %v3853_v42 }
 0x1f9   : > { %v630_v28 = vmul.f32 %v626_v34, %v3859_v44  ;;  %v629_v29 = vmul.f32 %v626_v34, %v3856_v43  ;;  %v651_v31 = vmul.f32 %v649_v13, %v3843_v21  ;;  %v653_v50 = vmul.f32 %v649_v13, %v3859_v44 }
 0x1fa   : > { %4655 = vst [vmem:[#allocation36_spill] sm:$0xff] %v3913_v12  ;;  %4656 = vst [vmem:[#allocation37_spill] sm:$0xff] %v3919_v27  ;;  %v652_v32 = vmul.f32 %v649_v13, %v3856_v43  ;;  %v675_v51 = vmul.f32 %v672_v35, %v3856_v43  ;;  %v676_v52 = vmul.f32 %v672_v35, %v3859_v44  ;;  %v3200_v35 = vmov 47  }
 0x1fb   : > { %638 = vrot.lane.b32.xlu1 %v630_v28, %s3192_s2  ;;  %636 = vrot.lane.b32.xlu0 %v629_v29, %s3192_s2  ;;  %v698_v55 = vmul.f32 %v695_v53, %v3856_v43  ;;  %v697_v56 = vmul.f32 %v695_v53, %v3843_v21  ;;  %v699_v58 = vmul.f32 %v695_v53, %v3859_v44  ;;  %v779_v23 = vpop.permute.xlu0 %778  ;;  %v3204_v29 = vmov 13   ;;  %s3207_s2 = smov 63  }
 0x1fc   : > { %v721_v59 = vmul.f32 %v718_v26, %v3856_v43  ;;  %v720_v62 = vmul.f32 %v718_v26, %v3843_v21  ;;  %v722_v8 = vmul.f32 %v718_v26, %v3859_v44  ;;  %v3949_v24 = vmul.f32 %v769_v0, %v3850_v41 }
 0x1fd   : > { %v741_v30 = vpop.permute.xlu1 %740  ;;  %v3959_v37 = vmul.f32 %v765_v15, %v3805_v1  ;;  %v773_v38 = vrot.slane %v3742_v18, %v764_v60  ;;  %v3202_v1 = vmov 6   ;;  %vm1015_vm0 = vcmask 769024  }
 0x1fe   : > { %v744_v63 = vmul.f32 %v741_v30, %v3856_v43  ;;  %v782_v6 = vmul.f32 %v779_v23, %v3949_v24  ;;  %v743_v20 = vmul.f32 %v741_v30, %v3843_v21  ;;  %v745_v36 = vmul.f32 %v741_v30, %v3859_v44 }
 0x1ff   : > { %657 = vrot.lane.b32.xlu1 %v651_v31, %s3194_s4  ;;  %661 = vrot.lane.b32.xlu0 %v653_v50, %s3194_s4  ;;  %v781_v7 = vmul.f32 %v779_v23, %v3959_v37  ;;  %v3969_v41 = vmul.f32 %v773_v38, %v3853_v42  ;;  %v3212_v38 = vmov 41  }
 0x200   : > { %v848_v30 = vpop.permute.xlu0 %847 }
 0x201   : > { %v783_v18 = vmul.f32 %v779_v23, %v3969_v41  ;;  %v851_v50 = vmul.f32 %v848_v30, %v3949_v24 }
 0x202   : > { %v3927_v33 = vpop.permute.xlu1 %801 }
 0x203   : > { %659 = vrot.lane.b32.xlu1 %v652_v32, %s3194_s4  ;;  %680 = vrot.lane.b32.xlu0 %v674_v14, %s3195_s25  ;;  %v805_v40 = vmul.f32 %v3927_v33, %v3949_v24  ;;  %v804_v45 = vmul.f32 %v3927_v33, %v3959_v37  ;;  %v806_v13 = vmul.f32 %v3927_v33, %v3969_v41  ;;  %s3209_s4 = smov 47  }
 0x207   : > { %682 = vrot.lane.b32.xlu1 %v675_v51, %s3195_s25  ;;  %684 = vrot.lane.b32.xlu0 %v676_v52, %s3195_s25  ;;  %v3931_v54 = vpop.permute.xlu1 %824  ;;  %v3206_v51 = vmov 20   ;;  %v917_v52 = vpop.permute.xlu0 %916  ;;  %s3211_s25 = smov 31  }
 0x208   : > { %v828_v26 = vmul.f32 %v3931_v54, %v3949_v24  ;;  %v827_v32 = vmul.f32 %v3931_v54, %v3959_v37  ;;  %v829_v33 = vmul.f32 %v3931_v54, %v3969_v41  ;;  %v920_v15 = vmul.f32 %v917_v52, %v3949_v24 }
 0x20b   : > { %705 = vrot.lane.b32.xlu1 %v698_v55, %s3196_s21  ;;  %703 = vrot.lane.b32.xlu0 %v697_v56, %s3196_s21  ;;  %v850_v55 = vmul.f32 %v848_v30, %v3959_v37  ;;  %v4006_v54 = vpop.permute.xlu0 %1000 }
 0x20c   : > { %v3935_v57 = vpop.permute.xlu1 %870 }
 0x20d   : > { %v874_v56 = vmul.f32 %v3935_v57, %v3949_v24 }
 0x20f   : > { %707 = vrot.lane.b32.xlu0 %v699_v58, %s3196_s21  ;;  %728 = vrot.lane.b32.xlu1 %v721_v59, %s3197_s14  ;;  %v3208_v58 = vmov 27   ;;  %v852_v59 = vmul.f32 %v848_v30, %v3969_v41  ;;  %v4015_v23 = vpop.permute.xlu0 %1069  ;;  %s3213_s21 = smov 126  }
 0x211   : > { %v3940_v61 = vpop.permute.xlu1 %893 }
 0x213   : > { %726 = vrot.lane.b32.xlu0 %v720_v62, %s3197_s14  ;;  %751 = vrot.lane.b32.xlu1 %v744_v63, %s3198_s13  ;;  %v873_v62 = vmul.f32 %v3935_v57, %v3959_v37  ;;  %v897_v63 = vmul.f32 %v3940_v61, %v3949_v24 }
 0x216   : > { %v3946_v19 = vpop.permute.xlu1 %954 }
 0x217   : > { %730 = vrot.lane.b32.xlu0 %v722_v8, %s3197_s14  ;;  %1597 = vperm.xlu1 %2664, %v3709_v3   ;;  %v3210_v8 = vmov 34   ;;  %v958_v24 = vmul.f32 %v3946_v19, %v3865_v46  ;;  %s3215_s14 = smov 110  }
 0x21b   : > { %789 = vrot.lane.b32.xlu1 %v782_v6, %s3199_s6  ;;  %749 = vrot.lane.b32.xlu0 %v743_v20, %s3198_s13  ;;  %v3955_v34 = vpop.permute.xlu1 %977  ;;  %v875_v6 = vmul.f32 %v3935_v57, %v3969_v41  ;;  %v898_v57 = vmul.f32 %v3940_v61, %v3969_v41 }
 0x21c   : > { %2665 = vset.pattern.permute.xlu1 %v3200_v35  ;;  %v896_v35 = vmul.f32 %v3940_v61, %v3959_v37 }
 0x21f   : > { %1620 = vperm.xlu1 %2665, %v3709_v3   ;;  %753 = vrot.lane.b32.xlu0 %v745_v36, %s3198_s13  ;;  %v4025_v36 = vpop.permute.xlu0 %1153  ;;  %s3216_s13 = smov 94  }
 0x220   : > { %v3963_v39 = vpop.permute.xlu1 %1023 }
 0x223   : > { %787 = vrot.lane.b32.xlu0 %v781_v7, %s3199_s6  ;;  %812 = vrot.lane.b32.xlu1 %v805_v40, %s3201_s16  ;;  %v4034_v40 = vpop.permute.xlu0 %1222 }
 0x224   : > { %2666 = vset.pattern.permute.xlu1 %v3202_v1  ;;  %v919_v1 = vmul.f32 %v917_v52, %v3959_v37  ;;  %v957_v37 = vmul.f32 %v3946_v19, %v3811_v2 }
 0x225   : > { %v3971_v44 = vpop.permute.xlu1 %1046 }
 0x227   : > { %791 = vrot.lane.b32.xlu0 %v783_v18, %s3199_s6  ;;  %1658 = vperm.xlu1 %2666, %v3709_v3   ;;  %v4040_v61 = vpop.permute.xlu0 %1306  ;;  %s3217_s6 = smov 78  }
 0x22a   : > { %v3979_v42 = vpop.permute.xlu1 %1092 }
 0x22b   : > { %810 = vrot.lane.b32.xlu0 %v804_v45, %s3201_s16  ;;  %835 = vrot.lane.b32.xlu1 %v828_v26, %s3203_s28  ;;  %v3983_v28 = vmul.f32 %v3979_v42, %v3865_v46  ;;  %v3214_v45 = vmov 48   ;;  %v921_v26 = vmul.f32 %v917_v52, %v3969_v41  ;;  %v1003_v41 = vmul.f32 %v4006_v54, %v3811_v2 }
 0x22c   : > { %2667 = vset.pattern.permute.xlu1 %v3204_v29  ;;  %v1027_v52 = vmul.f32 %v3963_v39, %v3865_v46 }
 0x22f   : > { %814 = vrot.lane.b32.xlu0 %v806_v13, %s3201_s16  ;;  %1681 = vperm.xlu1 %2667, %v3709_v3   ;;  %v3988_v31 = vpop.permute.xlu1 %1130  ;;  %v981_v13 = vmul.f32 %v3955_v34, %v3865_v46  ;;  %s3218_s16 = smov 62  }
 0x233   : > { %858 = vrot.lane.b32.xlu1 %v851_v50, %s3205_s17  ;;  %833 = vrot.lane.b32.xlu0 %v827_v32, %s3203_s28  ;;  %v4054_v50 = vpop.permute.xlu0 %1421  ;;  %v1005_v32 = vmul.f32 %v4006_v54, %v3871_v47 }
 0x234   : > { %v3993_v14 = vpop.permute.xlu1 %1176  ;;  %2668 = vset.pattern.permute.xlu1 %v3206_v51 }
 0x237   : > { %1704 = vperm.xlu1 %2668, %v3709_v3   ;;  %837 = vrot.lane.b32.xlu0 %v829_v33, %s3203_s28  ;;  %v980_v33 = vmul.f32 %v3955_v34, %v3811_v2  ;;  %s3219_s28 = smov 46  }
 0x239   : > { %v3998_v53 = vpop.permute.xlu1 %1199 }
 0x23b   : > { %856 = vrot.lane.b32.xlu0 %v850_v55, %s3205_s17  ;;  %881 = vrot.lane.b32.xlu1 %v874_v56, %s3207_s2  ;;  %v1049_v56 = vmul.f32 %v3971_v44, %v3811_v2 }
 0x23c   : > { %2669 = vset.pattern.permute.xlu1 %v3208_v58 }
 0x23e   : > { %v4004_v60 = vpop.permute.xlu1 %1245 }
 0x23f   : > { %860 = vrot.lane.b32.xlu0 %v852_v59, %s3205_s17  ;;  %1727 = vperm.xlu1 %2669, %v3709_v3   ;;  %v1004_v59 = vmul.f32 %v4006_v54, %v3865_v46  ;;  %v1073_v54 = vmul.f32 %v4015_v23, %v3865_v46  ;;  %s3220_s17 = smov 30  }
 0x243   : > { %879 = vrot.lane.b32.xlu0 %v873_v62, %s3207_s2  ;;  %904 = vrot.lane.b32.xlu1 %v897_v63, %s3209_s4  ;;  %v4013_v0 = vpop.permute.xlu1 %1268 }
 0x244   : > { %2670 = vset.pattern.permute.xlu1 %v3210_v8  ;;  %v1026_v8 = vmul.f32 %v3963_v39, %v3811_v2 }
 0x247   : > { %883 = vrot.lane.b32.xlu0 %v875_v6, %s3207_s2  ;;  %1750 = vperm.xlu1 %2670, %v3709_v3   ;;  %s3221_s2 = smov 125  }
 0x248   : > { %v4020_v20 = vpop.permute.xlu1 %1329 }
 0x24b   : > { %927 = vrot.lane.b32.xlu1 %v920_v15, %s3211_s25  ;;  %902 = vrot.lane.b32.xlu0 %v896_v35, %s3209_s4  ;;  %v1028_v35 = vmul.f32 %v3963_v39, %v3871_v47  ;;  %v1097_v39 = vmul.f32 %v3979_v42, %v3871_v47 }
 0x24c   : > { %2671 = vset.pattern.permute.xlu1 %v3212_v38 }
 0x24d   : > { %v4027_v7 = vpop.permute.xlu1 %1352 }
 0x24e   : > { %v1356_v12 = vmul.f32 %v4027_v7, %v3889_v22 }
 0x24f   : > { %1773 = vperm.xlu1 %2671, %v3709_v3   ;;  %906 = vrot.lane.b32.xlu0 %v898_v57, %s3209_s4  ;;  %v1095_v57 = vmul.f32 %v3979_v42, %v3811_v2  ;;  %s3222_s4 = smov 109  }
 0x252   : > { %v4037_v18 = vpop.permute.xlu1 %1375 }
 0x253   : > { %925 = vrot.lane.b32.xlu0 %v919_v1, %s3211_s25  ;;  %965 = vrot.lane.b32.xlu1 %v958_v24, %s3213_s21  ;;  %v1050_v1 = vmul.f32 %v3971_v44, %v3865_v46  ;;  %v1134_v46 = vmul.f32 %v3988_v31, %v3877_v48 }
 0x254   : > { %2672 = vset.pattern.permute.xlu1 %v3214_v45 }
 0x257   : > { %929 = vrot.lane.b32.xlu0 %v921_v26, %s3211_s25  ;;  %1796 = vperm.xlu1 %2672, %v3709_v3   ;;  %v4043_v29 = vpop.permute.xlu1 %1398  ;;  %v959_v3 = vmul.f32 %v3946_v19, %v3871_v47  ;;  %v982_v19 = vmul.f32 %v3955_v34, %v3871_v47  ;;  %v1051_v34 = vmul.f32 %v3971_v44, %v3871_v47  ;;  %s3223_s25 = smov 93  }
 0x25b   : > { %963 = vrot.lane.b32.xlu0 %v957_v37, %s3213_s21  ;;  %988 = vrot.lane.b32.xlu1 %v981_v13, %s3215_s14  ;;  %v1072_v13 = vmul.f32 %v4015_v23, %v3811_v2  ;;  %v1156_v2 = vmul.f32 %v4025_v36, %v3817_v4 }
 0x25c   : > { %v4049_v30 = vpop.permute.xlu1 %1444  ;;  %2673 = vset.pattern.permute.xlu1 %v3153_v5  ;;  %v4064_v5 = vpop.permute.xlu0 %1482 }
 0x25f   : > { %967 = vrot.lane.b32.xlu0 %v959_v3, %s3213_s21  ;;  %1009 = vrot.lane.b32.xlu1 %v1003_v41, %s3216_s13  ;;  %v1074_v41 = vmul.f32 %v4015_v23, %v3871_v47  ;;  %v1133_v47 = vmul.f32 %v3988_v31, %v3817_v4  ;;  %s3224_s21 = smov 77  }
 0x260   : > { %v4074_v58 = vpop.permute.xlu0 %617 }
 0x261   : > { %v4060_v51 = vpop.permute.xlu1 %1505 }
 0x263   : > { %1013 = vrot.lane.b32.xlu1 %v1005_v32, %s3216_s13  ;;  %986 = vrot.lane.b32.xlu0 %v980_v33, %s3215_s14  ;;  %v1158_v33 = vmul.f32 %v4025_v36, %v3883_v49 }
 0x266   : > { %v4070_v55 = vpop.permute.xlu1 %1528 }
 0x267   : > { %990 = vrot.lane.b32.xlu0 %v982_v19, %s3215_s14  ;;  %1034 = vrot.lane.b32.xlu1 %v1027_v52, %s3217_s6  ;;  %v1135_v19 = vmul.f32 %v3988_v31, %v3883_v49  ;;  %s3225_s14 = smov 61  }
 0x26b   : > { %1011 = vrot.lane.b32.xlu0 %v1004_v59, %s3216_s13  ;;  %1055 = vrot.lane.b32.xlu1 %v1049_v56, %s3218_s16  ;;  %v4078_v62 = vpop.permute.xlu1 %1551  ;;  %s3226_s13 = smov 45  }
 0x26d   : > { %v4082_v63 = vpop.permute.xlu0 %636 }
 0x26f   : > { %1032 = vrot.lane.b32.xlu0 %v1026_v8, %s3217_s6  ;;  %1059 = vrot.lane.b32.xlu1 %v1051_v34, %s3218_s16  ;;  %v1157_v34 = vmul.f32 %v4025_v36, %v3877_v48  ;;  %v1202_v8 = vmul.f32 %v3998_v53, %v3817_v4  ;;  %v1226_v36 = vmul.f32 %v4034_v40, %v3877_v48 }
 0x270   : > { %v4086_v6 = vpop.permute.xlu1 %1574 }
 0x271   : > { %v4090_v15 = vpop.permute.xlu0 %661 }
 0x273   : > { %1036 = vrot.lane.b32.xlu0 %v1028_v35, %s3217_s6  ;;  %1080 = vrot.lane.b32.xlu1 %v1073_v54, %s3219_s28  ;;  %v1179_v35 = vmul.f32 %v3993_v14, %v3817_v4  ;;  %s3227_s6 = smov 29  }
 0x274   : > { %v4094_v38 = vpop.permute.xlu1 %634 }
 0x275   : > { %v4098_v24 = vpop.permute.xlu0 %680 }
 0x277   : > { %1057 = vrot.lane.b32.xlu0 %v1050_v1, %s3218_s16  ;;  %1101 = vrot.lane.b32.xlu1 %v1095_v57, %s3220_s17  ;;  %v1204_v57 = vmul.f32 %v3998_v53, %v3883_v49  ;;  %s3228_s16 = smov 124  }
 0x278   : > { %v4102_v45 = vpop.permute.xlu1 %638 }
 0x279   : > { %v4106_v26 = vpop.permute.xlu0 %684 }
 0x27b   : > { %1078 = vrot.lane.b32.xlu0 %v1072_v13, %s3219_s28  ;;  %1105 = vrot.lane.b32.xlu1 %v1097_v39, %s3220_s17  ;;  %v1181_v39 = vmul.f32 %v3993_v14, %v3883_v49 }
 0x27c   : > { %v4110_v37 = vpop.permute.xlu1 %657 }
 0x27d   : > { %v4114_v44 = vpop.permute.xlu0 %703 }
 0x27f   : > { %1082 = vrot.lane.b32.xlu0 %v1074_v41, %s3219_s28  ;;  %1141 = vrot.lane.b32.xlu1 %v1134_v46, %s3221_s2  ;;  %v1203_v41 = vmul.f32 %v3998_v53, %v3877_v48  ;;  %v1227_v53 = vmul.f32 %v4034_v40, %v3883_v49  ;;  %s3229_s28 = smov 108  }
 0x280   : > { %v4118_v42 = vpop.permute.xlu1 %659 }
 0x281   : > { %v4122_v3 = vpop.permute.xlu0 %707 }
 0x283   : > { %1103 = vrot.lane.b32.xlu0 %v3983_v28, %s3220_s17  ;;  %1162 = vrot.lane.b32.xlu1 %v1156_v2, %s3222_s4  ;;  %v1180_v28 = vmul.f32 %v3993_v14, %v3877_v48  ;;  %v1248_v2 = vmul.f32 %v4004_v60, %v3817_v4  ;;  %v1225_v14 = vmul.f32 %v4034_v40, %v3817_v4  ;;  %s3230_s17 = smov 92  }
 0x284   : > { %v4125_v32 = vpop.permute.xlu1 %682  ;;  %v1311_v40 = vmul.f32 %v4040_v61, %v3895_v10 }
 0x285   : > { %v4131_v23 = vpop.permute.xlu0 %726 }
 0x287   : > { %1139 = vrot.lane.b32.xlu0 %v1133_v47, %s3221_s2  ;;  %1166 = vrot.lane.b32.xlu1 %v1158_v33, %s3222_s4 }
 0x288   : > { %v4133_v52 = vpop.permute.xlu1 %705 }
 0x289   : > { %v4139_v56 = vpop.permute.xlu0 %730 }
 0x28b   : > { %1143 = vrot.lane.b32.xlu0 %v1135_v19, %s3221_s2  ;;  %1187 = vrot.lane.b32.xlu1 %v1180_v28, %s3223_s25  ;;  %v1250_v19 = vmul.f32 %v4004_v60, %v3883_v49  ;;  %s3231_s2 = smov 76  }
 0x28c   : > { %v4141_v59 = vpop.permute.xlu1 %728 }
 0x28d   : > { %v4147_v54 = vpop.permute.xlu0 %749 }
 0x28f   : > { %1164 = vrot.lane.b32.xlu0 %v1157_v34, %s3222_s4  ;;  %1208 = vrot.lane.b32.xlu1 %v1202_v8, %s3224_s21  ;;  %v1272_v8 = vmul.f32 %v4013_v0, %v3877_v48  ;;  %s3232_s4 = smov 60  }
 0x290   : > { %v4149_v31 = vpop.permute.xlu1 %751 }
 0x291   : > { %v4155_v1 = vpop.permute.xlu0 %753 }
 0x293   : > { %1185 = vrot.lane.b32.xlu0 %v1179_v35, %s3223_s25  ;;  %1212 = vrot.lane.b32.xlu1 %v1204_v57, %s3224_s21 }
 0x295   : > { %v4161_v13 = vpop.permute.xlu0 %787 }
 0x296   : > { %v4163_v46 = vpop.permute.xlu1 %1597 }
 0x297   : > { %1189 = vrot.lane.b32.xlu0 %v1181_v39, %s3223_s25  ;;  %1233 = vrot.lane.b32.xlu1 %v1226_v36, %s3225_s14  ;;  %v1309_v36 = vmul.f32 %v4040_v61, %v3823_v9  ;;  %v1249_v39 = vmul.f32 %v4004_v60, %v3877_v48  ;;  %v1273_v48 = vmul.f32 %v4013_v0, %v3883_v49  ;;  %s3233_s25 = smov 44  }
 0x298   : > { %v1333_v60 = vmul.f32 %v4020_v20, %v3889_v22  ;;  %v1332_v49 = vmul.f32 %v4020_v20, %v3823_v9 }
 0x299   : > { %v4169_v33 = vpop.permute.xlu0 %791 }
 0x29a   : > { %v4171_v47 = vpop.permute.xlu1 %789 }
 0x29b   : > { %1210 = vrot.lane.b32.xlu0 %v1203_v41, %s3224_s21  ;;  %1254 = vrot.lane.b32.xlu1 %v1248_v2, %s3226_s13  ;;  %s3234_s21 = smov 28  }
 0x29d   : > { %v4177_v28 = vpop.permute.xlu0 %810 }
 0x29e   : > { %v4179_v34 = vpop.permute.xlu1 %1620 }
 0x29f   : > { %4657 = vst [vmem:[#allocation38_spill] sm:$0xff] %v4179_v34  ;;  %1231 = vrot.lane.b32.xlu0 %v1225_v14, %s3225_s14  ;;  %1258 = vrot.lane.b32.xlu1 %v1250_v19, %s3226_s13  ;;  %v1271_v14 = vmul.f32 %v4013_v0, %v3817_v4  ;;  %v1310_v4 = vmul.f32 %v4040_v61, %v3889_v22 }
 0x2a0   : > { %v1357_v0 = vmul.f32 %v4027_v7, %v3895_v10  ;;  %v1334_v61 = vmul.f32 %v4020_v20, %v3895_v10  ;;  %v1378_v20 = vmul.f32 %v4037_v18, %v3823_v9  ;;  %v642_v34 = vsel %vm640_vm1, %v4082_v63, %v4102_v45 }
 0x2a1   : > { %v4185_v35 = vpop.permute.xlu0 %814  ;;  %v665_v45 = vsel %vm663_vm2, %v4118_v42, %v4090_v15 }
 0x2a2   : > { %v4187_v57 = vpop.permute.xlu1 %812 }
 0x2a3   : > { %1235 = vrot.lane.b32.xlu0 %v1227_v53, %s3225_s14  ;;  %1279 = vrot.lane.b32.xlu1 %v1272_v8, %s3227_s6  ;;  %s3235_s14 = smov 123  }
 0x2a5   : > { %v4193_v41 = vpop.permute.xlu0 %833 }
 0x2a6   : > { %v4195_v2 = vpop.permute.xlu1 %1658 }
 0x2a7   : > { %4658 = vst [vmem:[#allocation39_spill] sm:$0xff] %v4195_v2  ;;  %1256 = vrot.lane.b32.xlu0 %v1249_v39, %s3226_s13  ;;  %1315 = vrot.lane.b32.xlu1 %v1309_v36, %s3228_s16  ;;  %v1355_v39 = vmul.f32 %v4027_v7, %v3823_v9  ;;  %v1425_v7 = vmul.f32 %v4054_v50, %v3889_v22  ;;  %s3236_s13 = smov 107  }
 0x2a8   : > { %v1402_v2 = vmul.f32 %v4043_v29, %v3889_v22 }
 0x2a9   : > { %v4201_v19 = vpop.permute.xlu0 %837 }
 0x2aa   : > { %v4203_v53 = vpop.permute.xlu1 %835 }
 0x2ab   : > { %1277 = vrot.lane.b32.xlu0 %v1271_v14, %s3227_s6  ;;  %1319 = vrot.lane.b32.xlu1 %v1311_v40, %s3228_s16 }
 0x2ad   : > { %v4209_v8 = vpop.permute.xlu0 %856 }
 0x2ae   : > { %v4211_v36 = vpop.permute.xlu1 %1681 }
 0x2af   : > { %4659 = vst [vmem:[#allocation40_spill] sm:$0xff] %v4211_v36  ;;  %1281 = vrot.lane.b32.xlu0 %v1273_v48, %s3227_s6  ;;  %1340 = vrot.lane.b32.xlu1 %v1333_v60, %s3229_s28  ;;  %s3237_s6 = smov 91  }
 0x2b1   : > { %v4217_v40 = vpop.permute.xlu0 %860 }
 0x2b2   : > { %v4219_v14 = vpop.permute.xlu1 %858 }
 0x2b3   : > { %1317 = vrot.lane.b32.xlu0 %v1310_v4, %s3228_s16  ;;  %1361 = vrot.lane.b32.xlu1 %v1355_v39, %s3230_s17  ;;  %v1379_v4 = vmul.f32 %v4037_v18, %v3889_v22  ;;  %s3238_s16 = smov 75  }
 0x2b5   : > { %v4225_v48 = vpop.permute.xlu0 %879 }
 0x2b6   : > { %v4227_v60 = vpop.permute.xlu1 %1704 }
 0x2b7   : > { %4660 = vst [vmem:[#allocation41_spill] sm:$0xff] %v4227_v60  ;;  %1338 = vrot.lane.b32.xlu0 %v1332_v49, %s3229_s28  ;;  %1365 = vrot.lane.b32.xlu1 %v1357_v0, %s3230_s17  ;;  %v1401_v49 = vmul.f32 %v4043_v29, %v3823_v9 }
 0x2b9   : > { %v4233_v36 = vpop.permute.xlu0 %883 }
 0x2ba   : > { %v4235_v39 = vpop.permute.xlu1 %881 }
 0x2bb   : > { %1342 = vrot.lane.b32.xlu0 %v1334_v61, %s3229_s28  ;;  %1386 = vrot.lane.b32.xlu1 %v1379_v4, %s3231_s2  ;;  %v1403_v61 = vmul.f32 %v4043_v29, %v3895_v10  ;;  %s3239_s28 = smov 59  }
 0x2bd   : > { %v4241_v0 = vpop.permute.xlu0 %902 }
 0x2be   : > { %v4243_v60 = vpop.permute.xlu1 %1727 }
 0x2bf   : > { %4661 = vst [vmem:[#allocation42_spill] sm:$0xff] %v4243_v60  ;;  %1363 = vrot.lane.b32.xlu0 %v1356_v12, %s3230_s17  ;;  %1407 = vrot.lane.b32.xlu1 %v1401_v49, %s3232_s4  ;;  %v1380_v12 = vmul.f32 %v4037_v18, %v3895_v10  ;;  %v1424_v18 = vmul.f32 %v4054_v50, %v3823_v9  ;;  %s3240_s17 = smov 43  }
 0x2c1   : > { %v4249_v4 = vpop.permute.xlu0 %906 }
 0x2c2   : > { %v4251_v27 = vpop.permute.xlu1 %904 }
 0x2c3   : > { %1384 = vrot.lane.b32.xlu0 %v1378_v20, %s3231_s2  ;;  %1411 = vrot.lane.b32.xlu1 %v1403_v61, %s3232_s4  ;;  %v1447_v20 = vmul.f32 %v4049_v30, %v3823_v9 }
 0x2c5   : > { %v4257_v60 = vpop.permute.xlu0 %925 }
 0x2c6   : > { %v4259_v49 = vpop.permute.xlu1 %1750 }
 0x2c7   : > { %4662 = vst [vmem:[#allocation43_spill] sm:$0xff] %v4259_v49  ;;  %1388 = vrot.lane.b32.xlu0 %v1380_v12, %s3231_s2  ;;  %1432 = vrot.lane.b32.xlu1 %v1425_v7, %s3233_s25  ;;  %v1449_v7 = vmul.f32 %v4049_v30, %v3895_v10  ;;  %v1426_v49 = vmul.f32 %v4054_v50, %v3895_v10  ;;  %s3241_s2 = smov 27  }
 0x2c8   : > { %v1448_v10 = vmul.f32 %v4049_v30, %v3889_v22  ;;  %v1508_v50 = vmul.f32 %v4060_v51, %v3829_v16  ;;  %v664_v22 = vsel %vm663_vm2, %v4110_v37, %v4118_v42  ;;  %v688_v30 = vsel %vm686_vm3, %v4125_v32, %v4106_v26 }
 0x2c9   : > { %v4265_v61 = vpop.permute.xlu0 %929  ;;  %v711_v26 = vsel %vm709_vm4, %v4133_v52, %v4122_v3  ;;  %vm1061_vm2 = vcmask 506880  }
 0x2ca   : > { %v4267_v17 = vpop.permute.xlu1 %927 }
 0x2cb   : > { %1409 = vrot.lane.b32.xlu0 %v1402_v2, %s3232_s4  ;;  %1453 = vrot.lane.b32.xlu1 %v1447_v20, %s3234_s21  ;;  %v1486_v2 = vmul.f32 %v4064_v5, %v3901_v25  ;;  %s3242_s4 = smov 122  }
 0x2cd   : > { %v4274_v12 = vpop.permute.xlu0 %963 }
 0x2ce   : > { %v4276_v29 = vpop.permute.xlu1 %1773 }
 0x2cf   : > { %4663 = vst [vmem:[#allocation44_spill] sm:$0xff] %v4276_v29  ;;  %1430 = vrot.lane.b32.xlu0 %v1424_v18, %s3233_s25  ;;  %1457 = vrot.lane.b32.xlu1 %v1449_v7, %s3234_s21  ;;  %v621_v18 = vmul.f32 %v4074_v58, %v3856_v43  ;;  %v641_v7 = vsel %vm640_vm1, %v4094_v38, %v4082_v63  ;;  %vm1038_vm1 = vcmask 637952  }
 0x2d0   : > { %v687_v38 = vsel %vm686_vm3, %v4098_v24, %v4125_v32  ;;  %v1487_v32 = vmul.f32 %v4064_v5, %v3907_v11  ;;  %vm1084_vm3 = vcmask 375808  }
 0x2d1   : > { %v4283_v20 = vpop.permute.xlu0 %967  ;;  %v646_v43 = vadd.f32 %v642_v34, %v621_v18 }
 0x2d2   : > { %v4285_v9 = vpop.permute.xlu1 %965 }
 0x2d3   : > { %1434 = vrot.lane.b32.xlu0 %v1426_v49, %s3233_s25  ;;  %1493 = vrot.lane.b32.xlu1 %v1486_v2, %s3235_s14  ;;  %v620_v2 = vmul.f32 %v4074_v58, %v3843_v21  ;;  %v669_v15 = vadd.f32 %v665_v45, %v646_v43  ;;  %v1485_v21 = vmul.f32 %v4064_v5, %v3829_v16  ;;  %s3243_s25 = smov 106  }
 0x2d4   : > { %v1510_v58 = vmul.f32 %v4060_v51, %v3907_v11  ;;  %v756_v5 = vsel %vm755_vm6, %v4147_v54, %v4149_v31  ;;  %v794_v54 = vsel %vm793_vm7, %v4161_v13, %v4171_v47 }
 0x2d5   : > { %v4301_v49 = vpop.permute.xlu0 %986  ;;  %v645_v63 = vadd.f32 %v641_v7, %v620_v2  ;;  %v692_v34 = vadd.f32 %v688_v30, %v669_v15  ;;  %v1532_v7 = vmul.f32 %v4070_v55, %v3901_v25  ;;  %v1554_v30 = vmul.f32 %v4078_v62, %v3829_v16 }
 0x2d6   : > { %v4305_v29 = vpop.permute.xlu1 %1796 }
 0x2d7   : > { %1455 = vrot.lane.b32.xlu0 %v1448_v10, %s3234_s21  ;;  %1514 = vrot.lane.b32.xlu1 %v1508_v50, %s3236_s13  ;;  %v668_v42 = vadd.f32 %v664_v22, %v645_v63  ;;  %v710_v10 = vsel %vm709_vm4, %v4114_v44, %v4133_v52  ;;  %v734_v50 = vsel %vm732_vm5, %v4141_v59, %v4139_v56  ;;  %vm1107_vm4 = vcmask 244736   ;;  %s3244_s21 = smov 90  }
 0x2d8   : > { %v715_v3 = vadd.f32 %v711_v26, %v692_v34  ;;  %v733_v44 = vsel %vm732_vm5, %v4131_v23, %v4141_v59  ;;  %v757_v52 = vsel %vm755_vm6, %v4149_v31, %v4155_v1  ;;  %v795_v22 = vsel %vm793_vm7, %v4171_v47, %v4169_v33 }
 0x2d9   : > { %v4325_v37 = vpop.permute.xlu0 %990  ;;  %v691_v24 = vadd.f32 %v687_v38, %v668_v42  ;;  %v1509_v1 = vmul.f32 %v4060_v51, %v3901_v25  ;;  %v818_v31 = vsel %vm816_vm8, %v4187_v57, %v4185_v35  ;;  %v817_v51 = vsel %vm816_vm8, %v4177_v28, %v4187_v57 }
 0x2da   : > { %v4327_v18 = vpop.permute.xlu1 %988  ;;  %v738_v2 = vadd.f32 %v734_v50, %v715_v3  ;;  %v1531_v35 = vmul.f32 %v4070_v55, %v3829_v16  ;;  %v1556_v38 = vmul.f32 %v4078_v62, %v3907_v11  ;;  %v840_v28 = vsel %vm839_vm9, %v4193_v41, %v4203_v53 }
 0x2db   : > { %1491 = vrot.lane.b32.xlu0 %v1485_v21, %s3235_s14  ;;  %1518 = vrot.lane.b32.xlu1 %v1510_v58, %s3236_s13  ;;  %v714_v45 = vadd.f32 %v710_v10, %v691_v24  ;;  %v841_v58 = vsel %vm839_vm9, %v4203_v53, %v4201_v19  ;;  %v864_v57 = vsel %vm862_vm10, %v4219_v14, %v4217_v40  ;;  %vm1145_vm5 = vcmask 1022976  }
 0x2dc   : > { %v761_v59 = vadd.f32 %v757_v52, %v738_v2  ;;  %v863_v10 = vsel %vm862_vm10, %v4209_v8, %v4219_v14  ;;  %v887_v50 = vsel %vm885_vm11, %v4235_v39, %v4233_v36  ;;  %v1533_v40 = vmul.f32 %v4070_v55, %v3907_v11 }
 0x2dd   : > { %v4347_v56 = vpop.permute.xlu0 %1011  ;;  %v737_v23 = vadd.f32 %v733_v44, %v714_v45  ;;  %v1578_v24 = vmul.f32 %v4086_v6, %v3901_v25  ;;  %v886_v8 = vsel %vm885_vm11, %v4225_v48, %v4235_v39  ;;  %v910_v36 = vsel %vm908_vm12, %v4251_v27, %v4249_v4 }
 0x2de   : > { %v4349_v43 = vpop.permute.xlu1 %1009  ;;  %v799_v15 = vadd.f32 %v795_v22, %v761_v59  ;;  %v909_v55 = vsel %vm908_vm12, %v4241_v0, %v4251_v27  ;;  %v933_v44 = vsel %vm931_vm13, %v4267_v17, %v4265_v61  ;;  %v1555_v4 = vmul.f32 %v4078_v62, %v3901_v25 }
 0x2df   : > { %1495 = vrot.lane.b32.xlu0 %v1487_v32, %s3235_s14  ;;  %1539 = vrot.lane.b32.xlu1 %v1532_v7, %s3237_s6  ;;  %v760_v63 = vadd.f32 %v756_v5, %v737_v23  ;;  %v1600_v52 = vmul.f32 %v4163_v46, %v3829_v16  ;;  %v932_v27 = vsel %vm931_vm13, %v4257_v60, %v4267_v17  ;;  %vm1168_vm6 = vcmask 891904   ;;  %s3245_s14 = smov 74  }
 0x2e0   : > { %v822_v47 = vadd.f32 %v818_v31, %v799_v15  ;;  %v971_v0 = vsel %vm969_vm14, %v4285_v9, %v4283_v20  ;;  %v970_v22 = vsel %vm969_vm14, %v4274_v12, %v4285_v9  ;;  %v994_v62 = vsel %vm992_vm15, %v4327_v18, %v4325_v37 }
 0x2e1   : > { %v4369_v33 = vpop.permute.xlu0 %1032  ;;  %v798_v13 = vadd.f32 %v794_v54, %v760_v63  ;;  %v1577_v20 = vmul.f32 %v4086_v6, %v3829_v16  ;;  %v1602_v23 = vmul.f32 %v4163_v46, %v3907_v11  ;;  %v993_v12 = vsel %vm992_vm15, %v4301_v49, %v4327_v18  ;;  %v4664_v18 = vld [vmem:[#allocation38_spill] sm:$0xff] }
 0x2e2   : > { %v4371_v21 = vpop.permute.xlu1 %1013  ;;  %v845_v42 = vadd.f32 %v841_v58, %v822_v47  ;;  %v1016_v54 = vsel %vm1015_vm0, %v4349_v43, %v4347_v56  ;;  %v1579_v49 = vmul.f32 %v4086_v6, %v3907_v11  ;;  %vm1191_vm7 = vcmask 760832  }
 0x2e3   : > { %1516 = vrot.lane.b32.xlu0 %v1509_v1, %s3236_s13  ;;  %1560 = vrot.lane.b32.xlu1 %v1554_v30, %s3238_s16  ;;  %v821_v26 = vadd.f32 %v817_v51, %v798_v13  ;;  %v1017_v9 = vsel %vm1015_vm0, %v4347_v56, %v4371_v21  ;;  %v1624_v21 = vmul.f32 %v4664_v18, %v3901_v25  ;;  %vm1214_vm8 = vcmask 629760   ;;  %s3246_s13 = smov 58  }
 0x2e4   : > { %v868_v53 = vadd.f32 %v864_v57, %v845_v42  ;;  %v1601_v57 = vmul.f32 %v4163_v46, %v3901_v25  ;;  %v1623_v25 = vmul.f32 %v4664_v18, %v3829_v16  ;;  %v4667_v46 = vld [vmem:[#allocation37_spill] sm:$0xff]  ;;  %v4669_v16 = vld [vmem:[#allocation40_spill] sm:$0xff]  ;;  %vm1237_vm9 = vcmask 498688  }
 0x2e5   : > { %v1037_v19 = vpop.permute.xlu0 %1036  ;;  %v844_v41 = vadd.f32 %v840_v28, %v821_v26  ;;  %vm1260_vm10 = vcmask 367616   ;;  %vm1283_vm11 = vcmask 236544   ;;  %vm1321_vm12 = vcmask 1014784  }
 0x2e6   : > { %v1035_v34 = vpop.permute.xlu1 %1034  ;;  %v891_v32 = vadd.f32 %v887_v50, %v868_v53  ;;  %vm1344_vm13 = vcmask 883712   ;;  %vm1367_vm14 = vcmask 752640   ;;  %vm1390_vm15 = vcmask 621568  }
 0x2e7   : > { %1537 = vrot.lane.b32.xlu0 %v1531_v35, %s3237_s6  ;;  %1564 = vrot.lane.b32.xlu1 %v1556_v38, %s3238_s16  ;;  %v867_v3 = vadd.f32 %v863_v10, %v844_v41  ;;  %v1040_v31 = vsel %vm1038_vm1, %v1035_v34, %v1037_v19  ;;  %v1039_v51 = vsel %vm1038_vm1, %v4369_v33, %v1035_v34  ;;  %v4665_v33 = vld [vmem:[#allocation35_spill] sm:$0xff]  ;;  %vm1413_vm0 = vcmask 490496  }
 0x2e8   : > { %v914_v39 = vadd.f32 %v910_v36, %v891_v32  ;;  %v4666_v19 = vld [vmem:[#allocation39_spill] sm:$0xff]  ;;  %vm1436_vm1 = vcmask 359424  }
 0x2e9   : > { %v1058_v14 = vpop.permute.xlu0 %1057  ;;  %v890_v48 = vadd.f32 %v886_v8, %v867_v3  ;;  %v1661_v26 = vmul.f32 %v4666_v19, %v4665_v33  ;;  %v1663_v36 = vmul.f32 %v4666_v19, %v4667_v46 }
 0x2ea   : > { %v1056_v7 = vpop.permute.xlu1 %1055  ;;  %v937_v2 = vadd.f32 %v933_v44, %v914_v39  ;;  %v1625_v39 = vmul.f32 %v4664_v18, %v3907_v11 }
 0x2eb   : > { %1541 = vrot.lane.b32.xlu0 %v1533_v40, %s3237_s6  ;;  %1585 = vrot.lane.b32.xlu1 %v1578_v24, %s3239_s28  ;;  %v913_v45 = vadd.f32 %v909_v55, %v890_v48  ;;  %v1062_v35 = vsel %vm1061_vm2, %v1056_v7, %v1058_v14  ;;  %s3247_s6 = smov 42  }
 0x2ec   : > { %v975_v60 = vadd.f32 %v971_v0, %v937_v2 }
 0x2ed   : > { %v1079_v61 = vpop.permute.xlu0 %1078  ;;  %v936_v17 = vadd.f32 %v932_v27, %v913_v45 }
 0x2ee   : > { %v1060_v5 = vpop.permute.xlu1 %1059  ;;  %v998_v1 = vadd.f32 %v994_v62, %v975_v60 }
 0x2ef   : > { %1562 = vrot.lane.b32.xlu0 %v1555_v4, %s3238_s16  ;;  %1606 = vrot.lane.b32.xlu1 %v1600_v52, %s3240_s17  ;;  %v974_v59 = vadd.f32 %v970_v22, %v936_v17  ;;  %v1063_v56 = vsel %vm1061_vm2, %v1058_v14, %v1060_v5  ;;  %v4668_v4 = vld [vmem:[#allocation36_spill] sm:$0xff]  ;;  %v4670_v5 = vld [vmem:[#allocation41_spill] sm:$0xff]  ;;  %s3248_s16 = smov 26   ;;  %vm1459_vm2 = vcmask 228352  }
 0x2f0   : > { %v1021_v15 = vadd.f32 %v1017_v9, %v998_v1  ;;  %v1685_v52 = vmul.f32 %v4669_v16, %v4668_v4  ;;  %v1662_v2 = vmul.f32 %v4666_v19, %v4668_v4  ;;  %v1707_v22 = vmul.f32 %v4670_v5, %v4665_v33 }
 0x2f1   : > { %v1083_v37 = vpop.permute.xlu0 %1082  ;;  %v997_v63 = vadd.f32 %v993_v12, %v974_v59 }
 0x2f2   : > { %v1081_v30 = vpop.permute.xlu1 %1080  ;;  %v1044_v13 = vadd.f32 %v1040_v31, %v1021_v15  ;;  %v4671_v31 = vld [vmem:[#allocation42_spill] sm:$0xff] }
 0x2f3   : > { %1583 = vrot.lane.b32.xlu0 %v1577_v20, %s3239_s28  ;;  %1610 = vrot.lane.b32.xlu1 %v1602_v23, %s3240_s17  ;;  %v1020_v58 = vadd.f32 %v1016_v54, %v997_v63  ;;  %v1086_v38 = vsel %vm1084_vm3, %v1081_v30, %v1083_v37  ;;  %v1085_v42 = vsel %vm1084_vm3, %v1079_v61, %v1081_v30  ;;  %vm1497_vm3 = vcmask 1006592  }
 0x2f4   : > { %v1067_v28 = vadd.f32 %v1063_v56, %v1044_v13  ;;  %v1684_v20 = vmul.f32 %v4669_v16, %v4665_v33  ;;  %v1709_v23 = vmul.f32 %v4670_v5, %v4667_v46  ;;  %v1686_v54 = vmul.f32 %v4669_v16, %v4667_v46  ;;  %v4672_v56 = vld [vmem:[#allocation43_spill] sm:$0xff] }
 0x2f5   : > { %v1104_v43 = vpop.permute.xlu0 %1103  ;;  %v1043_v6 = vadd.f32 %v1039_v51, %v1020_v58  ;;  %v1731_v63 = vmul.f32 %v4671_v31, %v4668_v4  ;;  %v1708_v51 = vmul.f32 %v4670_v5, %v4668_v4 }
 0x2f6   : > { %v1102_v47 = vpop.permute.xlu1 %1101  ;;  %v1090_v50 = vadd.f32 %v1086_v38, %v1067_v28  ;;  %v1730_v38 = vmul.f32 %v4671_v31, %v4665_v33 }
 0x2f7   : > { %1587 = vrot.lane.b32.xlu0 %v1579_v49, %s3239_s28  ;;  %1631 = vrot.lane.b32.xlu1 %v1624_v21, %s3241_s2  ;;  %v1066_v10 = vadd.f32 %v1062_v35, %v1043_v6  ;;  %v1108_v53 = vsel %vm1107_vm4, %v1102_v47, %v1104_v43  ;;  %v1755_v6 = vmul.f32 %v4672_v56, %v4667_v46  ;;  %s2125_s28 = sld [smem:[#allocation3 + %s3353_s23]] }
 0x2f9   : > { %v1140_v34 = vpop.permute.xlu0 %1139  ;;  %v1089_v24 = vadd.f32 %v1085_v42, %v1066_v10  ;;  %v1732_v10 = vmul.f32 %v4671_v31, %v4667_v46  ;;  %v1891_v31 = vld [vmem:[#allocation16] sm:$0xff] }
 0x2fa   : > { %v1106_v41 = vpop.permute.xlu1 %1105 }
 0x2fb   : > { %v1109_v40 = vsel %vm1107_vm4, %v1104_v43, %v1106_v41  ;;  %1608 = vrot.lane.b32.xlu0 %v1601_v57, %s3240_s17  ;;  %1667 = vrot.lane.b32.xlu1 %v1661_v26, %s3242_s4  ;;  %v1112_v3 = vadd.f32 %v1108_v53, %v1089_v24  ;;  %v1753_v43 = vmul.f32 %v4672_v56, %v4665_v33  ;;  %vm1520_vm4 = vcmask 875520   ;;  %s2365_s17 = sshll.u32 %s3353_s23, 7  ;;  %s3249_s23 = smov [#allocation24]  }
 0x2fc   : > { %v1113_v8 = vadd.f32 %v1109_v40, %v1090_v50  ;;  %v4673_v50 = vld [vmem:[#allocation44_spill] sm:$0xff] }
 0x2fd   : > { %v1144_v14 = vpop.permute.xlu0 %1143  ;;  %v1776_v41 = vmul.f32 %v4673_v50, %v4665_v33 }
 0x2fe   : > { %v1142_v32 = vpop.permute.xlu1 %1141 }
 0x2ff   : > { %v1146_v7 = vsel %vm1145_vm5, %v1140_v34, %v1142_v32  ;;  %v1147_v55 = vsel %vm1145_vm5, %v1142_v32, %v1144_v14  ;;  %1629 = vrot.lane.b32.xlu0 %v1623_v25, %s3241_s2  ;;  %1671 = vrot.lane.b32.xlu1 %v1663_v36, %s3242_s4  ;;  %v1754_v25 = vmul.f32 %v4672_v56, %v4668_v4  ;;  %vm1543_vm5 = vcmask 744448  }
 0x300   : > { %v1150_v44 = vadd.f32 %v1146_v7, %v1112_v3  ;;  %v1151_v48 = vadd.f32 %v1147_v55, %v1113_v8  ;;  %v1777_v36 = vmul.f32 %v4673_v50, %v4668_v4  ;;  %v1818_v55 = vld [vmem:[#allocation10] sm:$0xf] }
 0x301   : > { %v1165_v27 = vpop.permute.xlu0 %1164 }
 0x302   : > { %v1163_v0 = vpop.permute.xlu1 %1162 }
 0x303   : > { %v1169_v61 = vsel %vm1168_vm6, %v1163_v0, %v1165_v27  ;;  %1633 = vrot.lane.b32.xlu0 %v1625_v39, %s3241_s2  ;;  %1692 = vrot.lane.b32.xlu1 %v1685_v52, %s3243_s25  ;;  %s580_s2 = scalar_lea.vmem [#allocation24], %s2343_s22  ;;  %s3046_s22 = sshll.u32 %s3249_s23, 4  ;;  %s3047_s22 = int_to_ptr.vmem [resolvable:$false] %s3046_s22 }
 0x304   : > { %v1173_v45 = vadd.f32 %v1169_v61, %v1150_v44  ;;  %v1799_v44 = vmul.f32 %v4305_v29, %v4665_v33  ;;  %v1778_v61 = vmul.f32 %v4673_v50, %v4667_v46 }
 0x305   : > { %v1186_v62 = vpop.permute.xlu0 %1185 }
 0x306   : > { %v1167_v17 = vpop.permute.xlu1 %1166 }
 0x307   : > { %v1170_v11 = vsel %vm1168_vm6, %v1165_v27, %v1167_v17  ;;  %1669 = vrot.lane.b32.xlu0 %v1662_v2, %s3242_s4  ;;  %1713 = vrot.lane.b32.xlu1 %v1707_v22, %s3244_s21  ;;  %v1800_v17 = vmul.f32 %v4305_v29, %v4668_v4  ;;  %vm1566_vm6 = vcmask 613376   ;;  %s2150_s4 = sshll.u32 %s580_s2, 4  ;;  %s4553_s4 = int_to_ptr.vmem [resolvable:$true] %s2150_s4 }
 0x308   : > { %v1174_v60 = vadd.f32 %v1170_v11, %v1151_v48  ;;  %p3049_p5 = scmp.lt.s32.totalorder %s4553_s4, %s3047_s22 }
 0x309   : > { %v1190_v12 = vpop.permute.xlu0 %1189 }
 0x30a   : > { %v1188_v9 = vpop.permute.xlu1 %1187 }
 0x30b   : > { %v1192_v37 = vsel %vm1191_vm7, %v1186_v62, %v1188_v9  ;;  %v1193_v59 = vsel %vm1191_vm7, %v1188_v9, %v1190_v12  ;;  %1690 = vrot.lane.b32.xlu0 %v1684_v20, %s3243_s25  ;;  %1717 = vrot.lane.b32.xlu1 %v1709_v23, %s3244_s21  ;;  %v1878_v62 = vld [vmem:[#allocation13] sm:$0xf]  ;;  %v1870_v12 = vld [vmem:[#allocation12] sm:$0xf]  ;;  %vm1589_vm7 = vcmask 482304  }
 0x30c   : > { %v1196_v1 = vadd.f32 %v1192_v37, %v1173_v45  ;;  %v1197_v30 = vadd.f32 %v1193_v59, %v1174_v60  ;;  %v1801_v45 = vmul.f32 %v4305_v29, %v4667_v46  ;;  %v1892_v9 = vld [vmem:[#allocation16 + $0x8] sm:$0xff] }
 0x30d   : > { %v1211_v15 = vpop.permute.xlu0 %1210 }
 0x30e   : > { %v1209_v49 = vpop.permute.xlu1 %1208 }
 0x30f   : > { %v1215_v18 = vsel %vm1214_vm8, %v1209_v49, %v1211_v15  ;;  %1694 = vrot.lane.b32.xlu0 %v1686_v54, %s3243_s25  ;;  %1738 = vrot.lane.b32.xlu1 %v1731_v63, %s3245_s14 }
 0x310   : > { %v1219_v21 = vadd.f32 %v1215_v18, %v1196_v1 }
 0x311   : > { %v1232_v58 = vpop.permute.xlu0 %1231 }
 0x312   : > { %v1213_v13 = vpop.permute.xlu1 %1212 }
 0x313   : > { %v1216_v47 = vsel %vm1214_vm8, %v1211_v15, %v1213_v13  ;;  %1715 = vrot.lane.b32.xlu0 %v1708_v51, %s3244_s21  ;;  %1759 = vrot.lane.b32.xlu1 %v1753_v43, %s3246_s13  ;;  %vm1612_vm8 = vcmask 351232  }
 0x314   : > { %v1220_v35 = vadd.f32 %v1216_v47, %v1197_v30 }
 0x315   : > { %v1236_v28 = vpop.permute.xlu0 %1235 }
 0x316   : > { %v1234_v57 = vpop.permute.xlu1 %1233 }
 0x317   : > { %v1238_v19 = vsel %vm1237_vm9, %v1232_v58, %v1234_v57  ;;  %v1239_v26 = vsel %vm1237_vm9, %v1234_v57, %v1236_v28  ;;  %1736 = vrot.lane.b32.xlu0 %v1730_v38, %s3245_s14  ;;  %1763 = vrot.lane.b32.xlu1 %v1755_v6, %s3246_s13  ;;  %vm1635_vm9 = vcmask 220160  }
 0x318   : > { %v1242_v42 = vadd.f32 %v1238_v19, %v1219_v21  ;;  %v1243_v34 = vadd.f32 %v1239_v26, %v1220_v35 }
 0x319   : > { %v1257_v53 = vpop.permute.xlu0 %1256 }
 0x31a   : > { %v1255_v40 = vpop.permute.xlu1 %1254 }
 0x31b   : > { %v1261_v24 = vsel %vm1260_vm10, %v1255_v40, %v1257_v53  ;;  %1740 = vrot.lane.b32.xlu0 %v1732_v10, %s3245_s14  ;;  %1782 = vrot.lane.b32.xlu1 %v1776_v41, %s3247_s6  ;;  %s4674_s14 = sld [smem:[#allocation48_spill]] }
 0x31c   : > { %v1265_v8 = vadd.f32 %v1261_v24, %v1242_v42 }
 0x31d   : > { %v1278_v14 = vpop.permute.xlu0 %1277 }
 0x31e   : > { %v1259_v3 = vpop.permute.xlu1 %1258 }
 0x31f   : > { %v1262_v32 = vsel %vm1260_vm10, %v1257_v53, %v1259_v3  ;;  %1761 = vrot.lane.b32.xlu0 %v1754_v25, %s3246_s13  ;;  %1784 = vrot.lane.b32.xlu1 %v1777_v36, %s3247_s6  ;;  %vm1673_vm10 = vcmask 998400  }
 0x320   : > { %v1266_v7 = vadd.f32 %v1262_v32, %v1243_v34 }
 0x321   : > { %v1282_v48 = vpop.permute.xlu0 %1281  ;;  %s4551_s13 = scalar_lea.hbm %s4674_s14, %s2365_s17 }
 0x322   : > { %v1280_v39 = vpop.permute.xlu1 %1279 }
 0x323   : > { %v1284_v16 = vsel %vm1283_vm11, %v1278_v14, %v1280_v39  ;;  %v1285_v52 = vsel %vm1283_vm11, %v1280_v39, %v1282_v48  ;;  %1821 = vperm.xlu0 %2659, %v1818_v55   ;;  %1805 = vrot.lane.b32.xlu1 %v1799_v44, %s3248_s16  ;;  %vm1696_vm11 = vcmask 867328  }
 0x324   : > { %v1288_v27 = vadd.f32 %v1284_v16, %v1265_v8  ;;  %v1289_v0 = vadd.f32 %v1285_v52, %v1266_v7 }
 0x325   : > { %v1318_v2 = vpop.permute.xlu0 %1317 }
 0x326   : > { %v1316_v5 = vpop.permute.xlu1 %1315 }
 0x327   : > { %v1322_v22 = vsel %vm1321_vm12, %v1316_v5, %v1318_v2  ;;  %1786 = vrot.lane.b32.xlu0 %v1778_v61, %s3247_s6  ;;  %1809 = vrot.lane.b32.xlu1 %v1801_v45, %s3248_s16  ;;  %s2136_s6 = scalar_lea.sflag [#allocation6], %s3673_s26 }
 0x328   : > { %v1326_v33 = vadd.f32 %v1322_v22, %v1288_v27 }
 0x329   : > { %v1339_v11 = vpop.permute.xlu0 %1338 }
 0x32a   : > { %v1320_v60 = vpop.permute.xlu1 %1319 }
 0x32b   : > { %v1323_v20 = vsel %vm1321_vm12, %v1318_v2, %v1320_v60  ;;  %1807 = vrot.lane.b32.xlu0 %v1800_v17, %s3248_s16  ;;  %1881 = vperm.xlu1 %2673, %v1878_v62   ;;  %vm1719_vm12 = vcmask 736256   ;;  %s3042_s16 = scalar_lea.vmem %s4553_s4, 128 }
 0x32c   : > { %v1327_v23 = vadd.f32 %v1323_v20, %v1289_v0  ;;  %p3043_p6 = scmp.ne.s32.totalorder %s4553_s4, %s3042_s16 }
 0x32d   : > { %v1343_v46 = vpop.permute.xlu0 %1342 }
 0x32e   : > { %v1341_v37 = vpop.permute.xlu1 %1340  ;;  %p3044_p9 = pnand %p3043_p6, %p4675_p12 }
 0x32f   : > { %v1345_v59 = vsel %vm1344_vm13, %v1339_v11, %v1341_v37  ;;  %v1346_v1 = vsel %vm1344_vm13, %v1341_v37, %v1343_v46  ;;  %1873 = vperm.xlu0 %2659, %v1870_v12   ;;  %1900 = vperm.xlu1 %2673, %v1892_v9   ;;  %vm1742_vm13 = vcmask 605184  }
 0x330   : > { %v1349_v30 = vadd.f32 %v1345_v59, %v1326_v33  ;;  %v1350_v54 = vadd.f32 %v1346_v1, %v1327_v23  ;;  %p3045_p3 = pneg %p3044_p9 }
 0x331   : > { %v1364_v29 = vpop.permute.xlu0 %1363 }
 0x332   : > { %v1362_v4 = vpop.permute.xlu1 %1361 }
 0x333   : > { %v1368_v63 = vsel %vm1367_vm14, %v1362_v4, %v1364_v29  ;;  %1895 = vperm.xlu0 %2659, %v1891_v31  }
 0x334   : > { %v1372_v15 = vadd.f32 %v1368_v63, %v1349_v30 }
 0x335   : > { %v1385_v49 = vpop.permute.xlu0 %1384 }
 0x336   : > { %v1366_v18 = vpop.permute.xlu1 %1365 }
 0x337   : > { %v1369_v21 = vsel %vm1367_vm14, %v1364_v29, %v1366_v18  ;;  %vm1765_vm14 = vcmask 474112  }
 0x338   : > { %v1373_v51 = vadd.f32 %v1369_v21, %v1350_v54 }
 0x339   : > { %v1389_v56 = vpop.permute.xlu0 %1388 }
 0x33a   : > { %v1387_v43 = vpop.permute.xlu1 %1386 }
 0x33b   : > { %v1391_v58 = vsel %vm1390_vm15, %v1385_v49, %v1387_v43  ;;  %v1392_v13 = vsel %vm1390_vm15, %v1387_v43, %v1389_v56  ;;  %vm1788_vm15 = vcmask 343040  }
 0x33c   : > { %v1395_v47 = vadd.f32 %v1391_v58, %v1372_v15  ;;  %v1396_v35 = vadd.f32 %v1392_v13, %v1373_v51 }
 0x33d   : > { %v1410_v38 = vpop.permute.xlu0 %1409 }
 0x33e   : > { %v1408_v6 = vpop.permute.xlu1 %1407 }
 0x33f   : > { %v1414_v28 = vsel %vm1413_vm0, %v1408_v6, %v1410_v38 }
 0x340   : > { %v1418_v57 = vadd.f32 %v1414_v28, %v1395_v47 }
 0x341   : > { %v1431_v19 = vpop.permute.xlu0 %1430 }
 0x342   : > { %v1412_v26 = vpop.permute.xlu1 %1411 }
 0x343   : > { %v1415_v42 = vsel %vm1413_vm0, %v1410_v38, %v1412_v26  ;;  %vm1811_vm0 = vcmask 211968  }
 0x344   : > { %v1419_v34 = vadd.f32 %v1415_v42, %v1396_v35 }
 0x345   : > { %v1435_v10 = vpop.permute.xlu0 %1434 }
 0x346   : > { %v1433_v50 = vpop.permute.xlu1 %1432 }
 0x347   : > { %v1437_v41 = vsel %vm1436_vm1, %v1431_v19, %v1433_v50  ;;  %v1438_v53 = vsel %vm1436_vm1, %v1433_v50, %v1435_v10  ;;  %vm1826_vm1 = vcmask 1043456  }
 0x348   : > { %v1441_v40 = vadd.f32 %v1437_v41, %v1418_v57  ;;  %v1442_v24 = vadd.f32 %v1438_v53, %v1419_v34 }
 0x349   : > { %v1456_v8 = vpop.permute.xlu0 %1455 }
 0x34a   : > { %v1454_v25 = vpop.permute.xlu1 %1453 }
 0x34b   : > { %v1460_v36 = vsel %vm1459_vm2, %v1454_v25, %v1456_v8 }
 0x34c   : > { %v1464_v14 = vadd.f32 %v1460_v36, %v1441_v40 }
 0x34d   : > { %v1492_v3 = vpop.permute.xlu0 %1491 }
 0x34e   : > { %v1458_v32 = vpop.permute.xlu1 %1457 }
 0x34f   : > { %v1461_v31 = vsel %vm1459_vm2, %v1456_v8, %v1458_v32  ;;  %vm1907_vm2 = vcmask 1041408  }
 0x350   : > { %v1465_v15 = vadd.f32 %v1461_v31, %v1442_v24 }
 0x351   : > { %v1496_v7 = vpop.permute.xlu0 %1495 }
 0x352   : > { %v1494_v55 = vpop.permute.xlu1 %1493 }
 0x353   : > { %v1498_v4 = vsel %vm1497_vm3, %v1492_v3, %v1494_v55  ;;  %v1499_v63 = vsel %vm1497_vm3, %v1494_v55, %v1496_v7  ;;  %vm1903_vm3 = vcmask 31744  }
 0x354   : > { %v1502_v21 = vadd.f32 %v1498_v4, %v1464_v14  ;;  %v1503_v51 = vadd.f32 %v1499_v63, %v1465_v15 }
 0x355   : > { %v1517_v44 = vpop.permute.xlu0 %1516 }
 0x356   : > { %v1515_v48 = vpop.permute.xlu1 %1514 }
 0x357   : > { %v1521_v49 = vsel %vm1520_vm4, %v1515_v48, %v1517_v44 }
 0x358   : > { %v1525_v47 = vadd.f32 %v1521_v49, %v1502_v21 }
 0x359   : > { %v1538_v39 = vpop.permute.xlu0 %1537 }
 0x35a   : > { %v1519_v16 = vpop.permute.xlu1 %1518 }
 0x35b   : > { %v1522_v18 = vsel %vm1520_vm4, %v1517_v44, %v1519_v16 }
 0x35c   : > { %v1526_v35 = vadd.f32 %v1522_v18, %v1503_v51 }
 0x35d   : > { %v1542_v52 = vpop.permute.xlu0 %1541 }
 0x35e   : > { %v1540_v27 = vpop.permute.xlu1 %1539 }
 0x35f   : > { %v1544_v58 = vsel %vm1543_vm5, %v1538_v39, %v1540_v27  ;;  %v1545_v13 = vsel %vm1543_vm5, %v1540_v27, %v1542_v52 }
 0x360   : > { %v1548_v28 = vadd.f32 %v1544_v58, %v1525_v47  ;;  %v1549_v57 = vadd.f32 %v1545_v13, %v1526_v35 }
 0x361   : > { %v1563_v0 = vpop.permute.xlu0 %1562 }
 0x362   : > { %v1561_v61 = vpop.permute.xlu1 %1560 }
 0x363   : > { %v1567_v38 = vsel %vm1566_vm6, %v1561_v61, %v1563_v0 }
 0x364   : > { %v1571_v34 = vadd.f32 %v1567_v38, %v1548_v28 }
 0x365   : > { %v1584_v45 = vpop.permute.xlu0 %1583 }
 0x366   : > { %v1565_v2 = vpop.permute.xlu1 %1564 }
 0x367   : > { %v1568_v6 = vsel %vm1566_vm6, %v1563_v0, %v1565_v2 }
 0x368   : > { %v1572_v10 = vadd.f32 %v1568_v6, %v1549_v57 }
 0x369   : > { %v1588_v5 = vpop.permute.xlu0 %1587 }
 0x36a   : > { %v1586_v22 = vpop.permute.xlu1 %1585 }
 0x36b   : > { %v1590_v26 = vsel %vm1589_vm7, %v1584_v45, %v1586_v22  ;;  %v1591_v42 = vsel %vm1589_vm7, %v1586_v22, %v1588_v5 }
 0x36c   : > { %v1594_v40 = vadd.f32 %v1590_v26, %v1571_v34  ;;  %v1595_v24 = vadd.f32 %v1591_v42, %v1572_v10 }
 0x36d   : > { %v1609_v33 = vpop.permute.xlu0 %1608 }
 0x36e   : > { %v1607_v62 = vpop.permute.xlu1 %1606 }
 0x36f   : > { %v1613_v41 = vsel %vm1612_vm8, %v1607_v62, %v1609_v33 }
 0x370   : > { %v1617_v14 = vadd.f32 %v1613_v41, %v1594_v40 }
 0x371   : > { %v1630_v17 = vpop.permute.xlu0 %1629 }
 0x372   : > { %v1611_v11 = vpop.permute.xlu1 %1610 }
 0x373   : > { %v1614_v53 = vsel %vm1612_vm8, %v1609_v33, %v1611_v11  ;;  %vm2080_vm8 = vcmask 130048  }
 0x374   : > { %v1618_v3 = vadd.f32 %v1614_v53, %v1595_v24 }
 0x375   : > { %v1634_v60 = vpop.permute.xlu0 %1633 }
 0x376   : > { %v1632_v20 = vpop.permute.xlu1 %1631 }
 0x377   : > { %v1636_v25 = vsel %vm1635_vm9, %v1630_v17, %v1632_v20  ;;  %v1637_v36 = vsel %vm1635_vm9, %v1632_v20, %v1634_v60 }
 0x378   : > { %v1640_v55 = vadd.f32 %v1636_v25, %v1617_v14  ;;  %v1641_v44 = vadd.f32 %v1637_v36, %v1618_v3 }
 0x379   : > { %v1670_v23 = vpop.permute.xlu0 %1669 }
 0x37a   : > { %v1668_v12 = vpop.permute.xlu1 %1667 }
 0x37b   : > { %v1674_v32 = vsel %vm1673_vm10, %v1668_v12, %v1670_v23 }
 0x37c   : > { %v1678_v27 = vadd.f32 %v1674_v32, %v1640_v55 }
 0x37d   : > { %v1691_v46 = vpop.permute.xlu0 %1690 }
 0x37e   : > { %v1672_v9 = vpop.permute.xlu1 %1671 }
 0x37f   : > { %v1675_v7 = vsel %vm1673_vm10, %v1670_v23, %v1672_v9 }
 0x380   : > { %v1679_v0 = vadd.f32 %v1675_v7, %v1641_v44 }
 0x381   : > { %v1695_v59 = vpop.permute.xlu0 %1694 }
 0x382   : > { %v1693_v37 = vpop.permute.xlu1 %1692 }
 0x383   : > { %v1697_v16 = vsel %vm1696_vm11, %v1691_v46, %v1693_v37  ;;  %v1698_v52 = vsel %vm1696_vm11, %v1693_v37, %v1695_v59 }
 0x384   : > { %v1701_v2 = vadd.f32 %v1697_v16, %v1678_v27  ;;  %v1702_v5 = vadd.f32 %v1698_v52, %v1679_v0 }
 0x385   : > { %v1716_v54 = vpop.permute.xlu0 %1715 }
 0x386   : > { %v1714_v1 = vpop.permute.xlu1 %1713 }
 0x387   : > { %v1720_v61 = vsel %vm1719_vm12, %v1714_v1, %v1716_v54 }
 0x388   : > { %v1724_v17 = vadd.f32 %v1720_v61, %v1701_v2 }
 0x389   : > { %v1737_v56 = vpop.permute.xlu0 %1736 }
 0x38a   : > { %v1718_v30 = vpop.permute.xlu1 %1717 }
 0x38b   : > { %v1721_v45 = vsel %vm1719_vm12, %v1716_v54, %v1718_v30 }
 0x38c   : > { %v1725_v11 = vadd.f32 %v1721_v45, %v1702_v5 }
 0x38d   : > { %v1741_v50 = vpop.permute.xlu0 %1740 }
 0x38e   : > { %v1739_v29 = vpop.permute.xlu1 %1738 }
 0x38f   : > { %v1743_v33 = vsel %vm1742_vm13, %v1737_v56, %v1739_v29  ;;  %v1744_v62 = vsel %vm1742_vm13, %v1739_v29, %v1741_v50 }
 0x390   : > { %v1747_v12 = vadd.f32 %v1743_v33, %v1724_v17  ;;  %v1748_v9 = vadd.f32 %v1744_v62, %v1725_v11 }
 0x391   : > { %v1762_v48 = vpop.permute.xlu0 %1761 }
 0x392   : > { %v1760_v43 = vpop.permute.xlu1 %1759 }
 0x393   : > { %v1766_v20 = vsel %vm1765_vm14, %v1760_v43, %v1762_v48 }
 0x394   : > { %v1770_v31 = vadd.f32 %v1766_v20, %v1747_v12 }
 0x396   : > { %v1764_v19 = vpop.permute.xlu1 %1763 }
 0x397   : > { %v1767_v23 = vsel %vm1765_vm14, %v1762_v48, %v1764_v19 }
 0x398   : > { %v1771_v1 = vadd.f32 %v1767_v23, %v1748_v9 }
 0x39a   : > { %v1783_v8 = vpop.permute.xlu1 %1782 }
 0x39e   : > { %v1785_v39 = vpop.permute.xlu1 %1784 }
 0x39f   : > { %v1789_v37 = vsel %vm1788_vm15, %v1783_v8, %v1785_v39 }
 0x3a0   : > { %v1793_v30 = vadd.f32 %v1789_v37, %v1770_v31  ;;  %v1887_v37 = vld [vmem:[#allocation15 + $0x8] sm:$0xff] }
 0x3a2   : > { %v1822_v22 = vpop.permute.xlu0 %1821  ;;  %v1806_v60 = vpop.permute.xlu1 %1805 }
 0x3a6   : > { %v1787_v46 = vpop.permute.xlu0 %1786  ;;  %v1810_v4 = vpop.permute.xlu1 %1809 }
 0x3a7   : > { %v1790_v59 = vsel %vm1788_vm15, %v1785_v39, %v1787_v46  ;;  %v1886_v46 = vld [vmem:[#allocation15] sm:$0xff] }
 0x3a8   : > { %v1794_v54 = vadd.f32 %v1790_v59, %v1771_v1  ;;  %v1888_v1 = vpack.c.bf16 %v1887_v37, %v1886_v46 }
 0x3aa   : > { %v1808_v63 = vpop.permute.xlu0 %1807  ;;  %v1882_v20 = vpop.permute.xlu1 %1881 }
 0x3ab   : > { %v1812_v15 = vsel %vm1811_vm0, %v1806_v60, %v1808_v63  ;;  %v1813_v29 = vsel %vm1811_vm0, %v1808_v63, %v1810_v4 }
 0x3ac   : > { %v1816_v49 = vadd.f32 %v1812_v15, %v1793_v30  ;;  %v1817_v18 = vadd.f32 %v1813_v29, %v1794_v54 }
 0x3ae   : > { %v1824_v21 = vadd.f32 %v1822_v22, %v1816_v49  ;;  %v1825_v51 = vadd.f32 %v1822_v22, %v1817_v18  ;;  %v1874_v62 = vpop.permute.xlu0 %1873  ;;  %v1901_v15 = vpop.permute.xlu1 %1900 }
 0x3b0   : > { %v1827_v56 = vsel %vm1826_vm1, %v1824_v21, 0.0  ;;  %v1834_v43 = vsel %vm1826_vm1, %v1825_v51, 0.0 }
 0x3b1   : > { %v1828_v58 = vrot.slane %v1827_v56, 4  ;;  %v1835_v13 = vrot.slane %v1834_v43, 4 }
 0x3b2   : > { %v1896_v30 = vpop.permute.xlu0 %1895 }
 0x3b3   : > { %v1829_v47 = vadd.f32 %v1828_v58, %v1827_v56  ;;  %v1836_v35 = vadd.f32 %v1835_v13, %v1834_v43 }
 0x3b5   : > { %v1830_v38 = vrot.slane %v1829_v47, 2  ;;  %v1837_v6 = vrot.slane %v1836_v35, 2 }
 0x3b7   : > { %v1831_v28 = vadd.f32 %v1830_v38, %v1829_v47  ;;  %v1838_v57 = vadd.f32 %v1837_v6, %v1836_v35 }
 0x3b9   : > { %v1832_v19 = vrot.slane %v1831_v28, 1  ;;  %v1839_v26 = vrot.slane %v1838_v57, 1 }
 0x3bb   : > { %v1833_v42 = vadd.f32 %v1832_v19, %v1831_v28  ;;  %v1840_v34 = vadd.f32 %v1839_v26, %v1838_v57 }
 0x3bd   : > { %v1842_v10 = vmul.f32 0.25, %v1833_v42  ;;  %v1843_v50 = vmul.f32 0.25, %v1840_v34 }
 0x3bf   : > { %v1844_v41 = vsub.f32 %v1824_v21, %v1842_v10  ;;  %v1845_v53 = vsub.f32 %v1825_v51, %v1843_v50 }
 0x3c1   : > { %v1846_v40 = vmul.f32 %v1844_v41, %v1844_v41  ;;  %v1847_v24 = vmul.f32 %v1845_v53, %v1845_v53 }
 0x3c3   : > { %v1848_v8 = vsel %vm1826_vm1, %v1846_v40, 0.0  ;;  %v1855_v25 = vsel %vm1826_vm1, %v1847_v24, 0.0 }
 0x3c4   : > { %v1849_v36 = vrot.slane %v1848_v8, 4  ;;  %v1856_v14 = vrot.slane %v1855_v25, 4 }
 0x3c6   : > { %v1850_v3 = vadd.f32 %v1849_v36, %v1848_v8  ;;  %v1857_v32 = vadd.f32 %v1856_v14, %v1855_v25 }
 0x3c8   : > { %v1851_v7 = vrot.slane %v1850_v3, 2  ;;  %v1858_v55 = vrot.slane %v1857_v32, 2 }
 0x3ca   : > { %v1852_v44 = vadd.f32 %v1851_v7, %v1850_v3  ;;  %v1859_v48 = vadd.f32 %v1858_v55, %v1857_v32 }
 0x3cc   : > { %v1853_v39 = vrot.slane %v1852_v44, 1  ;;  %v1860_v16 = vrot.slane %v1859_v48, 1 }
 0x3ce   : > { %v1854_v52 = vadd.f32 %v1853_v39, %v1852_v44  ;;  %v1861_v27 = vadd.f32 %v1860_v16, %v1859_v48 }
 0x3d0   : > { %v1862_v0 = vmul.f32 0.25, %v1854_v52  ;;  %v1863_v61 = vmul.f32 0.25, %v1861_v27 }
 0x3d2   : > { %v1864_v45 = vadd.f32 1e-06, %v1862_v0  ;;  %v1865_v2 = vadd.f32 1e-06, %v1863_v61 }
 0x3d4   : > { %2675 = vrsqrt.f32 %v1864_v45 }
 0x3d5   : > { %2677 = vrsqrt.f32 %v1865_v2 }
 0x3de   : > { %v2676_v5 = vpop.eup %2675 }
 0x3df   : > { %v2678_v22 = vpop.eup %2677  ;;  %v1868_v33 = vmul.f32 %v2676_v5, %v1844_v41 }
 0x3e0   : > { %v1869_v17 = vmul.f32 %v2678_v22, %v1845_v53 }
 0x3e1   : > { %v1876_v11 = vmul.f32 %v1874_v62, %v1868_v33 }
 0x3e2   : > { %v1877_v60 = vmul.f32 %v1874_v62, %v1869_v17  ;;  %v2031_v17 = vld [vmem:[#allocation18 + $0x8] sm:$0xff] }
 0x3e3   : > { %v1884_v23 = vadd.f32 %v1882_v20, %v1876_v11  ;;  %v2030_v11 = vld [vmem:[#allocation18] sm:$0xff] }
 0x3e4   : > { %v1885_v12 = vadd.f32 %v1882_v20, %v1877_v60  ;;  %v2051_v60 = vld [vmem:[#allocation19 + $0x8] sm:$0xff]  ;;  %v2050_v20 = vld [vmem:[#allocation19] sm:$0xff] }
 0x3e5   : > { %v1889_v9 = vpack.c.bf16 %v1884_v23, %v1884_v23  ;;  %v2074_v23 = vld [vmem:[#allocation22] sm:$0xf] }
 0x3e6   : > { %v1890_v59 = vpack.c.bf16 %v1885_v12, %v1885_v12 }
 0x3e7   : > { %v1909_v31 = vsel %vm1907_vm2, %v1889_v9, 0 }
 0x3e8   : > { %2356 = vmatprep.subr.msk.bf16.mxu0 %vm1907_vm2, %v1890_v59 }
 0x3e9   : > { %1915 = vmatpush1.bf16.msra.mxu0 %v1909_v31 }
 0x3ec   : > { %2357 = vmatmul.mubr.msk.bf16.vlgmr.msra.gmra.mrb[0].mxu0 %vm1903_vm3, %v1888_v1 }
 0x4bf   : > { %v1948_v54 = vpop.f32.mrb[0].mxu0 }
 0x4c0   : > { %v1949_v4 = vadd.f32 %v1948_v54, %v1896_v30  ;;  %v1950_v63 = vpop.f32.mrb[1].mxu0 }
 0x4c1   : > { %v1951_v29 = vadd.f32 %v1950_v63, %v1896_v30  ;;  %v1952_v49 = vpop.f32.mrb[2].mxu0 }
 0x4c2   : > { %v1961_v18 = vmul.f32 0.044715, %v1949_v4  ;;  %v1953_v21 = vadd.f32 %v1952_v49, %v1901_v15  ;;  %v1954_v51 = vpop.f32.mrb[3].mxu0  ;;  %v1957_v36 = vmul.f32 0.5, %v1949_v4 }
 0x4c3   : > { %v1962_v56 = vmul.f32 0.044715, %v1951_v29  ;;  %v1955_v43 = vadd.f32 %v1954_v51, %v1901_v15  ;;  %v1958_v32 = vmul.f32 0.5, %v1951_v29 }
 0x4c4   : > { %v1965_v58 = vmul.f32 %v1961_v18, %v1949_v4  ;;  %v1963_v13 = vmul.f32 0.044715, %v1953_v21  ;;  %v1959_v48 = vmul.f32 0.5, %v1953_v21 }
 0x4c5   : > { %v1966_v47 = vmul.f32 %v1962_v56, %v1951_v29  ;;  %v1964_v35 = vmul.f32 0.044715, %v1955_v43  ;;  %v1960_v52 = vmul.f32 0.5, %v1955_v43 }
 0x4c6   : > { %v1969_v38 = vmul.f32 %v1965_v58, %v1949_v4  ;;  %v1967_v6 = vmul.f32 %v1963_v13, %v1953_v21 }
 0x4c7   : > { %v1970_v28 = vmul.f32 %v1966_v47, %v1951_v29  ;;  %v1968_v57 = vmul.f32 %v1964_v35, %v1955_v43 }
 0x4c8   : > { %v1973_v19 = vadd.f32 %v1969_v38, %v1949_v4  ;;  %v1971_v26 = vmul.f32 %v1967_v6, %v1953_v21 }
 0x4c9   : > { %v1974_v42 = vadd.f32 %v1970_v28, %v1951_v29  ;;  %v1972_v34 = vmul.f32 %v1968_v57, %v1955_v43 }
 0x4ca   : > { %v1977_v10 = vmul.f32 0.7978846, %v1973_v19  ;;  %v1975_v50 = vadd.f32 %v1971_v26, %v1953_v21 }
 0x4cb   : > { %v1978_v41 = vmul.f32 0.7978846, %v1974_v42  ;;  %v1976_v53 = vadd.f32 %v1972_v34, %v1955_v43 }
 0x4cc   : > { %2679 = vtanh.f32 %v1977_v10  ;;  %v1979_v40 = vmul.f32 0.7978846, %v1975_v50 }
 0x4cd   : > { %2681 = vtanh.f32 %v1978_v41  ;;  %v1980_v24 = vmul.f32 0.7978846, %v1976_v53 }
 0x4ce   : > { %2683 = vtanh.f32 %v1979_v40 }
 0x4cf   : > { %2685 = vtanh.f32 %v1980_v24 }
 0x4d6   : > { %v2680_v8 = vpop.eup %2679 }
 0x4d7   : > { %v2682_v25 = vpop.eup %2681  ;;  %v1985_v14 = vadd.f32 1.0, %v2680_v8 }
 0x4d8   : > { %v2684_v3 = vpop.eup %2683  ;;  %v1986_v7 = vadd.f32 1.0, %v2682_v25 }
 0x4d9   : > { %v2686_v55 = vpop.eup %2685  ;;  %v4519_v44 = vmul.f32 %v1985_v14, %v1957_v36  ;;  %v1987_v39 = vadd.f32 1.0, %v2684_v3 }
 0x4da   : > { %v4521_v16 = vmul.f32 %v1986_v7, %v1958_v32  ;;  %v1988_v27 = vadd.f32 1.0, %v2686_v55  ;;  %v2070_v55 = vld [vmem:[#allocation21] sm:$0xf] }
 0x4db   : > { %v1993_v0 = vmul.f32 %v4519_v44, %v4519_v44  ;;  %v4525_v61 = vmul.f32 %v1987_v39, %v1959_v48 }
 0x4dc   : > { %v1994_v45 = vmul.f32 %v4521_v16, %v4521_v16  ;;  %v4529_v2 = vmul.f32 %v1988_v27, %v1960_v52  ;;  %v2071_v52 = vpack.c.bf16 %v2070_v55, %v2070_v55 }
 0x4dd   : > { %v1995_v5 = vmul.f32 %v4525_v61, %v4525_v61 }
 0x4de   : > { %v1997_v22 = vadd.f32 %v1994_v45, %v1993_v0  ;;  %v1996_v33 = vmul.f32 %v4529_v2, %v4529_v2 }
 0x4e0   : > { %1998 = vadd.xlane.f32.xlu0 %v1997_v22  ;;  %v2000_v62 = vadd.f32 %v1996_v33, %v1995_v5 }
 0x4e2   : > { %2001 = vadd.xlane.f32.xlu1 %v2000_v62 }
 0x4f3   : > { %2043 = vperm.xlu1 %2673, %v2031_v17   ;;  %v2693_v17 = vld [vmem:[%s3679_s30] sm:$0xff]  ;;  %s3048_s30 = scalar_lea.vmem %s3047_s22, 256 }
 0x4f4   : > { %p3050_p11 = scmp.lt.s32.totalorder %s3048_s30, %s3042_s16 }
 0x4f6   : > { %2038 = vperm.xlu0 %2659, %v2030_v11   ;;  %p3051_p13 = por %p3050_p11, %p3049_p5 }
 0x4f7   : > { %2059 = vperm.xlu1 %2673, %v2051_v60  }
 0x4f8   : > { %p3052_p1 = pnand %p3051_p13, %p3045_p3 }
 0x4fa   : > { %2054 = vperm.xlu0 %2659, %v2050_v20  }
 0x4fe   : > { %2077 = vperm.xlu0 %2659, %v2074_v23  }
 0x56d   : > { %v1999_v12 = vpop.xlane.xlu0 %1998 }
 0x56e   : > { %2687 = vrsqrt.f32 %v1999_v12  ;;  %vm2005_vm4 = vcmp.eq.f32.partialorder %v1999_v12, inf  ;;  %v2008_v30 = vand.u32 2147483648, %v1999_v12  ;;  %vm2007_vm6 = vcmp.eq.f32.partialorder %v1999_v12, 0.0 }
 0x56f   : > { %v2002_v9 = vpop.xlane.xlu1 %2001 }
 0x570   : > { %2689 = vrsqrt.f32 %v2002_v9  ;;  %vm2012_vm5 = vcmp.eq.f32.partialorder %v2002_v9, inf  ;;  %v2015_v54 = vand.u32 2147483648, %v2002_v9  ;;  %vm2014_vm7 = vcmp.eq.f32.partialorder %v2002_v9, 0.0 }
 0x573   : > { %v2044_v35 = vpop.permute.xlu1 %2043 }
 0x575   : > { %v2039_v38 = vpop.permute.xlu0 %2038 }
 0x577   : > { %v2060_v53 = vpop.permute.xlu1 %2059 }
 0x578   : > { %v2688_v46 = vpop.eup %2687 }
 0x579   : > { %v2004_v37 = vmul.f32 %v2688_v46, %v1999_v12  ;;  %v2055_v40 = vpop.permute.xlu0 %2054 }
 0x57a   : > { %v2690_v59 = vpop.eup %2689 }
 0x57b   : > { %v2011_v31 = vmul.f32 %v2690_v59, %v2002_v9  ;;  %v2006_v1 = vsel %vm2005_vm4, %v1999_v12, %v2004_v37 }
 0x57c   : > { %v2009_v63 = vsel %vm2007_vm6, %v2008_v30, %v2006_v1 }
 0x57d   : > { %v2013_v4 = vsel %vm2012_vm5, %v2002_v9, %v2011_v31  ;;  %v2078_v27 = vpop.permute.xlu0 %2077 }
 0x57e   : > { %v2016_v15 = vsel %vm2014_vm7, %v2015_v54, %v2013_v4 }
 0x57f   : > { %v2017_v29 = vadd.f32 %v2016_v15, %v2009_v63 }
 0x581   : > { %v2018_v49 = vrot.slane %v2017_v29, 4 }
 0x583   : > { %v2019_v18 = vadd.f32 %v2018_v49, %v2017_v29 }
 0x585   : > { %v2020_v21 = vrot.slane %v2019_v18, 2 }
 0x587   : > { %v2021_v51 = vadd.f32 %v2020_v21, %v2019_v18 }
 0x589   : > { %v2022_v56 = vrot.slane %v2021_v51, 1 }
 0x58b   : > { %v2023_v43 = vadd.f32 %v2022_v56, %v2021_v51 }
 0x58d   : > { %v2025_v58 = vmul.f32 0.0625, %v2023_v43 }
 0x58f   : > { %v2026_v13 = vadd.f32 1e-06, %v2025_v58 }
 0x591   : > { %2691 = vrcp.f32 %v2026_v13 }
 0x59b   : > { %v2692_v47 = vpop.eup %2691 }
 0x59c   : > { %v2029_v6 = vmul.f32 %v2692_v47, %v2016_v15  ;;  %v2028_v28 = vmul.f32 %v2692_v47, %v2009_v63 }
 0x59e   : > { %v2034_v57 = vmul.f32 %v2029_v6, %v4525_v61  ;;  %v2035_v19 = vmul.f32 %v2029_v6, %v4529_v2  ;;  %v2032_v26 = vmul.f32 %v2028_v28, %v4519_v44  ;;  %v2033_v42 = vmul.f32 %v2028_v28, %v4521_v16 }
 0x5a0   : > { %v2048_v34 = vmul.f32 %v2044_v35, %v2034_v57  ;;  %v2049_v10 = vmul.f32 %v2044_v35, %v2035_v19  ;;  %v2046_v50 = vmul.f32 %v2039_v38, %v2032_v26  ;;  %v2047_v41 = vmul.f32 %v2039_v38, %v2033_v42 }
 0x5a2   : > { %v2064_v24 = vadd.f32 %v2060_v53, %v2048_v34  ;;  %v2065_v8 = vadd.f32 %v2060_v53, %v2049_v10  ;;  %v2062_v25 = vadd.f32 %v2055_v40, %v2046_v50  ;;  %v2063_v36 = vadd.f32 %v2055_v40, %v2047_v41 }
 0x5a4   : > { %v2068_v14 = vadd.f32 %v2064_v24, %v4525_v61  ;;  %v2067_v3 = vadd.f32 %v2063_v36, %v4521_v16  ;;  %v2069_v32 = vadd.f32 %v2065_v8, %v4529_v2  ;;  %v2066_v7 = vadd.f32 %v2062_v25, %v4519_v44 }
 0x5a5   : > { %v2126_v61 = vstv %s2125_s28 }
 0x5a6   : > { %v2073_v48 = vpack.c.bf16 %v2069_v32, %v2067_v3  ;;  %v2072_v39 = vpack.c.bf16 %v2068_v14, %v2066_v7 }
 0x5a8   : > { %2084 = vmatprep.subr.bf16.mxu1 %v2073_v48 }
 0x5a9   : > { %2085 = vmatpush1.bf16.msra.mxu1 %v2072_v39 }
 0x5ac   : > { %2358 = vmatmul.mubr.msk.bf16.vlgmr.msra.gmra.mrb[0].mxu1 %vm2080_vm8, %v2071_v52 }
 0x67f   : > { %v2118_v0 = vpop.f32.mrb[0].mxu1 }
 0x680   : > { %v2119_v16 = vadd.f32 %v2118_v0, %v2078_v27  ;;  %v2120_v45 = vpop.f32.mrb[1].mxu1 }
 0x681   : > { %v2121_v2 = vadd.f32 %v2120_v45, %v2078_v27  ;;  %v2122_v44 = vpop.f32.mrb[2].mxu1 }
 0x682   : > { %v2127_v5 = vmul.f32 %v2126_v61, %v2119_v16  ;;  %v2123_v22 = vpop.f32.mrb[3].mxu1 }
 0x683   : > { %v2128_v33 = vmul.f32 %v2126_v61, %v2121_v2 }
 0x685   : > { %v2131_v62 = vcombine.low %v2127_v5, %v2128_v33 }
 0x687   : > { %v2133_v11 = vadd.f32 %v2693_v17, %v2131_v62 }
 0x689   : > { %2134 = vst [vmem:[%s580_s2] sm:$0xff] %v2133_v11 }
 0x68a   : > { %3055 = shalt.err (!%p3052_p1)
}
 0x68b   : > { %s3056_s26 = scalar_lea.hbm %s4551_s13, 128  ;;  %s3060_s2 = scalar_lea.hbm %s4674_s14, 256 }
 0x68c   : > { %p3057_p0 = scmp.ne.s32.totalorder %s4551_s13, %s3056_s26  ;;  %p3061_p10 = scmp.lt.u32.totalorder %s4551_s13, %s4674_s14 }
 0x68d   : > { %p3062_p7 = scmp.lt.u32.totalorder %s3060_s2, %s3056_s26  ;;  %p3064_p6 = scmp.lt.u32.totalorder %s3056_s26, %s4551_s13 }
 0x68e   : > { %p3058_p2 = pnand %p3057_p0, %p4675_p12 }
 0x68f   : > { %p3063_p4 = por %p3062_p7, %p3061_p10 }
 0x690   : > { %p3059_p8 = pneg %p3058_p2 }
 0x691   : > { %p3065_p9 = por %p3064_p6, %p3063_p4 }
 0x693   : > { %p3066_p3 = pnand %p3065_p9, %p3059_p8 }
 0x695   : > { %3069 = shalt.err (!%p3066_p3)
}
 0x696   : > { %2412 = dma.vmem_to_hbm [thread:$0]  (%p4675_p12), %s4553_s4, 128, %s4551_s13, %s2136_s6  }
 0x697 PF: > { %s2162_s16 = sand.u32 1, %s3122_s18   ;;  %p4676_p5 = scmp.ne.s32.totalorder %s4638_s15, 0 }
 0x698   : > { %p4677_p11 = scmp.ge.s32.totalorder %s3134_s0, 2  ;;  %s2163_s23 = scalar_lea.sflag [#allocation6], %s2162_s16 }
 0x69a   : > { %p2453_p13 = pnand %p4677_p11, %p4676_p5 }
 0x69c   : > { %3117 = dma.done.wait (!%p2453_p13), %s2163_s23, 128  }
 0x69d   : > { %3119 = vsyncadd (!%p2453_p13), %s2163_s23, 4294967168  ;;  %p36_p1 = scmp.ge.s32.totalorder %s3603_s29, 4   ;;  %s4678_s18 = smov %s3126_s19 }
 0x69e   : > { %s4679_s19 = smov %s3130_s20  ;;  %s4680_s20 = smov %s3615_s24 }
 0x69f   : > { %s4681_s0 = smov %s3603_s29  ;;  %38 = sbr.rel (!%p36_p1) target bundleno = 24 (0x18), region = 157 }
 0x6a6   :  { %2168 = vsyncpa [#allocation5], 1 }
 0x6a7   :  { %2170 = vsyncpa [#allocation5 + $0x1], 1 }
 0x6a8   :  { %2171 = vsyncpa [#allocation8], 1 }
 0x6a9   :  { %2172 = vsyncpa [#allocation11], 1 }
 0x6aa   :  { %2173 = vsyncpa [#allocation14], 1 }
 0x6ab   :  { %2174 = vsyncpa [#allocation17], 1 }
 0x6ac   :  { %2175 = vsyncpa [#allocation20], 1 }
 0x6ad   :  { %2176 = vsyncpa [#allocation23], 1 }
 0x6ae   :  { %2177 = vsyncpa [#allocation6], 1 }
 0x6af   :  { %2179 = vsyncpa [#allocation6 + $0x1], 1 }

</bundles_post_ra>
